<compile_context>
chip_gen: v6e
topology: v6e:2x2x1
jax: 0.10.0
libtpu: 0.0.40
codegen_flags: <defaults>
</compile_context>

<pallas_src>
import functools

import numpy as np

import jax
import jax.numpy as jnp
from jax.experimental import pallas as pl
from jax.experimental.pallas import tpu as pltpu


# ---------------------------------------------------------------------------
# Host-side helpers mirroring the PyTorch module's constant tensors.
# ---------------------------------------------------------------------------
def relative_position_maps(window_size):
    idx = np.array([[x, y, z]
                    for x in range(window_size)
                    for y in range(window_size)
                    for z in range(window_size)], dtype=np.int64)
    return idx[None, :, :] - idx[:, None, :]            # (ws^3, ws^3, 3)


def create_mask(window_size, displacement, direction):
    ws, d = window_size, displacement
    ninf = float("-inf")
    mask = np.zeros((ws ** 3, ws ** 3), dtype=np.float32)
    if direction[0] == 1:
        mask[-d * ws * ws:, :-d * ws * ws] = ninf
        mask[:-d * ws * ws, -d * ws * ws:] = ninf
    elif direction[1] == 1:
        m = mask.reshape(ws, ws * ws, ws, ws * ws)
        m[:, -d * ws:, :, :-d * ws] = ninf
        m[:, :-d * ws, :, -d * ws:] = ninf
        mask = m.reshape(ws ** 3, ws ** 3)
    else:
        m = mask.reshape(ws * ws, ws, ws * ws, ws)
        m[-d:, :-d] = ninf          # mirrors the original module's indexing
        m[:-d, -d:] = ninf
        mask = m.reshape(ws ** 3, ws ** 3)
    return mask


def build_window_bias(patch_shape, nw_l, nw_h, nw_w, pos_embedding,
                      switch_position, switch_shift):
    """(W, ws^3, ws^3) additive bias = relative-position bias (+ shift masks),
    combined per window exactly the way the PyTorch forward adds them."""
    p = patch_shape
    wsz = p ** 3
    W = nw_l * nw_h * nw_w
    if switch_position:
        rel = relative_position_maps(p) + p - 1
        pos_bias = pos_embedding[rel[..., 0], rel[..., 1], rel[..., 2]]
    else:
        pos_bias = pos_embedding       # (p**2, p**2) -- broadcast like the module
    bias = jnp.broadcast_to(pos_bias.astype(jnp.float32), (W, wsz, wsz))

    if switch_shift:
        disp = p // 2
        upper = jnp.asarray(create_mask(p, disp, (1, 0, 0)))
        left = jnp.asarray(create_mask(p, disp, (0, 1, 0)))
        front = jnp.asarray(create_mask(p, disp, (0, 0, 1)))
        idx = np.arange(W)
        h1 = (idx % (nw_h * nw_w)) // nw_w
        w1 = idx % nw_w
        sel_upper = jnp.asarray(idx >= W - nw_w)          # dots[:, :, -nw_w:]
        sel_left = jnp.asarray(w1 == nw_w - 1)            # dots[:, :, nw_w-1::nw_w]
        sel_front_a = jnp.asarray(h1 == nw_w - 1)         # dots[:, :, :, nw_w-1] (rearranged view)
        sel_front_b = jnp.asarray(w1 == nw_w - 1)         # second front add

        def add(b_, sel, m_):
            return b_ + jnp.where(sel[:, None, None], m_[None], 0.0)

        bias = add(bias, sel_upper, upper)
        bias = add(bias, sel_left, left)
        bias = add(bias, sel_front_a, front)
        bias = add(bias, sel_front_b, front)
    return bias


# ---------------------------------------------------------------------------
# Pallas kernels
# ---------------------------------------------------------------------------
def _linear_kernel(x_ref, w_ref, o_ref):
    o_ref[...] = jnp.dot(x_ref[...], w_ref[...],
                         preferred_element_type=jnp.float32).astype(o_ref.dtype)


def _linear_bias_kernel(x_ref, w_ref, b_ref, o_ref):
    acc = jnp.dot(x_ref[...], w_ref[...], preferred_element_type=jnp.float32)
    o_ref[...] = (acc + b_ref[...]).astype(o_ref.dtype)


def pallas_linear(x, w_kn, bias=None, *, tm=512):
    """y = x @ w_kn (+ bias).  x: (M, K); w_kn: (K, N), already transposed."""
    M, K = x.shape
    Kw, N = w_kn.shape
    assert K == Kw
    tm = min(tm, M)
    if tm != M and tm % 8:
        tm = max(8, (tm // 8) * 8)
    grid = (pl.cdiv(M, tm),)                     # no jnp.pad: tail tile is masked
    x_spec = pl.BlockSpec((tm, K), lambda i: (i, 0))
    w_spec = pl.BlockSpec((K, N), lambda i: (0, 0))     # resident, fetched once
    o_spec = pl.BlockSpec((tm, N), lambda i: (i, 0))
    cparams = pltpu.CompilerParams(dimension_semantics=("parallel",))
    if bias is None:
        return pl.pallas_call(
            _linear_kernel,
            out_shape=jax.ShapeDtypeStruct((M, N), x.dtype),
            grid=grid, in_specs=[x_spec, w_spec], out_specs=o_spec,
            compiler_params=cparams,
        )(x, w_kn)
    return pl.pallas_call(
        _linear_bias_kernel,
        out_shape=jax.ShapeDtypeStruct((M, N), x.dtype),
        grid=grid,
        in_specs=[x_spec, w_spec, pl.BlockSpec((1, N), lambda i: (0, 0))],
        out_specs=o_spec,
        compiler_params=cparams,
    )(x, w_kn, bias.reshape(1, N))


def _window_attn_kernel(q_ref, k_ref, v_ref, bias_ref, o_ref, *, scale):
    q = q_ref[...]                                  # (W, wsz, d)
    k = k_ref[...]
    v = v_ref[...]
    dots = jnp.einsum('wid,wjd->wij', q, k,
                      preferred_element_type=jnp.float32) * scale
    dots = dots + bias_ref[...]                     # pos bias (+ shift masks)
    m = jnp.max(dots, axis=-1, keepdims=True)
    e = jnp.exp(dots - m)
    s = jnp.sum(e, axis=-1, keepdims=True)
    attn = e / s
    out = jnp.einsum('wij,wjd->wid', attn, v,
                     preferred_element_type=jnp.float32)
    o_ref[...] = out.astype(o_ref.dtype)


def pallas_window_attention(q, k, v, window_bias, *, scale):
    """q,k,v: (B*H, W, wsz, d); window_bias: (W, wsz, wsz)."""
    BH, W, wsz, d = q.shape
    kern = functools.partial(_window_attn_kernel, scale=scale)
    qkv_spec = pl.BlockSpec((None, W, wsz, d), lambda i: (i, 0, 0, 0))
    return pl.pallas_call(
        kern,
        out_shape=jax.ShapeDtypeStruct((BH, W, wsz, d), q.dtype),
        grid=(BH,),
        in_specs=[qkv_spec, qkv_spec, qkv_spec,
                  pl.BlockSpec((W, wsz, wsz), lambda i: (0, 0, 0))],
        out_specs=pl.BlockSpec((None, W, wsz, d), lambda i: (i, 0, 0, 0)),
        compiler_params=pltpu.CompilerParams(
            dimension_semantics=("parallel",)),
    )(q, k, v, window_bias)


# ---------------------------------------------------------------------------
# Full MSA_Block forward (glue in JAX, hot paths in Pallas)
# ---------------------------------------------------------------------------
def msa_block_forward(x, w_qkv_kn, w_out_kn, b_out, window_bias, *,
                      num_heads, dim_head, patch_shape, switch_shift):
    # TODO(synk): the patch_shape=None branch (plain sequence attention) is not ported.
    b, n_l, n_h, n_w, dim_seq = x.shape
    p, h, d = patch_shape, num_heads, dim_head
    dim_inner = h * d
    scale = d ** -0.5
    M = b * n_l * n_h * n_w

    # to_qkv (bias-free Linear) over a lane-dense (tokens, features) matrix.
    qkv = pallas_linear(x.reshape(M, dim_seq), w_qkv_kn)
    qkv = qkv.reshape(b, n_l, n_h, n_w, 3 * dim_inner)
    q, k, v = jnp.split(qkv, 3, axis=-1)

    # NOTE: the original module rolls x (patch_shifting) here, but q/k/v were
    # already computed from the unshifted x, so the roll has no effect; skipped.

    nw_l, nw_h, nw_w = n_l // p, n_h // p, n_w // p
    W, wsz = nw_l * nw_h * nw_w, p ** 3

    def to_windows(t):
        t = t.reshape(b, nw_l, p, nw_h, p, nw_w, p, h, d)
        t = jnp.transpose(t, (0, 7, 1, 3, 5, 2, 4, 6, 8))
        return t.reshape(b * h, W, wsz, d)

    qw, kw, vw = (to_windows(t) for t in (q, k, v))
    ow = pallas_window_attention(qw, kw, vw, window_bias, scale=scale)

    # windows -> (b, n_l, n_h, n_w, h*d)
    ow = ow.reshape(b, h, nw_l, nw_h, nw_w, p, p, p, d)
    ow = jnp.transpose(ow, (0, 2, 5, 3, 6, 4, 7, 1, 8))
    out = ow.reshape(M, dim_inner)

    out = pallas_linear(out, w_out_kn, b_out)
    out = out.reshape(b, n_l, n_h, n_w, dim_seq)

    if switch_shift:
        disp = p // 2
        out = jnp.roll(out, shift=(disp, disp, disp), axis=(1, 2, 3))   # patch_restoration
    return out


# ---------------------------------------------------------------------------
# Pure-JAX reference mirroring the PyTorch forward op-by-op
# ---------------------------------------------------------------------------
def ref_forward(x, w_qkv, w_out, b_out, pos_embedding, *,
                num_heads, dim_head, patch_shape, switch_shift, switch_position):
    b, n_l, n_h, n_w, dim_seq = x.shape
    p, h, d = patch_shape, num_heads, dim_head
    scale = d ** -0.5
    qkv = x @ w_qkv.T
    q, k, v = jnp.split(qkv, 3, axis=-1)
    nw_l, nw_h, nw_w = n_l // p, n_h // p, n_w // p
    W, wsz = nw_l * nw_h * nw_w, p ** 3

    def rearr(t):
        t = t.reshape(b, nw_l, p, nw_h, p, nw_w, p, h, d)
        t = jnp.transpose(t, (0, 7, 1, 3, 5, 2, 4, 6, 8))
        return t.reshape(b, h, W, wsz, d)

    q, k, v = map(rearr, (q, k, v))
    dots = jnp.einsum('bhwid,bhwjd->bhwij', q, k) * scale
    if switch_position:
        rel = relative_position_maps(p) + p - 1
        dots = dots + pos_embedding[rel[..., 0], rel[..., 1], rel[..., 2]]
    else:
        dots = dots + pos_embedding
    if switch_shift:
        disp = p // 2
        upper = jnp.asarray(create_mask(p, disp, (1, 0, 0)))
        left = jnp.asarray(create_mask(p, disp, (0, 1, 0)))
        front = jnp.asarray(create_mask(p, disp, (0, 0, 1)))
        dots = dots.at[:, :, -nw_w:].add(upper)
        dots = dots.at[:, :, nw_w - 1::nw_w].add(left)
        dd = dots.reshape(b, h, nw_l, nw_h, nw_w, wsz, wsz)
        dd = jnp.transpose(dd, (0, 1, 2, 4, 3, 5, 6)).reshape(
            b, h, nw_l * nw_w, nw_h, wsz, wsz)
        dd = dd.at[:, :, :, nw_w - 1].add(front)
        dd = dd.reshape(b, h, nw_l, nw_w, nw_h, wsz, wsz)
        dots = jnp.transpose(dd, (0, 1, 2, 4, 3, 5, 6)).reshape(b, h, W, wsz, wsz)
        dots = dots.at[:, :, nw_w - 1::nw_w].add(front)
    attn = jax.nn.softmax(dots, axis=-1)
    out = jnp.einsum('bhwij,bhwjd->bhwid', attn, v)
    out = out.reshape(b, h, nw_l, nw_h, nw_w, p, p, p, d)
    out = jnp.transpose(out, (0, 2, 5, 3, 6, 4, 7, 1, 8)).reshape(
        b, n_l, n_h, n_w, h * d)
    out = out @ w_out.T + b_out
    if switch_shift:
        disp = p // 2
        out = jnp.roll(out, shift=(disp, disp, disp), axis=(1, 2, 3))
    return out


# ---------------------------------------------------------------------------
if __name__ == "__main__":
    b = 2
    n_l = n_h = n_w = 8
    dim_seq = 128
    num_heads, dim_head = 4, 32
    patch_shape = 4
    switch_position = True
    switch_shift = False    # see faithfulness note at the top
    dim_inner = num_heads * dim_head

    key = jax.random.PRNGKey(0)
    kx, kq, ko, kb, kp = jax.random.split(key, 5)
    x = jax.random.normal(kx, (b, n_l, n_h, n_w, dim_seq), jnp.float32)
    # torch nn.Linear layout: weight is (out_features, in_features)
    w_qkv = 0.05 * jax.random.normal(kq, (3 * dim_inner, dim_seq), jnp.float32)
    w_out = 0.05 * jax.random.normal(ko, (dim_seq, dim_inner), jnp.float32)
    b_out = 0.05 * jax.random.normal(kb, (dim_seq,), jnp.float32)
    pos_embedding = jax.random.normal(
        kp, (2 * patch_shape - 1,) * 3, jnp.float32)

    # Pre-transpose weights ONCE to (K, N): no per-call weight.T transpose.
    w_qkv_kn = jnp.asarray(w_qkv.T)
    w_out_kn = jnp.asarray(w_out.T)

    nw_l, nw_h, nw_w = n_l // patch_shape, n_h // patch_shape, n_w // patch_shape
    window_bias = build_window_bias(patch_shape, nw_l, nw_h, nw_w,
                                    pos_embedding, switch_position, switch_shift)

    fwd = jax.jit(functools.partial(
        msa_block_forward,
        num_heads=num_heads, dim_head=dim_head,
        patch_shape=patch_shape, switch_shift=switch_shift))

    y = fwd(x, w_qkv_kn, w_out_kn, b_out, window_bias)
    y = jax.block_until_ready(y)

    y_ref = jax.block_until_ready(ref_forward(
        x, w_qkv, w_out, b_out, pos_embedding,
        num_heads=num_heads, dim_head=dim_head, patch_shape=patch_shape,
        switch_shift=switch_shift, switch_position=switch_position))

    assert y.shape == (b, n_l, n_h, n_w, dim_seq), y.shape
    assert bool(jnp.all(jnp.isfinite(y))), "non-finite output"
    assert jnp.allclose(y, y_ref, atol=2e-2, rtol=2e-2), (
        "mismatch vs reference, max abs diff = %e"
        % float(jnp.max(jnp.abs(y - y_ref))))

    print("KERNEL_OK")
</pallas_src>

<mosaic_0001>
module attributes {stable_mosaic.version = 11 : i64} {
  func.func @_linear_kernel(%arg0: i32, %arg1: memref<512x128xf32, #tpu.memory_space<vmem>>, %arg2: memref<128x384xf32, #tpu.memory_space<vmem>>, %arg3: memref<512x384xf32, #tpu.memory_space<vmem>>) attributes {dimension_semantics = [#tpu.dimension_semantics<parallel>], iteration_bounds = array<i64: 2>, scalar_prefetch = 0 : i64, scratch_operands = 0 : i64, tpu.core_type = #tpu.core_type<tc>, window_params = [{transform_indices = @transform_0, window_bounds = array<i64: 512, 128>}, {pipeline_mode = #tpu.pipeline_mode<synchronous>, transform_indices = @transform_1, window_bounds = array<i64: 128, 384>}, {transform_indices = @transform_2, window_bounds = array<i64: 512, 384>}]} {
    %c0 = arith.constant 0 : index
    %c0_0 = arith.constant 0 : index
    %0 = vector.load %arg1[%c0, %c0_0] : memref<512x128xf32, #tpu.memory_space<vmem>>, vector<512x128xf32>
    %c0_1 = arith.constant 0 : index
    %c0_2 = arith.constant 0 : index
    %1 = vector.load %arg2[%c0_1, %c0_2] : memref<128x384xf32, #tpu.memory_space<vmem>>, vector<128x384xf32>
    %cst = arith.constant dense<0.000000e+00> : vector<512x384xf32>
    %2 = tpu.matmul %0, %1, %cst {dimension_numbers = #tpu.dot_dimension_numbers<[1], [0], [0], [1], [0, 0, 1, 1], [], []>} : vector<512x128xf32>, vector<128x384xf32>, vector<512x384xf32> -> vector<512x384xf32>
    %c0_3 = arith.constant 0 : index
    %c0_4 = arith.constant 0 : index
    %3 = vector.load %arg3[%c0_3, %c0_4] : memref<512x384xf32, #tpu.memory_space<vmem>>, vector<512x384xf32>
    tpu.vector_store %arg3[%c0_3, %c0_4], %2 {strides = array<i32>} : memref<512x384xf32, #tpu.memory_space<vmem>>, vector<512x384xf32>,
    return
  }
  func.func @transform_0(%arg0: i32) -> (i32, i32) {
    %c0_i32 = arith.constant 0 : i32
    %c0_i32_0 = arith.constant 0 : i32
    return %arg0, %c0_i32 : i32, i32
  }
  func.func @transform_1(%arg0: i32) -> (i32, i32) {
    %c0_i32 = arith.constant 0 : i32
    %c0_i32_0 = arith.constant 0 : i32
    %c0_i32_1 = arith.constant 0 : i32
    return %c0_i32, %c0_i32_0 : i32, i32
  }
  func.func @transform_2(%arg0: i32) -> (i32, i32) {
    %c0_i32 = arith.constant 0 : i32
    %c0_i32_0 = arith.constant 0 : i32
    return %arg0, %c0_i32 : i32, i32
  }
}

module attributes {stable_mosaic.version = 11 : i64} {
  func.func @_window_attn_kernel(%arg0: i32, %arg1: memref<1x8x64x32xf32, #tpu.memory_space<vmem>>, %arg2: memref<1x8x64x32xf32, #tpu.memory_space<vmem>>, %arg3: memref<1x8x64x32xf32, #tpu.memory_space<vmem>>, %arg4: memref<8x64x64xf32, #tpu.memory_space<vmem>>, %arg5: memref<1x8x64x32xf32, #tpu.memory_space<vmem>>) attributes {dimension_semantics = [#tpu.dimension_semantics<parallel>], iteration_bounds = array<i64: 8>, scalar_prefetch = 0 : i64, scratch_operands = 0 : i64, tpu.core_type = #tpu.core_type<tc>, window_params = [{transform_indices = @transform_0, window_bounds = array<i64: 1, 8, 64, 32>}, {transform_indices = @transform_1, window_bounds = array<i64: 1, 8, 64, 32>}, {transform_indices = @transform_2, window_bounds = array<i64: 1, 8, 64, 32>}, {pipeline_mode = #tpu.pipeline_mode<synchronous>, transform_indices = @transform_3, window_bounds = array<i64: 8, 64, 64>}, {transform_indices = @transform_4, window_bounds = array<i64: 1, 8, 64, 32>}]} {
    %c0 = arith.constant 0 : index
    %c0_0 = arith.constant 0 : index
    %c0_1 = arith.constant 0 : index
    %c0_2 = arith.constant 0 : index
    %0 = vector.load %arg1[%c0, %c0_0, %c0_1, %c0_2] : memref<1x8x64x32xf32, #tpu.memory_space<vmem>>, vector<1x8x64x32xf32>
    %1 = vector.shape_cast %0 : vector<1x8x64x32xf32> to vector<8x64x32xf32>
    %c0_3 = arith.constant 0 : index
    %c0_4 = arith.constant 0 : index
    %c0_5 = arith.constant 0 : index
    %c0_6 = arith.constant 0 : index
    %2 = vector.load %arg2[%c0_3, %c0_4, %c0_5, %c0_6] : memref<1x8x64x32xf32, #tpu.memory_space<vmem>>, vector<1x8x64x32xf32>
    %3 = vector.shape_cast %2 : vector<1x8x64x32xf32> to vector<8x64x32xf32>
    %c0_7 = arith.constant 0 : index
    %c0_8 = arith.constant 0 : index
    %c0_9 = arith.constant 0 : index
    %c0_10 = arith.constant 0 : index
    %4 = vector.load %arg3[%c0_7, %c0_8, %c0_9, %c0_10] : memref<1x8x64x32xf32, #tpu.memory_space<vmem>>, vector<1x8x64x32xf32>
    %5 = vector.shape_cast %4 : vector<1x8x64x32xf32> to vector<8x64x32xf32>
    "tpu.trace_start"() <{level = 10 : i32, message = "wid,wjd->wij"}> : () -> ()
    %cst = arith.constant dense<0.000000e+00> : vector<8x64x64xf32>
    %6 = tpu.matmul %1, %3, %cst {dimension_numbers = #tpu.dot_dimension_numbers<[2], [2], [1], [1], [0, 0, 0, 1, 1, 1], [0], [0]>} : vector<8x64x32xf32>, vector<8x64x32xf32>, vector<8x64x64xf32> -> vector<8x64x64xf32>
    "tpu.trace_stop"() : () -> ()
    %cst_11 = arith.constant 0.176776692 : f32
    %7 = vector.broadcast %cst_11 : f32 to vector<8x64x64xf32>
    %8 = arith.mulf %6, %7 : vector<8x64x64xf32>
    %c0_12 = arith.constant 0 : index
    %c0_13 = arith.constant 0 : index
    %c0_14 = arith.constant 0 : index
    %9 = vector.load %arg4[%c0_12, %c0_13, %c0_14] : memref<8x64x64xf32, #tpu.memory_space<vmem>>, vector<8x64x64xf32>
    %10 = arith.addf %8, %9 : vector<8x64x64xf32>
    %cst_15 = arith.constant dense<0xFF800000> : vector<8x64xf32>
    %11 = vector.multi_reduction <maximumf>, %10, %cst_15 [2] : vector<8x64x64xf32> to vector<8x64xf32>
    %12 = vector.shape_cast %11 : vector<8x64xf32> to vector<8x64x1xf32>
    %13 = vector.broadcast %12 : vector<8x64x1xf32> to vector<8x64x64xf32>
    %14 = arith.subf %10, %13 : vector<8x64x64xf32>
    %15 = math.exp %14 : vector<8x64x64xf32>
    %cst_16 = arith.constant dense<0.000000e+00> : vector<8x64xf32>
    %16 = vector.multi_reduction <add>, %15, %cst_16 [2] : vector<8x64x64xf32> to vector<8x64xf32>
    %17 = vector.shape_cast %16 : vector<8x64xf32> to vector<8x64x1xf32>
    %18 = vector.broadcast %17 : vector<8x64x1xf32> to vector<8x64x64xf32>
    %19 = arith.divf %15, %18 : vector<8x64x64xf32>
    "tpu.trace_start"() <{level = 10 : i32, message = "wij,wjd->wid"}> : () -> ()
    %cst_17 = arith.constant dense<0.000000e+00> : vector<8x64x32xf32>
    %20 = tpu.matmul %19, %5, %cst_17 {dimension_numbers = #tpu.dot_dimension_numbers<[2], [1], [1], [2], [0, 0, 0, 1, 1, 2], [0], [0]>} : vector<8x64x64xf32>, vector<8x64x32xf32>, vector<8x64x32xf32> -> vector<8x64x32xf32>
    "tpu.trace_stop"() : () -> ()
    %c0_18 = arith.constant 0 : index
    %c0_19 = arith.constant 0 : index
    %c0_20 = arith.constant 0 : index
    %c0_21 = arith.constant 0 : index
    %21 = vector.load %arg5[%c0_18, %c0_19, %c0_20, %c0_21] : memref<1x8x64x32xf32, #tpu.memory_space<vmem>>, vector<1x8x64x32xf32>
    %22 = vector.shape_cast %21 : vector<1x8x64x32xf32> to vector<8x64x32xf32>
    %23 = vector.shape_cast %20 : vector<8x64x32xf32> to vector<1x8x64x32xf32>
    tpu.vector_store %arg5[%c0_18, %c0_19, %c0_20, %c0_21], %23 {strides = array<i32>} : memref<1x8x64x32xf32, #tpu.memory_space<vmem>>, vector<1x8x64x32xf32>,
    return
  }
  func.func @transform_0(%arg0: i32) -> (i32, i32, i32, i32) {
    %c0_i32 = arith.constant 0 : i32
    %c0_i32_0 = arith.constant 0 : i32
    %c0_i32_1 = arith.constant 0 : i32
    %c0_i32_2 = arith.constant 0 : i32
    return %arg0, %c0_i32, %c0_i32_0, %c0_i32_1 : i32, i32, i32, i32
  }
  func.func @transform_1(%arg0: i32) -> (i32, i32, i32, i32) {
    %c0_i32 = arith.constant 0 : i32
    %c0_i32_0 = arith.constant 0 : i32
    %c0_i32_1 = arith.constant 0 : i32
    %c0_i32_2 = arith.constant 0 : i32
    return %arg0, %c0_i32, %c0_i32_0, %c0_i32_1 : i32, i32, i32, i32
  }
  func.func @transform_2(%arg0: i32) -> (i32, i32, i32, i32) {
    %c0_i32 = arith.constant 0 : i32
    %c0_i32_0 = arith.constant 0 : i32
    %c0_i32_1 = arith.constant 0 : i32
    %c0_i32_2 = arith.constant 0 : i32
    return %arg0, %c0_i32, %c0_i32_0, %c0_i32_1 : i32, i32, i32, i32
  }
  func.func @transform_3(%arg0: i32) -> (i32, i32, i32) {
    %c0_i32 = arith.constant 0 : i32
    %c0_i32_0 = arith.constant 0 : i32
    %c0_i32_1 = arith.constant 0 : i32
    %c0_i32_2 = arith.constant 0 : i32
    return %c0_i32, %c0_i32_0, %c0_i32_1 : i32, i32, i32
  }
  func.func @transform_4(%arg0: i32) -> (i32, i32, i32, i32) {
    %c0_i32 = arith.constant 0 : i32
    %c0_i32_0 = arith.constant 0 : i32
    %c0_i32_1 = arith.constant 0 : i32
    %c0_i32_2 = arith.constant 0 : i32
    return %arg0, %c0_i32, %c0_i32_0, %c0_i32_1 : i32, i32, i32, i32
  }
}

module attributes {stable_mosaic.version = 11 : i64} {
  func.func @_linear_bias_kernel(%arg0: i32, %arg1: memref<512x128xf32, #tpu.memory_space<vmem>>, %arg2: memref<128x128xf32, #tpu.memory_space<vmem>>, %arg3: memref<1x128xf32, #tpu.memory_space<vmem>>, %arg4: memref<512x128xf32, #tpu.memory_space<vmem>>) attributes {dimension_semantics = [#tpu.dimension_semantics<parallel>], iteration_bounds = array<i64: 2>, scalar_prefetch = 0 : i64, scratch_operands = 0 : i64, tpu.core_type = #tpu.core_type<tc>, window_params = [{transform_indices = @transform_0, window_bounds = array<i64: 512, 128>}, {pipeline_mode = #tpu.pipeline_mode<synchronous>, transform_indices = @transform_1, window_bounds = array<i64: 128, 128>}, {pipeline_mode = #tpu.pipeline_mode<synchronous>, transform_indices = @transform_2, window_bounds = array<i64: 1, 128>}, {transform_indices = @transform_3, window_bounds = array<i64: 512, 128>}]} {
    %c0 = arith.constant 0 : index
    %c0_0 = arith.constant 0 : index
    %0 = vector.load %arg1[%c0, %c0_0] : memref<512x128xf32, #tpu.memory_space<vmem>>, vector<512x128xf32>
    %c0_1 = arith.constant 0 : index
    %c0_2 = arith.constant 0 : index
    %1 = vector.load %arg2[%c0_1, %c0_2] : memref<128x128xf32, #tpu.memory_space<vmem>>, vector<128x128xf32>
    %cst = arith.constant dense<0.000000e+00> : vector<512x128xf32>
    %2 = tpu.matmul %0, %1, %cst {dimension_numbers = #tpu.dot_dimension_numbers<[1], [0], [0], [1], [0, 0, 1, 1], [], []>} : vector<512x128xf32>, vector<128x128xf32>, vector<512x128xf32> -> vector<512x128xf32>
    %c0_3 = arith.constant 0 : index
    %c0_4 = arith.constant 0 : index
    %3 = vector.load %arg3[%c0_3, %c0_4] : memref<1x128xf32, #tpu.memory_space<vmem>>, vector<1x128xf32>
    %4 = vector.broadcast %3 : vector<1x128xf32> to vector<512x128xf32>
    %5 = arith.addf %2, %4 : vector<512x128xf32>
    %c0_5 = arith.constant 0 : index
    %c0_6 = arith.constant 0 : index
    %6 = vector.load %arg4[%c0_5, %c0_6] : memref<512x128xf32, #tpu.memory_space<vmem>>, vector<512x128xf32>
    tpu.vector_store %arg4[%c0_5, %c0_6], %5 {strides = array<i32>} : memref<512x128xf32, #tpu.memory_space<vmem>>, vector<512x128xf32>,
    return
  }
  func.func @transform_0(%arg0: i32) -> (i32, i32) {
    %c0_i32 = arith.constant 0 : i32
    %c0_i32_0 = arith.constant 0 : i32
    return %arg0, %c0_i32 : i32, i32
  }
  func.func @transform_1(%arg0: i32) -> (i32, i32) {
    %c0_i32 = arith.constant 0 : i32
    %c0_i32_0 = arith.constant 0 : i32
    %c0_i32_1 = arith.constant 0 : i32
    return %c0_i32, %c0_i32_0 : i32, i32
  }
  func.func @transform_2(%arg0: i32) -> (i32, i32) {
    %c0_i32 = arith.constant 0 : i32
    %c0_i32_0 = arith.constant 0 : i32
    %c0_i32_1 = arith.constant 0 : i32
    return %c0_i32, %c0_i32_0 : i32, i32
  }
  func.func @transform_3(%arg0: i32) -> (i32, i32) {
    %c0_i32 = arith.constant 0 : i32
    %c0_i32_0 = arith.constant 0 : i32
    return %arg0, %c0_i32 : i32, i32
  }
}

</mosaic_0001>

<bundles_post_ra>
// kernel: msa_block_forward.3
= control target key start
LH: loop header
LB: loop body
LE: loop exit
PB: predicated region body
PF: predicated region fallthrough
CT: control target
= control target key end

     0   :  { %7 = vsyncpa [#allocation3], 0  ;;  %s2397_s0 = inlined_call_operand.hbm [shape: f32[1024,128], index: 0, kind: input, shape index: {}]   ;;  %s2398_s1 = inlined_call_operand.hbm [shape: f32[128,384], index: 1, kind: input, shape index: {}]   ;;  %s2399_s2 = inlined_call_operand.vmem [shape: f32[1024,384], index: 2, kind: output, shape index: {}]  }
   0x1   :  { %9 = vsyncpa [#allocation3 + $0x1], 0 }
   0x2   :  { %10 = vsyncpa [#allocation5], 0  ;;  %s1828_s9 = smov 0   ;;  %s1830_s10 = smov 0  }
   0x3   :  { %s1832_s11 = smov 0   ;;  %s1834_s12 = smov 0  }
   0x4 LB: > { %s1400_s13 = sadd.s32 4294967295, %s1804_s12   ;;  %p36_p0 = scmp.ne.s32.totalorder %s1796_s10, %s1792_s9  ;;  %s1804_s12 = sphi %s1834_s12, %s2415_s12   ;;  %s1800_s11 = sphi %s1832_s11, %s2414_s11   ;;  %s1796_s10 = sphi %s1830_s10, %s2413_s10   ;;  %s1792_s9 = sphi %s1828_s9, %s2412_s9  }
   0x5   : > { %p1850_p1 = scmp.eq.s32.totalorder %s1400_s13, 0  ;;  %p1402_p2 = scmp.ge.s32.totalorder %s1804_s12, 1 }
   0x6   : > { %p94_p3 = scmp.lt.s32.totalorder %s1804_s12, 3  ;;  %s1806_s17 = smov [#allocation4]  }
   0x7   : > { %s2404_s14 = scalar_select %p1850_p1, 1, 0 }
   0x8   : > { %p1858_p4 = por %p1850_p1, %p36_p0  ;;  %p1862_p5 = pnand %p1402_p2, %p94_p3 }
   0x9   : > { %s106_s18 = sshll.u32 %s1806_s17, 4  ;;  %s1875_s20 = sadd.s32 1, %s1804_s12   ;;  %s107_s18 = int_to_ptr.vmem [resolvable:$true] %s106_s18 }
   0xa   : > { %s2405_s15 = scalar_select %p1858_p4, 1, 0 }
   0xb   : > { %s2406_s16 = scalar_select %p1862_p5, 1, 0 }
   0xc   : > { %p1663_p6 = pneg %p1862_p5  ;;  %s23_s21 = sadd.s32 1, %s1800_s11 }
   0xd   : > { %s20_s22 = ssub.s32 %s1804_s12, %s1875_s20  ;;  %s1723_s23 = scalar_lea.vmem %s107_s18, 6144 }
   0xe   : > { %p1870_p7 = pnand %p1663_p6, %p1850_p1  ;;  %p1724_p9 = scmp.ne.s32.totalorder %s107_s18, %s1723_s23 }
   0xf   : > { %p1731_p12 = scmp.lt.s32.totalorder %s107_s18, %s107_s18  ;;  %p1732_p13 = scmp.lt.s32.totalorder %s1723_s23, %s1723_s23 }
  0x10   : > { %p1714_p8 = pneg %p1870_p7 }
  0x11   : > { %p1733_p0 = por %p1732_p13, %p1731_p12 }
  0x12   : > { %p1726_p10 = pnand %p1724_p9, %p1714_p8 }
  0x14   : > { %p1727_p11 = pneg %p1726_p10 }
  0x16   : > { %p1734_p2 = pnand %p1733_p0, %p1727_p11 }
  0x18   : > { %1737 = shalt.err (!%p1734_p2)
}
  0x19   : > { %s1807_s24 = smov 384   ;;  %s1808_s25 = smov 24  }
  0x1a   : > { %1666 = dma.hbm_to_vmem [thread:$0]  (!%p1870_p7), %s2398_s1, 6144, %s107_s18, [#allocation5], %s1807_s24, %s1807_s24, %s1808_s25  }
  0x1b   : > { %p21_p3 = scmp.eq.s32.totalorder %s20_s22, 0  ;;  %p30_p6 = scmp.ne.s32.totalorder %s1800_s11, %s1796_s10 }
  0x1c   : > { %p31_p8 = scmp.eq.s32.totalorder %s1804_s12, 0  ;;  %p1672_p9 = scmp.lt.s32.totalorder %s1804_s12, 2 }
  0x1d   : > { %s1892_s28 = scalar_select %p21_p3, %s1800_s11, %s23_s21  }
  0x1e   : > { %p32_p10 = por %p31_p8, %p30_p6  ;;  %s120_s29 = sand.u32 1, %s1800_s11  }
  0x1f   : > { %s1405_s30 = sshll.u32 %s120_s29, 9  ;;  %s1415_s3 = sshll.u32 %s1804_s12, 13 }
  0x20   : > { %s1899_s6 = scalar_lea.hbm %s2397_s0, %s1415_s3  ;;  %s124_s7 = scalar_lea.vmem [#allocation2], %s1405_s30 }
  0x21   : > { %s131_s8 = sshll.u32 %s124_s7, 4  ;;  %p1903_p7 = pnand %p1672_p9, %p32_p10  ;;  %s1901_s8 = int_to_ptr.vmem [resolvable:$true] %s131_s8 }
  0x22   : > { %s1907_s17 = scalar_lea.sflag [#allocation3], %s120_s29  ;;  %s1738_s18 = scalar_lea.hbm %s1899_s6, 8192 }
  0x23   : > { %p1739_p11 = scmp.ne.s32.totalorder %s1899_s6, %s1738_s18  ;;  %p1740_p12 = pneg %p1903_p7 }
  0x24   : > { %s1743_s22 = scalar_lea.hbm %s2397_s0, 16384  ;;  %p1744_p2 = scmp.lt.s32.totalorder %s1899_s6, %s2397_s0 }
  0x25   : > { %p1741_p13 = pnand %p1740_p12, %p1739_p11  ;;  %p1745_p3 = scmp.lt.s32.totalorder %s1743_s22, %s1738_s18 }
  0x27   : > { %p1742_p0 = pneg %p1741_p13  ;;  %p1746_p6 = por %p1745_p3, %p1744_p2 }
  0x29   : > { %p1747_p8 = pnand %p1746_p6, %p1742_p0 }
  0x2b   : > { %1750 = shalt.err (!%p1747_p8)
}
  0x2c   : > { %s1751_s25 = scalar_lea.vmem %s1901_s8, 8192  ;;  %s1809_s26 = smov [#allocation2]  }
  0x2d   : > { %p1752_p9 = scmp.ne.s32.totalorder %s1901_s8, %s1751_s25  ;;  %s1756_s27 = sshll.u32 %s1809_s26, 4  ;;  %s1757_s27 = int_to_ptr.vmem [resolvable:$false] %s1756_s27 }
  0x2e   : > { %s1758_s29 = scalar_lea.vmem %s1757_s27, 16384  ;;  %p1759_p13 = scmp.lt.s32.totalorder %s1901_s8, %s1757_s27 }
  0x2f   : > { %p1754_p10 = pnand %p1752_p9, %p1740_p12  ;;  %p1760_p1 = scmp.lt.s32.totalorder %s1758_s29, %s1751_s25 }
  0x31   : > { %p1755_p11 = pneg %p1754_p10  ;;  %p1761_p4 = por %p1760_p1, %p1759_p13 }
  0x33   : > { %p1762_p5 = pnand %p1761_p4, %p1755_p11 }
  0x35   : > { %1765 = shalt.err (!%p1762_p5)
}
  0x36   : > { %s1810_s30 = smov 128   ;;  %s1811_s3 = smov 8  }
  0x37   : > { %1670 = dma.hbm_to_vmem [thread:$0]  (!%p1903_p7), %s1899_s6, 8192, %s1901_s8, %s1907_s17, %s1810_s30, %s1810_s30, %s1811_s3  }
  0x38   : > { %p2409_p12 = scmp.ne.s32.totalorder %s2406_s16, 0 }
  0x39   : > { %s145_s4 = sand.u32 (!%p2409_p12), 1, %s1796_s10   ;;  %p2410_p1 = scmp.ne.s32.totalorder (!%p2409_p12), %s2405_s15, 0 }
  0x3a   : > { %143 = sbr.rel (%p2409_p12) target bundleno = 485 (0x1e5), region = 28  ;;  %s1409_s5 = sshll.u32 (!%p2409_p12), %s145_s4, 9 }
  0x3b   : > { %s146_s7 = scalar_lea.sflag (!%p2409_p12), [#allocation3], %s145_s4  ;;  %s1931_s18 = scalar_lea.vmem (!%p2409_p12), [#allocation2], %s1409_s5 }
  0x3f   : > { %1783 = dma.done.wait (%p2410_p1), %s146_s7, 8192  }
  0x40   : > { %1785 = vsyncadd (%p2410_p1), %s146_s7, 4294959104  ;;  %p2411_p4 = scmp.ne.s32.totalorder %s2404_s14, 0 }
  0x42   : > { %1787 = dma.done.wait (%p2411_p4), [#allocation5], 6144  }
  0x43   : > { %1789 = vsyncadd (%p2411_p4), [#allocation5], 4294961152  ;;  %v1812_v0 = vmov 0.0   ;;  %v293_v1 = vld [vmem:[#allocation4 + $0x170] sm:$0xff]  ;;  %v292_v2 = vld [vmem:[#allocation4 + $0x168] sm:$0xff]  ;;  %s1411_s14 = sshll.u32 %s1400_s13, 6 }
  0x44   : > { %359 = vmatprep.mubr.f32.mxu0 %v1812_v0  ;;  %647 = vmatprep.mubr.f32.mxu1 %v1812_v0  ;;  %v290_v3 = vld [vmem:[#allocation4 + $0x158] sm:$0xff]  ;;  %v289_v4 = vld [vmem:[#allocation4 + $0x150] sm:$0xff]  ;;  %v287_v5 = vld [vmem:[#allocation4 + $0x140] sm:$0xff]  ;;  %p177_p5 = scmp.lt.s32.totalorder %s1411_s14, 127 }
  0x45   : > { %295 = vmatprep.subr.mxu0 %v293_v1  ;;  %1624 = vmatprep.subr.mxu1 %v293_v1  ;;  %v286_v6 = vld [vmem:[#allocation4 + $0x138] sm:$0xff]  ;;  %v284_v7 = vld [vmem:[#allocation4 + $0x128] sm:$0xff]  ;;  %v283_v8 = vld [vmem:[#allocation4 + $0x120] sm:$0xff] }
  0x46   : > { %296 = vmatpush1.msra.mxu0 %v292_v2  ;;  %1640 = vmatpush1.msra.mxu1 %v292_v2  ;;  %v281_v9 = vld [vmem:[#allocation4 + $0x110] sm:$0xff]  ;;  %v280_v10 = vld [vmem:[#allocation4 + $0x108] sm:$0xff]  ;;  %v278_v11 = vld [vmem:[#allocation4 + $0xf8] sm:$0xff]  ;;  %s2417_s14 = smov (!%p177_p5, %s1411_s14), 127 }
  0x47   : > { %297 = vmatprep.subr.mxu0 %v290_v3  ;;  %1625 = vmatprep.subr.mxu1 %v290_v3  ;;  %v277_v12 = vld [vmem:[#allocation4 + $0xf0] sm:$0xff]  ;;  %v275_v13 = vld [vmem:[#allocation4 + $0xe0] sm:$0xff]  ;;  %v274_v14 = vld [vmem:[#allocation4 + $0xd8] sm:$0xff]  ;;  %s1656_s12 = smul.u32 24, %s2417_s14 }
  0x48   : > { %298 = vmatpush1.msra.mxu0 %v289_v4  ;;  %1641 = vmatpush1.msra.mxu1 %v289_v4  ;;  %v272_v15 = vld [vmem:[#allocation4 + $0xc8] sm:$0xff]  ;;  %v271_v16 = vld [vmem:[#allocation4 + $0xc0] sm:$0xff]  ;;  %v269_v17 = vld [vmem:[#allocation4 + $0xb0] sm:$0xff] }
  0x49   : > { %299 = vmatprep.subr.mxu0 %v287_v5  ;;  %1626 = vmatprep.subr.mxu1 %v287_v5  ;;  %v268_v18 = vld [vmem:[#allocation4 + $0xa8] sm:$0xff]  ;;  %v266_v19 = vld [vmem:[#allocation4 + $0x98] sm:$0xff]  ;;  %v265_v20 = vld [vmem:[#allocation4 + $0x90] sm:$0xff]  ;;  %s2190_s16 = scalar_lea.vmem %s2399_s2, %s1656_s12 }
  0x4a   : > { %300 = vmatpush1.msra.mxu0 %v286_v6  ;;  %1642 = vmatpush1.msra.mxu1 %v286_v6  ;;  %v263_v21 = vld [vmem:[#allocation4 + $0x80] sm:$0xff]  ;;  %v262_v22 = vld [vmem:[#allocation4 + $0x78] sm:$0xff]  ;;  %v260_v23 = vld [vmem:[#allocation4 + $0x68] sm:$0xff] }
  0x4b   : > { %301 = vmatprep.subr.mxu0 %v284_v7  ;;  %1627 = vmatprep.subr.mxu1 %v284_v7  ;;  %v259_v24 = vld [vmem:[#allocation4 + $0x60] sm:$0xff]  ;;  %v257_v25 = vld [vmem:[#allocation4 + $0x50] sm:$0xff]  ;;  %v256_v26 = vld [vmem:[#allocation4 + $0x48] sm:$0xff] }
  0x4c   : > { %302 = vmatpush1.msra.mxu0 %v283_v8  ;;  %1643 = vmatpush1.msra.mxu1 %v283_v8  ;;  %v254_v27 = vld [vmem:[#allocation4 + $0x38] sm:$0xff]  ;;  %v253_v28 = vld [vmem:[#allocation4 + $0x30] sm:$0xff]  ;;  %v251_v29 = vld [vmem:[#allocation4 + $0x20] sm:$0xff] }
  0x4d   : > { %303 = vmatprep.subr.mxu0 %v281_v9  ;;  %1628 = vmatprep.subr.mxu1 %v281_v9  ;;  %v250_v30 = vld [vmem:[#allocation4 + $0x18] sm:$0xff]  ;;  %v248_v31 = vld [vmem:[#allocation4 + $0x8] sm:$0xff]  ;;  %v247_v32 = vld [vmem:[#allocation4] sm:$0xff] }
  0x4e   : > { %304 = vmatpush1.msra.mxu0 %v280_v10  ;;  %1644 = vmatpush1.msra.mxu1 %v280_v10  ;;  %v1944_v33 = vld [vmem:[%s1931_s18] sm:$0xff]  ;;  %v294_v35 = vld [vmem:[#allocation4 + $0x178] sm:$0xff]  ;;  %v1953_v37 = vld [vmem:[%s1931_s18 + $0x8] sm:$0xff] }
  0x4f   : > { %305 = vmatprep.subr.mxu0 %v278_v11  ;;  %1629 = vmatprep.subr.mxu1 %v278_v11  ;;  %v1947_v34 = vld [vmem:[%s1931_s18 + $0x180] sm:$0xff]  ;;  %v1956_v38 = vld [vmem:[%s1931_s18 + $0x188] sm:$0xff]  ;;  %v1963_v40 = vld [vmem:[%s1931_s18 + $0x10] sm:$0xff] }
  0x50   : > { %306 = vmatpush1.msra.mxu0 %v277_v12  ;;  %1645 = vmatpush1.msra.mxu1 %v277_v12  ;;  %v291_v36 = vld [vmem:[#allocation4 + $0x160] sm:$0xff]  ;;  %v288_v39 = vld [vmem:[#allocation4 + $0x148] sm:$0xff]  ;;  %v1966_v41 = vld [vmem:[%s1931_s18 + $0x190] sm:$0xff] }
  0x51   : > { %307 = vmatprep.subr.mxu0 %v275_v13  ;;  %1630 = vmatprep.subr.mxu1 %v275_v13  ;;  %v285_v42 = vld [vmem:[#allocation4 + $0x130] sm:$0xff]  ;;  %v1974_v43 = vld [vmem:[%s1931_s18 + $0x18] sm:$0xff]  ;;  %v1984_v46 = vld [vmem:[%s1931_s18 + $0x20] sm:$0xff] }
  0x52   : > { %308 = vmatpush1.msra.mxu0 %v274_v14  ;;  %1646 = vmatpush1.msra.mxu1 %v274_v14  ;;  %v1977_v44 = vld [vmem:[%s1931_s18 + $0x198] sm:$0xff]  ;;  %v1987_v47 = vld [vmem:[%s1931_s18 + $0x1a0] sm:$0xff]  ;;  %v1994_v49 = vld [vmem:[%s1931_s18 + $0x28] sm:$0xff] }
  0x53   : > { %309 = vmatprep.subr.mxu0 %v272_v15  ;;  %1631 = vmatprep.subr.mxu1 %v272_v15  ;;  %v282_v45 = vld [vmem:[#allocation4 + $0x118] sm:$0xff]  ;;  %v279_v48 = vld [vmem:[#allocation4 + $0x100] sm:$0xff]  ;;  %v1997_v50 = vld [vmem:[%s1931_s18 + $0x1a8] sm:$0xff] }
  0x54   : > { %310 = vmatpush1.msra.mxu0 %v271_v16  ;;  %1647 = vmatpush1.msra.mxu1 %v271_v16  ;;  %v276_v51 = vld [vmem:[#allocation4 + $0xe8] sm:$0xff]  ;;  %v2004_v52 = vld [vmem:[%s1931_s18 + $0x30] sm:$0xff]  ;;  %v2014_v55 = vld [vmem:[%s1931_s18 + $0x38] sm:$0xff] }
  0x55   : > { %311 = vmatprep.subr.mxu0 %v269_v17  ;;  %1632 = vmatprep.subr.mxu1 %v269_v17  ;;  %v2007_v53 = vld [vmem:[%s1931_s18 + $0x1b0] sm:$0xff]  ;;  %v2017_v56 = vld [vmem:[%s1931_s18 + $0x1b8] sm:$0xff]  ;;  %v2024_v58 = vld [vmem:[%s1931_s18 + $0x40] sm:$0xff] }
  0x56   : > { %312 = vmatpush1.msra.mxu0 %v268_v18  ;;  %1648 = vmatpush1.msra.mxu1 %v268_v18  ;;  %v273_v54 = vld [vmem:[#allocation4 + $0xd0] sm:$0xff]  ;;  %v270_v57 = vld [vmem:[#allocation4 + $0xb8] sm:$0xff]  ;;  %v2027_v59 = vld [vmem:[%s1931_s18 + $0x1c0] sm:$0xff] }
  0x57   : > { %313 = vmatprep.subr.mxu0 %v266_v19  ;;  %1633 = vmatprep.subr.mxu1 %v266_v19  ;;  %v267_v60 = vld [vmem:[#allocation4 + $0xa0] sm:$0xff]  ;;  %v2034_v61 = vld [vmem:[%s1931_s18 + $0x48] sm:$0xff]  ;;  %v2044_v1 = vld [vmem:[%s1931_s18 + $0x50] sm:$0xff] }
  0x58   : > { %314 = vmatpush1.msra.mxu0 %v265_v20  ;;  %1649 = vmatpush1.msra.mxu1 %v265_v20  ;;  %v2037_v62 = vld [vmem:[%s1931_s18 + $0x1c8] sm:$0xff]  ;;  %v2047_v2 = vld [vmem:[%s1931_s18 + $0x1d0] sm:$0xff]  ;;  %v2054_v4 = vld [vmem:[%s1931_s18 + $0x58] sm:$0xff] }
  0x59   : > { %315 = vmatprep.subr.mxu0 %v263_v21  ;;  %1634 = vmatprep.subr.mxu1 %v263_v21  ;;  %v264_v63 = vld [vmem:[#allocation4 + $0x88] sm:$0xff]  ;;  %v261_v3 = vld [vmem:[#allocation4 + $0x70] sm:$0xff]  ;;  %v2057_v5 = vld [vmem:[%s1931_s18 + $0x1d8] sm:$0xff] }
  0x5a   : > { %316 = vmatpush1.msra.mxu0 %v262_v22  ;;  %1650 = vmatpush1.msra.mxu1 %v262_v22  ;;  %v258_v6 = vld [vmem:[#allocation4 + $0x58] sm:$0xff]  ;;  %v2064_v7 = vld [vmem:[%s1931_s18 + $0x60] sm:$0xff]  ;;  %v196_v10 = vld [vmem:[%s1931_s18 + $0x68] sm:$0xff] }
  0x5b   : > { %317 = vmatprep.subr.mxu0 %v260_v23  ;;  %1635 = vmatprep.subr.mxu1 %v260_v23  ;;  %v2067_v8 = vld [vmem:[%s1931_s18 + $0x1e0] sm:$0xff]  ;;  %v2075_v11 = vld [vmem:[%s1931_s18 + $0x1e8] sm:$0xff]  ;;  %v197_v13 = vld [vmem:[%s1931_s18 + $0x70] sm:$0xff] }
  0x5c   : > { %318 = vmatpush1.msra.mxu0 %v259_v24  ;;  %1651 = vmatpush1.msra.mxu1 %v259_v24  ;;  %v255_v9 = vld [vmem:[#allocation4 + $0x40] sm:$0xff]  ;;  %v252_v12 = vld [vmem:[#allocation4 + $0x28] sm:$0xff]  ;;  %v2082_v14 = vld [vmem:[%s1931_s18 + $0x1f0] sm:$0xff] }
  0x5d   : > { %319 = vmatprep.subr.mxu0 %v257_v25  ;;  %1636 = vmatprep.subr.mxu1 %v257_v25  ;;  %v249_v15 = vld [vmem:[#allocation4 + $0x10] sm:$0xff]  ;;  %v198_v16 = vld [vmem:[%s1931_s18 + $0x78] sm:$0xff]  ;;  %v199_v18 = vld [vmem:[%s1931_s18 + $0x80] sm:$0xff] }
  0x5e   : > { %320 = vmatpush1.msra.mxu0 %v256_v26  ;;  %1652 = vmatpush1.msra.mxu1 %v256_v26  ;;  %v2089_v17 = vld [vmem:[%s1931_s18 + $0x1f8] sm:$0xff]  ;;  %v200_v19 = vld [vmem:[%s1931_s18 + $0x88] sm:$0xff]  ;;  %v201_v20 = vld [vmem:[%s1931_s18 + $0x90] sm:$0xff] }
  0x5f   : > { %321 = vmatprep.subr.mxu0 %v254_v27  ;;  %1637 = vmatprep.subr.mxu1 %v254_v27  ;;  %v202_v21 = vld [vmem:[%s1931_s18 + $0x98] sm:$0xff]  ;;  %v203_v22 = vld [vmem:[%s1931_s18 + $0xa0] sm:$0xff]  ;;  %v204_v23 = vld [vmem:[%s1931_s18 + $0xa8] sm:$0xff] }
  0x60   : > { %322 = vmatpush1.msra.mxu0 %v253_v28  ;;  %1653 = vmatpush1.msra.mxu1 %v253_v28  ;;  %v205_v24 = vld [vmem:[%s1931_s18 + $0xb0] sm:$0xff]  ;;  %v206_v25 = vld [vmem:[%s1931_s18 + $0xb8] sm:$0xff]  ;;  %v207_v26 = vld [vmem:[%s1931_s18 + $0xc0] sm:$0xff] }
  0x61   : > { %323 = vmatprep.subr.mxu0 %v251_v29  ;;  %1638 = vmatprep.subr.mxu1 %v251_v29  ;;  %v208_v27 = vld [vmem:[%s1931_s18 + $0xc8] sm:$0xff]  ;;  %v209_v28 = vld [vmem:[%s1931_s18 + $0xd0] sm:$0xff]  ;;  %v210_v29 = vld [vmem:[%s1931_s18 + $0xd8] sm:$0xff] }
  0x62   : > { %324 = vmatpush1.msra.mxu0 %v250_v30  ;;  %1654 = vmatpush1.msra.mxu1 %v250_v30  ;;  %v211_v30 = vld [vmem:[%s1931_s18 + $0xe0] sm:$0xff] }
  0x63   : > { %325 = vmatprep.subr.mxu0 %v248_v31  ;;  %1639 = vmatprep.subr.mxu1 %v248_v31  ;;  %v212_v31 = vld [vmem:[%s1931_s18 + $0xe8] sm:$0xff] }
  0x64   : > { %326 = vmatpush1.msra.mxu0 %v247_v32  ;;  %1655 = vmatpush1.msra.mxu1 %v247_v32  ;;  %v213_v32 = vld [vmem:[%s1931_s18 + $0xf0] sm:$0xff] }
  0x65   : > { %360 = vmatmul.mubr.f32.vlgmr.msra.gmra.mxu0 %v1944_v33  ;;  %648 = vmatmul.mubr.f32.vlgmr.msra.gmra.mxu1 %v1947_v34 }
  0x66   : > { %1496 = vmatprep.subr.mxu1 %v294_v35  ;;  %365 = vmatprep.mubr.f32.mxu0 %v1812_v0 }
  0x67   : > { %1497 = vmatpush3.msra.mxu1 %v294_v35  ;;  %653 = vmatprep.mubr.f32.mxu1 %v1812_v0  ;;  %v215_v35 = vld [vmem:[%s1931_s18 + $0x100] sm:$0xff] }
  0x68   : > { %1498 = vmatprep.subr.mxu1 %v291_v36 }
  0x69   : > { %366 = vmatmul.mubr.f32.gmra.mxu0 %v1953_v37  ;;  %654 = vmatmul.mubr.f32.gmra.mxu1 %v1956_v38 }
  0x6a   : > { %1499 = vmatpush3.msra.mxu1 %v291_v36  ;;  %371 = vmatprep.mubr.f32.mxu0 %v1812_v0  ;;  %v216_v36 = vld [vmem:[%s1931_s18 + $0x108] sm:$0xff] }
  0x6b   : > { %659 = vmatprep.mubr.f32.mxu1 %v1812_v0  ;;  %1500 = vmatprep.subr.mxu1 %v288_v39 }
  0x6c   : > { %1501 = vmatpush3.msra.mxu1 %v288_v39  ;;  %v218_v39 = vld [vmem:[%s1931_s18 + $0x118] sm:$0xff] }
  0x6d   : > { %372 = vmatmul.mubr.f32.gmra.mxu0 %v1963_v40  ;;  %660 = vmatmul.mubr.f32.gmra.mxu1 %v1966_v41 }
  0x6e   : > { %377 = vmatprep.mubr.f32.mxu0 %v1812_v0  ;;  %665 = vmatprep.mubr.f32.mxu1 %v1812_v0 }
  0x6f   : > { %1502 = vmatprep.subr.mxu1 %v285_v42 }
  0x70   : > { %1503 = vmatpush3.msra.mxu1 %v285_v42  ;;  %v220_v42 = vld [vmem:[%s1931_s18 + $0x128] sm:$0xff] }
  0x71   : > { %378 = vmatmul.mubr.f32.gmra.mxu0 %v1974_v43  ;;  %666 = vmatmul.mubr.f32.gmra.mxu1 %v1977_v44 }
  0x72   : > { %383 = vmatprep.mubr.f32.mxu0 %v1812_v0  ;;  %671 = vmatprep.mubr.f32.mxu1 %v1812_v0 }
  0x73   : > { %1504 = vmatprep.subr.mxu1 %v282_v45 }
  0x74   : > { %1505 = vmatpush3.msra.mxu1 %v282_v45  ;;  %v222_v45 = vld [vmem:[%s1931_s18 + $0x138] sm:$0xff] }
  0x75   : > { %384 = vmatmul.mubr.f32.gmra.mxu0 %v1984_v46  ;;  %672 = vmatmul.mubr.f32.gmra.mxu1 %v1987_v47 }
  0x76   : > { %389 = vmatprep.mubr.f32.mxu0 %v1812_v0  ;;  %677 = vmatprep.mubr.f32.mxu1 %v1812_v0 }
  0x77   : > { %1506 = vmatprep.subr.mxu1 %v279_v48 }
  0x78   : > { %1507 = vmatpush3.msra.mxu1 %v279_v48  ;;  %v224_v48 = vld [vmem:[%s1931_s18 + $0x148] sm:$0xff] }
  0x79   : > { %390 = vmatmul.mubr.f32.gmra.mxu0 %v1994_v49  ;;  %678 = vmatmul.mubr.f32.gmra.mxu1 %v1997_v50 }
  0x7a   : > { %395 = vmatprep.mubr.f32.mxu0 %v1812_v0  ;;  %683 = vmatprep.mubr.f32.mxu1 %v1812_v0 }
  0x7b   : > { %1508 = vmatprep.subr.mxu1 %v276_v51 }
  0x7c   : > { %1509 = vmatpush3.msra.mxu1 %v276_v51  ;;  %v226_v51 = vld [vmem:[%s1931_s18 + $0x158] sm:$0xff] }
  0x7d   : > { %396 = vmatmul.mubr.f32.gmra.mxu0 %v2004_v52  ;;  %684 = vmatmul.mubr.f32.gmra.mxu1 %v2007_v53 }
  0x7e   : > { %401 = vmatprep.mubr.f32.mxu0 %v1812_v0  ;;  %689 = vmatprep.mubr.f32.mxu1 %v1812_v0 }
  0x7f   : > { %1510 = vmatprep.subr.mxu1 %v273_v54 }
  0x80   : > { %1511 = vmatpush3.msra.mxu1 %v273_v54  ;;  %v228_v54 = vld [vmem:[%s1931_s18 + $0x168] sm:$0xff] }
  0x81   : > { %402 = vmatmul.mubr.f32.gmra.mxu0 %v2014_v55  ;;  %690 = vmatmul.mubr.f32.gmra.mxu1 %v2017_v56 }
  0x82   : > { %407 = vmatprep.mubr.f32.mxu0 %v1812_v0  ;;  %695 = vmatprep.mubr.f32.mxu1 %v1812_v0 }
  0x83   : > { %1512 = vmatprep.subr.mxu1 %v270_v57 }
  0x84   : > { %1513 = vmatpush3.msra.mxu1 %v270_v57  ;;  %v230_v57 = vld [vmem:[%s1931_s18 + $0x178] sm:$0xff] }
  0x85   : > { %408 = vmatmul.mubr.f32.gmra.mxu0 %v2024_v58  ;;  %696 = vmatmul.mubr.f32.gmra.mxu1 %v2027_v59 }
  0x86   : > { %413 = vmatprep.mubr.f32.mxu0 %v1812_v0  ;;  %701 = vmatprep.mubr.f32.mxu1 %v1812_v0 }
  0x87   : > { %1514 = vmatprep.subr.mxu1 %v267_v60 }
  0x88   : > { %1515 = vmatpush3.msra.mxu1 %v267_v60 }
  0x89   : > { %414 = vmatmul.mubr.f32.gmra.mxu0 %v2034_v61  ;;  %702 = vmatmul.mubr.f32.gmra.mxu1 %v2037_v62 }
  0x8a   : > { %419 = vmatprep.mubr.f32.mxu0 %v1812_v0  ;;  %707 = vmatprep.mubr.f32.mxu1 %v1812_v0 }
  0x8b   : > { %1516 = vmatprep.subr.mxu1 %v264_v63 }
  0x8c   : > { %1517 = vmatpush3.msra.mxu1 %v264_v63 }
  0x8d   : > { %420 = vmatmul.mubr.f32.gmra.mxu0 %v2044_v1  ;;  %708 = vmatmul.mubr.f32.gmra.mxu1 %v2047_v2 }
  0x8e   : > { %425 = vmatprep.mubr.f32.mxu0 %v1812_v0  ;;  %713 = vmatprep.mubr.f32.mxu1 %v1812_v0 }
  0x8f   : > { %1518 = vmatprep.subr.mxu1 %v261_v3 }
  0x90   : > { %1519 = vmatpush3.msra.mxu1 %v261_v3 }
  0x91   : > { %426 = vmatmul.mubr.f32.gmra.mxu0 %v2054_v4  ;;  %714 = vmatmul.mubr.f32.gmra.mxu1 %v2057_v5 }
  0x92   : > { %431 = vmatprep.mubr.f32.mxu0 %v1812_v0  ;;  %719 = vmatprep.mubr.f32.mxu1 %v1812_v0 }
  0x93   : > { %1520 = vmatprep.subr.mxu1 %v258_v6 }
  0x94   : > { %1521 = vmatpush3.msra.mxu1 %v258_v6 }
  0x95   : > { %432 = vmatmul.mubr.f32.gmra.mxu0 %v2064_v7  ;;  %720 = vmatmul.mubr.f32.gmra.mxu1 %v2067_v8 }
  0x96   : > { %437 = vmatprep.mubr.f32.mxu0 %v1812_v0  ;;  %725 = vmatprep.mubr.f32.mxu1 %v1812_v0 }
  0x97   : > { %1522 = vmatprep.subr.mxu1 %v255_v9 }
  0x98   : > { %1523 = vmatpush3.msra.mxu1 %v255_v9 }
  0x99   : > { %438 = vmatmul.mubr.f32.gmra.mxu0 %v196_v10  ;;  %726 = vmatmul.mubr.f32.gmra.mxu1 %v2075_v11 }
  0x9a   : > { %443 = vmatprep.mubr.f32.mxu0 %v1812_v0  ;;  %731 = vmatprep.mubr.f32.mxu1 %v1812_v0 }
  0x9b   : > { %1524 = vmatprep.subr.mxu1 %v252_v12 }
  0x9c   : > { %1525 = vmatpush3.msra.mxu1 %v252_v12 }
  0x9d   : > { %444 = vmatmul.mubr.f32.gmra.mxu0 %v197_v13  ;;  %732 = vmatmul.mubr.f32.gmra.mxu1 %v2082_v14 }
  0x9e   : > { %449 = vmatprep.mubr.f32.mxu0 %v1812_v0  ;;  %737 = vmatprep.mubr.f32.mxu1 %v1812_v0 }
  0x9f   : > { %1526 = vmatprep.subr.mxu1 %v249_v15 }
  0xa0   : > { %1527 = vmatpush3.msra.mxu1 %v249_v15 }
  0xa1   : > { %450 = vmatmul.mubr.f32.gmra.mxu0 %v198_v16  ;;  %738 = vmatmul.mubr.f32.gmra.mxu1 %v2089_v17 }
  0xa2   : > { %455 = vmatprep.mubr.f32.mxu0 %v1812_v0  ;;  %1528 = vmatprep.mubr.f32.mxu1 %v1944_v33  ;;  %v214_v33 = vld [vmem:[%s1931_s18 + $0xf8] sm:$0xff] }
  0xa5   : > { %456 = vmatmul.mubr.f32.gmra.mxu0 %v199_v18  ;;  %1529 = vmatmul.mubr.f32.vlgmr.msra.gmra.mxu1 %v1953_v37  ;;  %v217_v37 = vld [vmem:[%s1931_s18 + $0x110] sm:$0xff] }
  0xa6   : > { %461 = vmatprep.mubr.f32.mxu0 %v1812_v0  ;;  %1531 = vmatprep.mubr.f32.mxu1 %v1963_v40  ;;  %v219_v40 = vld [vmem:[%s1931_s18 + $0x120] sm:$0xff] }
  0xa9   : > { %462 = vmatmul.mubr.f32.gmra.mxu0 %v200_v19  ;;  %1532 = vmatmul.mubr.f32.gmra.mxu1 %v1974_v43  ;;  %v221_v43 = vld [vmem:[%s1931_s18 + $0x130] sm:$0xff] }
  0xaa   : > { %467 = vmatprep.mubr.f32.mxu0 %v1812_v0  ;;  %1534 = vmatprep.mubr.f32.mxu1 %v1984_v46  ;;  %v223_v46 = vld [vmem:[%s1931_s18 + $0x140] sm:$0xff] }
  0xad   : > { %468 = vmatmul.mubr.f32.gmra.mxu0 %v201_v20  ;;  %1535 = vmatmul.mubr.f32.gmra.mxu1 %v1994_v49  ;;  %v225_v49 = vld [vmem:[%s1931_s18 + $0x150] sm:$0xff] }
  0xae   : > { %473 = vmatprep.mubr.f32.mxu0 %v1812_v0  ;;  %1537 = vmatprep.mubr.f32.mxu1 %v2004_v52  ;;  %v227_v52 = vld [vmem:[%s1931_s18 + $0x160] sm:$0xff] }
  0xb1   : > { %474 = vmatmul.mubr.f32.gmra.mxu0 %v202_v21  ;;  %1538 = vmatmul.mubr.f32.gmra.mxu1 %v2014_v55  ;;  %v229_v55 = vld [vmem:[%s1931_s18 + $0x170] sm:$0xff] }
  0xb2   : > { %479 = vmatprep.mubr.f32.mxu0 %v1812_v0  ;;  %1540 = vmatprep.mubr.f32.mxu1 %v2024_v58 }
  0xb5   : > { %480 = vmatmul.mubr.f32.gmra.mxu0 %v203_v22  ;;  %1541 = vmatmul.mubr.f32.gmra.mxu1 %v2034_v61 }
  0xb6   : > { %485 = vmatprep.mubr.f32.mxu0 %v1812_v0  ;;  %1543 = vmatprep.mubr.f32.mxu1 %v2044_v1 }
  0xb9   : > { %486 = vmatmul.mubr.f32.gmra.mxu0 %v204_v23  ;;  %1544 = vmatmul.mubr.f32.gmra.mxu1 %v2054_v4 }
  0xba   : > { %491 = vmatprep.mubr.f32.mxu0 %v1812_v0  ;;  %1546 = vmatprep.mubr.f32.mxu1 %v2064_v7 }
  0xbd   : > { %492 = vmatmul.mubr.f32.gmra.mxu0 %v205_v24  ;;  %1547 = vmatmul.mubr.f32.gmra.mxu1 %v196_v10 }
  0xbe   : > { %497 = vmatprep.mubr.f32.mxu0 %v1812_v0  ;;  %1549 = vmatprep.mubr.f32.mxu1 %v197_v13 }
  0xc1   : > { %498 = vmatmul.mubr.f32.gmra.mxu0 %v206_v25  ;;  %1550 = vmatmul.mubr.f32.gmra.mxu1 %v198_v16 }
  0xc2   : > { %503 = vmatprep.mubr.f32.mxu0 %v1812_v0  ;;  %1552 = vmatprep.mubr.f32.mxu1 %v199_v18 }
  0xc5   : > { %504 = vmatmul.mubr.f32.gmra.mxu0 %v207_v26  ;;  %1553 = vmatmul.mubr.f32.gmra.mxu1 %v200_v19 }
  0xc6   : > { %509 = vmatprep.mubr.f32.mxu0 %v1812_v0  ;;  %1555 = vmatprep.mubr.f32.mxu1 %v201_v20 }
  0xc9   : > { %510 = vmatmul.mubr.f32.gmra.mxu0 %v208_v27  ;;  %1556 = vmatmul.mubr.f32.gmra.mxu1 %v202_v21 }
  0xca   : > { %515 = vmatprep.mubr.f32.mxu0 %v1812_v0  ;;  %1558 = vmatprep.mubr.f32.mxu1 %v203_v22 }
  0xcd   : > { %516 = vmatmul.mubr.f32.gmra.mxu0 %v209_v28  ;;  %1559 = vmatmul.mubr.f32.gmra.mxu1 %v204_v23 }
  0xce   : > { %521 = vmatprep.mubr.f32.mxu0 %v1812_v0  ;;  %1561 = vmatprep.mubr.f32.mxu1 %v205_v24 }
  0xd1   : > { %522 = vmatmul.mubr.f32.gmra.mxu0 %v210_v29  ;;  %1562 = vmatmul.mubr.f32.gmra.mxu1 %v206_v25 }
  0xd2   : > { %527 = vmatprep.mubr.f32.mxu0 %v1812_v0  ;;  %1564 = vmatprep.mubr.f32.mxu1 %v207_v26 }
  0xd5   : > { %528 = vmatmul.mubr.f32.gmra.mxu0 %v211_v30  ;;  %1565 = vmatmul.mubr.f32.gmra.mxu1 %v208_v27 }
  0xd6   : > { %533 = vmatprep.mubr.f32.mxu0 %v1812_v0  ;;  %1567 = vmatprep.mubr.f32.mxu1 %v209_v28 }
  0xd9   : > { %534 = vmatmul.mubr.f32.gmra.mxu0 %v212_v31  ;;  %1568 = vmatmul.mubr.f32.gmra.mxu1 %v210_v29 }
  0xda   : > { %539 = vmatprep.mubr.f32.mxu0 %v1812_v0  ;;  %1570 = vmatprep.mubr.f32.mxu1 %v211_v30 }
  0xdd   : > { %540 = vmatmul.mubr.f32.gmra.mxu0 %v213_v32  ;;  %1571 = vmatmul.mubr.f32.gmra.mxu1 %v212_v31 }
  0xde   : > { %545 = vmatprep.mubr.f32.mxu0 %v1812_v0  ;;  %1573 = vmatprep.mubr.f32.mxu1 %v213_v32 }
  0xe1   : > { %546 = vmatmul.mubr.f32.gmra.mxu0 %v214_v33  ;;  %1574 = vmatmul.mubr.f32.gmra.mxu1 %v214_v33 }
  0xe2   : > { %551 = vmatprep.mubr.f32.mxu0 %v1812_v0  ;;  %1576 = vmatprep.mubr.f32.mxu1 %v215_v35 }
  0xe5   : > { %552 = vmatmul.mubr.f32.gmra.mxu0 %v215_v35  ;;  %1577 = vmatmul.mubr.f32.gmra.mxu1 %v216_v36 }
  0xe6   : > { %557 = vmatprep.mubr.f32.mxu0 %v1812_v0  ;;  %1579 = vmatprep.mubr.f32.mxu1 %v217_v37 }
  0xe9   : > { %558 = vmatmul.mubr.f32.gmra.mxu0 %v216_v36  ;;  %1580 = vmatmul.mubr.f32.gmra.mxu1 %v218_v39 }
  0xea   : > { %563 = vmatprep.mubr.f32.mxu0 %v1812_v0  ;;  %1582 = vmatprep.mubr.f32.mxu1 %v219_v40 }
  0xed   : > { %564 = vmatmul.mubr.f32.gmra.mxu0 %v217_v37  ;;  %1583 = vmatmul.mubr.f32.gmra.mxu1 %v220_v42 }
  0xee   : > { %569 = vmatprep.mubr.f32.mxu0 %v1812_v0  ;;  %1585 = vmatprep.mubr.f32.mxu1 %v221_v43 }
  0xf1   : > { %570 = vmatmul.mubr.f32.gmra.mxu0 %v218_v39  ;;  %1586 = vmatmul.mubr.f32.gmra.mxu1 %v222_v45 }
  0xf2   : > { %575 = vmatprep.mubr.f32.mxu0 %v1812_v0  ;;  %1588 = vmatprep.mubr.f32.mxu1 %v223_v46 }
  0xf5   : > { %576 = vmatmul.mubr.f32.gmra.mxu0 %v219_v40  ;;  %1589 = vmatmul.mubr.f32.gmra.mxu1 %v224_v48 }
  0xf6   : > { %581 = vmatprep.mubr.f32.mxu0 %v1812_v0  ;;  %1591 = vmatprep.mubr.f32.mxu1 %v225_v49 }
  0xf9   : > { %582 = vmatmul.mubr.f32.gmra.mxu0 %v220_v42  ;;  %1592 = vmatmul.mubr.f32.gmra.mxu1 %v226_v51 }
  0xfa   : > { %587 = vmatprep.mubr.f32.mxu0 %v1812_v0  ;;  %1594 = vmatprep.mubr.f32.mxu1 %v227_v52 }
  0xfd   : > { %588 = vmatmul.mubr.f32.gmra.mxu0 %v221_v43  ;;  %1595 = vmatmul.mubr.f32.gmra.mxu1 %v228_v54 }
  0xfe   : > { %593 = vmatprep.mubr.f32.mxu0 %v1812_v0  ;;  %1597 = vmatprep.mubr.f32.mxu1 %v229_v55 }
 0x101   : > { %594 = vmatmul.mubr.f32.gmra.mxu0 %v222_v45  ;;  %1598 = vmatmul.mubr.f32.gmra.mxu1 %v230_v57 }
 0x102   : > { %599 = vmatprep.mubr.f32.mxu0 %v1812_v0  ;;  %1600 = vmatprep.mubr.f32.mxu1 %v1947_v34 }
 0x105   : > { %600 = vmatmul.mubr.f32.gmra.mxu0 %v223_v46  ;;  %1601 = vmatmul.mubr.f32.gmra.mxu1 %v1956_v38 }
 0x106   : > { %605 = vmatprep.mubr.f32.mxu0 %v1812_v0  ;;  %1603 = vmatprep.mubr.f32.mxu1 %v1966_v41 }
 0x109   : > { %606 = vmatmul.mubr.f32.gmra.mxu0 %v224_v48  ;;  %1604 = vmatmul.mubr.f32.gmra.mxu1 %v1977_v44 }
 0x10a   : > { %611 = vmatprep.mubr.f32.mxu0 %v1812_v0  ;;  %1606 = vmatprep.mubr.f32.mxu1 %v1987_v47 }
 0x10d   : > { %612 = vmatmul.mubr.f32.gmra.mxu0 %v225_v49  ;;  %1607 = vmatmul.mubr.f32.gmra.mxu1 %v1997_v50 }
 0x10e   : > { %617 = vmatprep.mubr.f32.mxu0 %v1812_v0  ;;  %1609 = vmatprep.mubr.f32.mxu1 %v2007_v53 }
 0x111   : > { %618 = vmatmul.mubr.f32.gmra.mxu0 %v226_v51  ;;  %1610 = vmatmul.mubr.f32.gmra.mxu1 %v2017_v56 }
 0x112   : > { %623 = vmatprep.mubr.f32.mxu0 %v1812_v0  ;;  %1612 = vmatprep.mubr.f32.mxu1 %v2027_v59 }
 0x115   : > { %624 = vmatmul.mubr.f32.gmra.mxu0 %v227_v52  ;;  %1613 = vmatmul.mubr.f32.gmra.mxu1 %v2037_v62 }
 0x116   : > { %629 = vmatprep.mubr.f32.mxu0 %v1812_v0  ;;  %1615 = vmatprep.mubr.f32.mxu1 %v2047_v2 }
 0x119   : > { %630 = vmatmul.mubr.f32.gmra.mxu0 %v228_v54  ;;  %1616 = vmatmul.mubr.f32.gmra.mxu1 %v2057_v5 }
 0x11a   : > { %635 = vmatprep.mubr.f32.mxu0 %v1812_v0  ;;  %1618 = vmatprep.mubr.f32.mxu1 %v2067_v8 }
 0x11d   : > { %636 = vmatmul.mubr.f32.gmra.mxu0 %v229_v55  ;;  %1619 = vmatmul.mubr.f32.gmra.mxu1 %v2075_v11 }
 0x11e   : > { %641 = vmatprep.mubr.f32.mxu0 %v1812_v0  ;;  %1621 = vmatprep.mubr.f32.mxu1 %v2082_v14 }
 0x121   : > { %642 = vmatmul.mubr.f32.gmra.mxu0 %v230_v57  ;;  %1622 = vmatmul.mubr.f32.gmra.mxu1 %v2089_v17 }
 0x125   : > { %v361_v0 = vpop.f32.mrf.mxu0  ;;  %v649_v34 = vpop.f32.mrf.mxu1 }
 0x126   : > { %1129 = vst [vmem:[%s2190_s16] sm:$0xff] %v361_v0  ;;  %1273 = vst [vmem:[%s2190_s16 + $0x480] sm:$0xff] %v649_v34 }
 0x127   : > { %v363_v38 = vpop.f32.mrf.mxu0  ;;  %v651_v41 = vpop.f32.mrf.mxu1 }
 0x128   : > { %1130 = vst [vmem:[%s2190_s16 + $0x8] sm:$0xff] %v363_v38  ;;  %1274 = vst [vmem:[%s2190_s16 + $0x488] sm:$0xff] %v651_v41 }
 0x129   : > { %v367_v44 = vpop.f32.mrf.mxu0  ;;  %v655_v47 = vpop.f32.mrf.mxu1 }
 0x12a   : > { %1132 = vst [vmem:[%s2190_s16 + $0x18] sm:$0xff] %v367_v44  ;;  %1276 = vst [vmem:[%s2190_s16 + $0x498] sm:$0xff] %v655_v47 }
 0x12b   : > { %v369_v50 = vpop.f32.mrf.mxu0  ;;  %v657_v53 = vpop.f32.mrf.mxu1 }
 0x12c   : > { %1133 = vst [vmem:[%s2190_s16 + $0x20] sm:$0xff] %v369_v50  ;;  %1277 = vst [vmem:[%s2190_s16 + $0x4a0] sm:$0xff] %v657_v53 }
 0x12d   : > { %v373_v56 = vpop.f32.mrf.mxu0  ;;  %v661_v58 = vpop.f32.mrf.mxu1 }
 0x12e   : > { %1135 = vst [vmem:[%s2190_s16 + $0x30] sm:$0xff] %v373_v56  ;;  %1279 = vst [vmem:[%s2190_s16 + $0x4b0] sm:$0xff] %v661_v58 }
 0x12f   : > { %v375_v59 = vpop.f32.mrf.mxu0  ;;  %v663_v60 = vpop.f32.mrf.mxu1 }
 0x130   : > { %1136 = vst [vmem:[%s2190_s16 + $0x38] sm:$0xff] %v375_v59  ;;  %1280 = vst [vmem:[%s2190_s16 + $0x4b8] sm:$0xff] %v663_v60 }
 0x131   : > { %v379_v61 = vpop.f32.mrf.mxu0  ;;  %v667_v62 = vpop.f32.mrf.mxu1 }
 0x132   : > { %1138 = vst [vmem:[%s2190_s16 + $0x48] sm:$0xff] %v379_v61  ;;  %1282 = vst [vmem:[%s2190_s16 + $0x4c8] sm:$0xff] %v667_v62 }
 0x133   : > { %v381_v63 = vpop.f32.mrf.mxu0  ;;  %v669_v1 = vpop.f32.mrf.mxu1 }
 0x134   : > { %1139 = vst [vmem:[%s2190_s16 + $0x50] sm:$0xff] %v381_v63  ;;  %1283 = vst [vmem:[%s2190_s16 + $0x4d0] sm:$0xff] %v669_v1 }
 0x135   : > { %v385_v2 = vpop.f32.mrf.mxu0  ;;  %v673_v3 = vpop.f32.mrf.mxu1 }
 0x136   : > { %1141 = vst [vmem:[%s2190_s16 + $0x60] sm:$0xff] %v385_v2  ;;  %1285 = vst [vmem:[%s2190_s16 + $0x4e0] sm:$0xff] %v673_v3 }
 0x137   : > { %v387_v4 = vpop.f32.mrf.mxu0  ;;  %v675_v5 = vpop.f32.mrf.mxu1 }
 0x138   : > { %1142 = vst [vmem:[%s2190_s16 + $0x68] sm:$0xff] %v387_v4  ;;  %1286 = vst [vmem:[%s2190_s16 + $0x4e8] sm:$0xff] %v675_v5 }
 0x139   : > { %v391_v6 = vpop.f32.mrf.mxu0  ;;  %v679_v7 = vpop.f32.mrf.mxu1 }
 0x13a   : > { %1144 = vst [vmem:[%s2190_s16 + $0x78] sm:$0xff] %v391_v6  ;;  %1288 = vst [vmem:[%s2190_s16 + $0x4f8] sm:$0xff] %v679_v7 }
 0x13b   : > { %v393_v8 = vpop.f32.mrf.mxu0  ;;  %v681_v9 = vpop.f32.mrf.mxu1 }
 0x13c   : > { %1145 = vst [vmem:[%s2190_s16 + $0x80] sm:$0xff] %v393_v8  ;;  %1289 = vst [vmem:[%s2190_s16 + $0x500] sm:$0xff] %v681_v9 }
 0x13d   : > { %v397_v10 = vpop.f32.mrf.mxu0  ;;  %v685_v11 = vpop.f32.mrf.mxu1 }
 0x13e   : > { %1147 = vst [vmem:[%s2190_s16 + $0x90] sm:$0xff] %v397_v10  ;;  %1291 = vst [vmem:[%s2190_s16 + $0x510] sm:$0xff] %v685_v11 }
 0x13f   : > { %v399_v12 = vpop.f32.mrf.mxu0  ;;  %v687_v13 = vpop.f32.mrf.mxu1 }
 0x140   : > { %1148 = vst [vmem:[%s2190_s16 + $0x98] sm:$0xff] %v399_v12  ;;  %1292 = vst [vmem:[%s2190_s16 + $0x518] sm:$0xff] %v687_v13 }
 0x141   : > { %v403_v14 = vpop.f32.mrf.mxu0  ;;  %v691_v15 = vpop.f32.mrf.mxu1 }
 0x142   : > { %1150 = vst [vmem:[%s2190_s16 + $0xa8] sm:$0xff] %v403_v14  ;;  %1294 = vst [vmem:[%s2190_s16 + $0x528] sm:$0xff] %v691_v15 }
 0x143   : > { %v405_v16 = vpop.f32.mrf.mxu0  ;;  %v693_v17 = vpop.f32.mrf.mxu1 }
 0x144   : > { %1151 = vst [vmem:[%s2190_s16 + $0xb0] sm:$0xff] %v405_v16  ;;  %1295 = vst [vmem:[%s2190_s16 + $0x530] sm:$0xff] %v693_v17 }
 0x145   : > { %v409_v18 = vpop.f32.mrf.mxu0  ;;  %v697_v19 = vpop.f32.mrf.mxu1 }
 0x146   : > { %1153 = vst [vmem:[%s2190_s16 + $0xc0] sm:$0xff] %v409_v18  ;;  %1297 = vst [vmem:[%s2190_s16 + $0x540] sm:$0xff] %v697_v19 }
 0x147   : > { %v411_v20 = vpop.f32.mrf.mxu0  ;;  %v699_v21 = vpop.f32.mrf.mxu1 }
 0x148   : > { %1154 = vst [vmem:[%s2190_s16 + $0xc8] sm:$0xff] %v411_v20  ;;  %1298 = vst [vmem:[%s2190_s16 + $0x548] sm:$0xff] %v699_v21 }
 0x149   : > { %v415_v22 = vpop.f32.mrf.mxu0  ;;  %v703_v23 = vpop.f32.mrf.mxu1 }
 0x14a   : > { %1156 = vst [vmem:[%s2190_s16 + $0xd8] sm:$0xff] %v415_v22  ;;  %1300 = vst [vmem:[%s2190_s16 + $0x558] sm:$0xff] %v703_v23 }
 0x14b   : > { %v417_v24 = vpop.f32.mrf.mxu0  ;;  %v705_v25 = vpop.f32.mrf.mxu1 }
 0x14c   : > { %1157 = vst [vmem:[%s2190_s16 + $0xe0] sm:$0xff] %v417_v24  ;;  %1301 = vst [vmem:[%s2190_s16 + $0x560] sm:$0xff] %v705_v25 }
 0x14d   : > { %v421_v26 = vpop.f32.mrf.mxu0  ;;  %v709_v27 = vpop.f32.mrf.mxu1 }
 0x14e   : > { %1159 = vst [vmem:[%s2190_s16 + $0xf0] sm:$0xff] %v421_v26  ;;  %1303 = vst [vmem:[%s2190_s16 + $0x570] sm:$0xff] %v709_v27 }
 0x14f   : > { %v423_v28 = vpop.f32.mrf.mxu0  ;;  %v711_v29 = vpop.f32.mrf.mxu1 }
 0x150   : > { %1160 = vst [vmem:[%s2190_s16 + $0xf8] sm:$0xff] %v423_v28  ;;  %1304 = vst [vmem:[%s2190_s16 + $0x578] sm:$0xff] %v711_v29 }
 0x151   : > { %v427_v30 = vpop.f32.mrf.mxu0  ;;  %v715_v31 = vpop.f32.mrf.mxu1 }
 0x152   : > { %1162 = vst [vmem:[%s2190_s16 + $0x108] sm:$0xff] %v427_v30  ;;  %1306 = vst [vmem:[%s2190_s16 + $0x588] sm:$0xff] %v715_v31 }
 0x153   : > { %v429_v32 = vpop.f32.mrf.mxu0  ;;  %v717_v33 = vpop.f32.mrf.mxu1 }
 0x154   : > { %1163 = vst [vmem:[%s2190_s16 + $0x110] sm:$0xff] %v429_v32  ;;  %1307 = vst [vmem:[%s2190_s16 + $0x590] sm:$0xff] %v717_v33 }
 0x155   : > { %v433_v35 = vpop.f32.mrf.mxu0  ;;  %v721_v36 = vpop.f32.mrf.mxu1 }
 0x156   : > { %1165 = vst [vmem:[%s2190_s16 + $0x120] sm:$0xff] %v433_v35  ;;  %1309 = vst [vmem:[%s2190_s16 + $0x5a0] sm:$0xff] %v721_v36 }
 0x157   : > { %v435_v37 = vpop.f32.mrf.mxu0  ;;  %v723_v39 = vpop.f32.mrf.mxu1 }
 0x158   : > { %1166 = vst [vmem:[%s2190_s16 + $0x128] sm:$0xff] %v435_v37  ;;  %1310 = vst [vmem:[%s2190_s16 + $0x5a8] sm:$0xff] %v723_v39 }
 0x159   : > { %v439_v40 = vpop.f32.mrf.mxu0  ;;  %v727_v42 = vpop.f32.mrf.mxu1 }
 0x15a   : > { %1168 = vst [vmem:[%s2190_s16 + $0x138] sm:$0xff] %v439_v40  ;;  %1312 = vst [vmem:[%s2190_s16 + $0x5b8] sm:$0xff] %v727_v42 }
 0x15b   : > { %v441_v43 = vpop.f32.mrf.mxu0  ;;  %v729_v45 = vpop.f32.mrf.mxu1 }
 0x15c   : > { %1169 = vst [vmem:[%s2190_s16 + $0x140] sm:$0xff] %v441_v43  ;;  %1313 = vst [vmem:[%s2190_s16 + $0x5c0] sm:$0xff] %v729_v45 }
 0x15d   : > { %v445_v46 = vpop.f32.mrf.mxu0  ;;  %v733_v48 = vpop.f32.mrf.mxu1 }
 0x15e   : > { %1171 = vst [vmem:[%s2190_s16 + $0x150] sm:$0xff] %v445_v46  ;;  %1315 = vst [vmem:[%s2190_s16 + $0x5d0] sm:$0xff] %v733_v48 }
 0x15f   : > { %v447_v49 = vpop.f32.mrf.mxu0  ;;  %v735_v51 = vpop.f32.mrf.mxu1 }
 0x160   : > { %1172 = vst [vmem:[%s2190_s16 + $0x158] sm:$0xff] %v447_v49  ;;  %1316 = vst [vmem:[%s2190_s16 + $0x5d8] sm:$0xff] %v735_v51 }
 0x161   : > { %v451_v52 = vpop.f32.mrf.mxu0  ;;  %v739_v54 = vpop.f32.mrf.mxu1 }
 0x162   : > { %1174 = vst [vmem:[%s2190_s16 + $0x168] sm:$0xff] %v451_v52  ;;  %1318 = vst [vmem:[%s2190_s16 + $0x5e8] sm:$0xff] %v739_v54 }
 0x163   : > { %v453_v55 = vpop.f32.mrf.mxu0  ;;  %v741_v57 = vpop.f32.mrf.mxu1 }
 0x164   : > { %1175 = vst [vmem:[%s2190_s16 + $0x170] sm:$0xff] %v453_v55  ;;  %1319 = vst [vmem:[%s2190_s16 + $0x5f0] sm:$0xff] %v741_v57 }
 0x165   : > { %v457_v0 = vpop.f32.mrf.mxu0  ;;  %v1530_v34 = vpop.f32.mrf.mxu1 }
 0x166   : > { %1177 = vst [vmem:[%s2190_s16 + $0x180] sm:$0xff] %v457_v0  ;;  %1134 = vst [vmem:[%s2190_s16 + $0x28] sm:$0xff] %v1530_v34 }
 0x167   : > { %v459_v38 = vpop.f32.mrf.mxu0  ;;  %v810_v41 = vpop.f32.mrf.mxu1 }
 0x168   : > { %1178 = vst [vmem:[%s2190_s16 + $0x188] sm:$0xff] %v459_v38  ;;  %1131 = vst [vmem:[%s2190_s16 + $0x10] sm:$0xff] %v810_v41 }
 0x169   : > { %v463_v44 = vpop.f32.mrf.mxu0  ;;  %v1533_v47 = vpop.f32.mrf.mxu1 }
 0x16a   : > { %1180 = vst [vmem:[%s2190_s16 + $0x198] sm:$0xff] %v463_v44  ;;  %1140 = vst [vmem:[%s2190_s16 + $0x58] sm:$0xff] %v1533_v47 }
 0x16b   : > { %v465_v50 = vpop.f32.mrf.mxu0  ;;  %v820_v53 = vpop.f32.mrf.mxu1 }
 0x16c   : > { %1181 = vst [vmem:[%s2190_s16 + $0x1a0] sm:$0xff] %v465_v50  ;;  %1137 = vst [vmem:[%s2190_s16 + $0x40] sm:$0xff] %v820_v53 }
 0x16d   : > { %v469_v56 = vpop.f32.mrf.mxu0  ;;  %v1536_v58 = vpop.f32.mrf.mxu1 }
 0x16e   : > { %1183 = vst [vmem:[%s2190_s16 + $0x1b0] sm:$0xff] %v469_v56  ;;  %1146 = vst [vmem:[%s2190_s16 + $0x88] sm:$0xff] %v1536_v58 }
 0x16f   : > { %v471_v59 = vpop.f32.mrf.mxu0  ;;  %v830_v60 = vpop.f32.mrf.mxu1 }
 0x170   : > { %1184 = vst [vmem:[%s2190_s16 + $0x1b8] sm:$0xff] %v471_v59  ;;  %1143 = vst [vmem:[%s2190_s16 + $0x70] sm:$0xff] %v830_v60 }
 0x171   : > { %v475_v61 = vpop.f32.mrf.mxu0  ;;  %v1539_v62 = vpop.f32.mrf.mxu1 }
 0x172   : > { %1186 = vst [vmem:[%s2190_s16 + $0x1c8] sm:$0xff] %v475_v61  ;;  %1152 = vst [vmem:[%s2190_s16 + $0xb8] sm:$0xff] %v1539_v62 }
 0x173   : > { %v477_v63 = vpop.f32.mrf.mxu0  ;;  %v840_v1 = vpop.f32.mrf.mxu1 }
 0x174   : > { %1187 = vst [vmem:[%s2190_s16 + $0x1d0] sm:$0xff] %v477_v63  ;;  %1149 = vst [vmem:[%s2190_s16 + $0xa0] sm:$0xff] %v840_v1 }
 0x175   : > { %v481_v2 = vpop.f32.mrf.mxu0  ;;  %v1542_v3 = vpop.f32.mrf.mxu1 }
 0x176   : > { %1189 = vst [vmem:[%s2190_s16 + $0x1e0] sm:$0xff] %v481_v2  ;;  %1158 = vst [vmem:[%s2190_s16 + $0xe8] sm:$0xff] %v1542_v3 }
 0x177   : > { %v483_v4 = vpop.f32.mrf.mxu0  ;;  %v850_v5 = vpop.f32.mrf.mxu1 }
 0x178   : > { %1190 = vst [vmem:[%s2190_s16 + $0x1e8] sm:$0xff] %v483_v4  ;;  %1155 = vst [vmem:[%s2190_s16 + $0xd0] sm:$0xff] %v850_v5 }
 0x179   : > { %v487_v6 = vpop.f32.mrf.mxu0  ;;  %v1545_v7 = vpop.f32.mrf.mxu1 }
 0x17a   : > { %1192 = vst [vmem:[%s2190_s16 + $0x1f8] sm:$0xff] %v487_v6  ;;  %1164 = vst [vmem:[%s2190_s16 + $0x118] sm:$0xff] %v1545_v7 }
 0x17b   : > { %v489_v8 = vpop.f32.mrf.mxu0  ;;  %v860_v9 = vpop.f32.mrf.mxu1 }
 0x17c   : > { %1193 = vst [vmem:[%s2190_s16 + $0x200] sm:$0xff] %v489_v8  ;;  %1161 = vst [vmem:[%s2190_s16 + $0x100] sm:$0xff] %v860_v9 }
 0x17d   : > { %v493_v10 = vpop.f32.mrf.mxu0  ;;  %v1548_v11 = vpop.f32.mrf.mxu1 }
 0x17e   : > { %1195 = vst [vmem:[%s2190_s16 + $0x210] sm:$0xff] %v493_v10  ;;  %1170 = vst [vmem:[%s2190_s16 + $0x148] sm:$0xff] %v1548_v11 }
 0x17f   : > { %v495_v12 = vpop.f32.mrf.mxu0  ;;  %v870_v13 = vpop.f32.mrf.mxu1 }
 0x180   : > { %1196 = vst [vmem:[%s2190_s16 + $0x218] sm:$0xff] %v495_v12  ;;  %1167 = vst [vmem:[%s2190_s16 + $0x130] sm:$0xff] %v870_v13 }
 0x181   : > { %v499_v14 = vpop.f32.mrf.mxu0  ;;  %v1551_v15 = vpop.f32.mrf.mxu1 }
 0x182   : > { %1198 = vst [vmem:[%s2190_s16 + $0x228] sm:$0xff] %v499_v14  ;;  %1176 = vst [vmem:[%s2190_s16 + $0x178] sm:$0xff] %v1551_v15 }
 0x183   : > { %v501_v16 = vpop.f32.mrf.mxu0  ;;  %v880_v17 = vpop.f32.mrf.mxu1 }
 0x184   : > { %1199 = vst [vmem:[%s2190_s16 + $0x230] sm:$0xff] %v501_v16  ;;  %1173 = vst [vmem:[%s2190_s16 + $0x160] sm:$0xff] %v880_v17 }
 0x185   : > { %v505_v18 = vpop.f32.mrf.mxu0  ;;  %v1554_v19 = vpop.f32.mrf.mxu1 }
 0x186   : > { %1201 = vst [vmem:[%s2190_s16 + $0x240] sm:$0xff] %v505_v18  ;;  %1182 = vst [vmem:[%s2190_s16 + $0x1a8] sm:$0xff] %v1554_v19 }
 0x187   : > { %v507_v20 = vpop.f32.mrf.mxu0  ;;  %v890_v21 = vpop.f32.mrf.mxu1 }
 0x188   : > { %1202 = vst [vmem:[%s2190_s16 + $0x248] sm:$0xff] %v507_v20  ;;  %1179 = vst [vmem:[%s2190_s16 + $0x190] sm:$0xff] %v890_v21 }
 0x189   : > { %v511_v22 = vpop.f32.mrf.mxu0  ;;  %v1557_v23 = vpop.f32.mrf.mxu1 }
 0x18a   : > { %1204 = vst [vmem:[%s2190_s16 + $0x258] sm:$0xff] %v511_v22  ;;  %1188 = vst [vmem:[%s2190_s16 + $0x1d8] sm:$0xff] %v1557_v23 }
 0x18b   : > { %v513_v24 = vpop.f32.mrf.mxu0  ;;  %v900_v25 = vpop.f32.mrf.mxu1 }
 0x18c   : > { %1205 = vst [vmem:[%s2190_s16 + $0x260] sm:$0xff] %v513_v24  ;;  %1185 = vst [vmem:[%s2190_s16 + $0x1c0] sm:$0xff] %v900_v25 }
 0x18d   : > { %v517_v26 = vpop.f32.mrf.mxu0  ;;  %v1560_v27 = vpop.f32.mrf.mxu1 }
 0x18e   : > { %1207 = vst [vmem:[%s2190_s16 + $0x270] sm:$0xff] %v517_v26  ;;  %1194 = vst [vmem:[%s2190_s16 + $0x208] sm:$0xff] %v1560_v27 }
 0x18f   : > { %v519_v28 = vpop.f32.mrf.mxu0  ;;  %v910_v29 = vpop.f32.mrf.mxu1 }
 0x190   : > { %1208 = vst [vmem:[%s2190_s16 + $0x278] sm:$0xff] %v519_v28  ;;  %1191 = vst [vmem:[%s2190_s16 + $0x1f0] sm:$0xff] %v910_v29 }
 0x191   : > { %v523_v30 = vpop.f32.mrf.mxu0  ;;  %v1563_v31 = vpop.f32.mrf.mxu1 }
 0x192   : > { %1210 = vst [vmem:[%s2190_s16 + $0x288] sm:$0xff] %v523_v30  ;;  %1200 = vst [vmem:[%s2190_s16 + $0x238] sm:$0xff] %v1563_v31 }
 0x193   : > { %v525_v32 = vpop.f32.mrf.mxu0  ;;  %v920_v33 = vpop.f32.mrf.mxu1 }
 0x194   : > { %1211 = vst [vmem:[%s2190_s16 + $0x290] sm:$0xff] %v525_v32  ;;  %1197 = vst [vmem:[%s2190_s16 + $0x220] sm:$0xff] %v920_v33 }
 0x195   : > { %v529_v35 = vpop.f32.mrf.mxu0  ;;  %v1566_v36 = vpop.f32.mrf.mxu1 }
 0x196   : > { %1213 = vst [vmem:[%s2190_s16 + $0x2a0] sm:$0xff] %v529_v35  ;;  %1206 = vst [vmem:[%s2190_s16 + $0x268] sm:$0xff] %v1566_v36 }
 0x197   : > { %v531_v37 = vpop.f32.mrf.mxu0  ;;  %v930_v39 = vpop.f32.mrf.mxu1 }
 0x198   : > { %1214 = vst [vmem:[%s2190_s16 + $0x2a8] sm:$0xff] %v531_v37  ;;  %1203 = vst [vmem:[%s2190_s16 + $0x250] sm:$0xff] %v930_v39 }
 0x199   : > { %v535_v40 = vpop.f32.mrf.mxu0  ;;  %v1569_v42 = vpop.f32.mrf.mxu1 }
 0x19a   : > { %1216 = vst [vmem:[%s2190_s16 + $0x2b8] sm:$0xff] %v535_v40  ;;  %1212 = vst [vmem:[%s2190_s16 + $0x298] sm:$0xff] %v1569_v42 }
 0x19b   : > { %v537_v43 = vpop.f32.mrf.mxu0  ;;  %v940_v45 = vpop.f32.mrf.mxu1 }
 0x19c   : > { %1217 = vst [vmem:[%s2190_s16 + $0x2c0] sm:$0xff] %v537_v43  ;;  %1209 = vst [vmem:[%s2190_s16 + $0x280] sm:$0xff] %v940_v45 }
 0x19d   : > { %v541_v46 = vpop.f32.mrf.mxu0  ;;  %v1572_v48 = vpop.f32.mrf.mxu1 }
 0x19e   : > { %1219 = vst [vmem:[%s2190_s16 + $0x2d0] sm:$0xff] %v541_v46  ;;  %1218 = vst [vmem:[%s2190_s16 + $0x2c8] sm:$0xff] %v1572_v48 }
 0x19f   : > { %v543_v49 = vpop.f32.mrf.mxu0  ;;  %v950_v51 = vpop.f32.mrf.mxu1 }
 0x1a0   : > { %1220 = vst [vmem:[%s2190_s16 + $0x2d8] sm:$0xff] %v543_v49  ;;  %1215 = vst [vmem:[%s2190_s16 + $0x2b0] sm:$0xff] %v950_v51 }
 0x1a1   : > { %v547_v52 = vpop.f32.mrf.mxu0  ;;  %v1575_v54 = vpop.f32.mrf.mxu1 }
 0x1a2   : > { %1222 = vst [vmem:[%s2190_s16 + $0x2e8] sm:$0xff] %v547_v52  ;;  %1224 = vst [vmem:[%s2190_s16 + $0x2f8] sm:$0xff] %v1575_v54 }
 0x1a3   : > { %v549_v55 = vpop.f32.mrf.mxu0  ;;  %v960_v57 = vpop.f32.mrf.mxu1 }
 0x1a4   : > { %1223 = vst [vmem:[%s2190_s16 + $0x2f0] sm:$0xff] %v549_v55  ;;  %1221 = vst [vmem:[%s2190_s16 + $0x2e0] sm:$0xff] %v960_v57 }
 0x1a5   : > { %v553_v0 = vpop.f32.mrf.mxu0  ;;  %v1578_v34 = vpop.f32.mrf.mxu1 }
 0x1a6   : > { %1225 = vst [vmem:[%s2190_s16 + $0x300] sm:$0xff] %v553_v0  ;;  %1230 = vst [vmem:[%s2190_s16 + $0x328] sm:$0xff] %v1578_v34 }
 0x1a7   : > { %v555_v38 = vpop.f32.mrf.mxu0  ;;  %v970_v41 = vpop.f32.mrf.mxu1 }
 0x1a8   : > { %1226 = vst [vmem:[%s2190_s16 + $0x308] sm:$0xff] %v555_v38  ;;  %1227 = vst [vmem:[%s2190_s16 + $0x310] sm:$0xff] %v970_v41 }
 0x1a9   : > { %v559_v44 = vpop.f32.mrf.mxu0  ;;  %v1581_v47 = vpop.f32.mrf.mxu1 }
 0x1aa   : > { %1228 = vst [vmem:[%s2190_s16 + $0x318] sm:$0xff] %v559_v44  ;;  %1236 = vst [vmem:[%s2190_s16 + $0x358] sm:$0xff] %v1581_v47 }
 0x1ab   : > { %v561_v50 = vpop.f32.mrf.mxu0  ;;  %v980_v53 = vpop.f32.mrf.mxu1 }
 0x1ac   : > { %1229 = vst [vmem:[%s2190_s16 + $0x320] sm:$0xff] %v561_v50  ;;  %1233 = vst [vmem:[%s2190_s16 + $0x340] sm:$0xff] %v980_v53 }
 0x1ad   : > { %v565_v56 = vpop.f32.mrf.mxu0  ;;  %v1584_v58 = vpop.f32.mrf.mxu1 }
 0x1ae   : > { %1231 = vst [vmem:[%s2190_s16 + $0x330] sm:$0xff] %v565_v56  ;;  %1242 = vst [vmem:[%s2190_s16 + $0x388] sm:$0xff] %v1584_v58 }
 0x1af   : > { %v567_v59 = vpop.f32.mrf.mxu0  ;;  %v990_v60 = vpop.f32.mrf.mxu1 }
 0x1b0   : > { %1232 = vst [vmem:[%s2190_s16 + $0x338] sm:$0xff] %v567_v59  ;;  %1239 = vst [vmem:[%s2190_s16 + $0x370] sm:$0xff] %v990_v60 }
 0x1b1   : > { %v571_v61 = vpop.f32.mrf.mxu0  ;;  %v1587_v62 = vpop.f32.mrf.mxu1 }
 0x1b2   : > { %1234 = vst [vmem:[%s2190_s16 + $0x348] sm:$0xff] %v571_v61  ;;  %1248 = vst [vmem:[%s2190_s16 + $0x3b8] sm:$0xff] %v1587_v62 }
 0x1b3   : > { %v573_v63 = vpop.f32.mrf.mxu0  ;;  %v1000_v1 = vpop.f32.mrf.mxu1 }
 0x1b4   : > { %1235 = vst [vmem:[%s2190_s16 + $0x350] sm:$0xff] %v573_v63  ;;  %1245 = vst [vmem:[%s2190_s16 + $0x3a0] sm:$0xff] %v1000_v1 }
 0x1b5   : > { %v577_v2 = vpop.f32.mrf.mxu0  ;;  %v1590_v3 = vpop.f32.mrf.mxu1 }
 0x1b6   : > { %1237 = vst [vmem:[%s2190_s16 + $0x360] sm:$0xff] %v577_v2  ;;  %1254 = vst [vmem:[%s2190_s16 + $0x3e8] sm:$0xff] %v1590_v3 }
 0x1b7   : > { %v579_v4 = vpop.f32.mrf.mxu0  ;;  %v1010_v5 = vpop.f32.mrf.mxu1 }
 0x1b8   : > { %1238 = vst [vmem:[%s2190_s16 + $0x368] sm:$0xff] %v579_v4  ;;  %1251 = vst [vmem:[%s2190_s16 + $0x3d0] sm:$0xff] %v1010_v5 }
 0x1b9   : > { %v583_v6 = vpop.f32.mrf.mxu0  ;;  %v1593_v7 = vpop.f32.mrf.mxu1 }
 0x1ba   : > { %1240 = vst [vmem:[%s2190_s16 + $0x378] sm:$0xff] %v583_v6  ;;  %1260 = vst [vmem:[%s2190_s16 + $0x418] sm:$0xff] %v1593_v7 }
 0x1bb   : > { %v585_v8 = vpop.f32.mrf.mxu0  ;;  %v1020_v9 = vpop.f32.mrf.mxu1 }
 0x1bc   : > { %1241 = vst [vmem:[%s2190_s16 + $0x380] sm:$0xff] %v585_v8  ;;  %1257 = vst [vmem:[%s2190_s16 + $0x400] sm:$0xff] %v1020_v9 }
 0x1bd   : > { %v589_v10 = vpop.f32.mrf.mxu0  ;;  %v1596_v11 = vpop.f32.mrf.mxu1 }
 0x1be   : > { %1243 = vst [vmem:[%s2190_s16 + $0x390] sm:$0xff] %v589_v10  ;;  %1266 = vst [vmem:[%s2190_s16 + $0x448] sm:$0xff] %v1596_v11 }
 0x1bf   : > { %v591_v12 = vpop.f32.mrf.mxu0  ;;  %v1030_v13 = vpop.f32.mrf.mxu1 }
 0x1c0   : > { %1244 = vst [vmem:[%s2190_s16 + $0x398] sm:$0xff] %v591_v12  ;;  %1263 = vst [vmem:[%s2190_s16 + $0x430] sm:$0xff] %v1030_v13 }
 0x1c1   : > { %v595_v14 = vpop.f32.mrf.mxu0  ;;  %v1599_v15 = vpop.f32.mrf.mxu1 }
 0x1c2   : > { %1246 = vst [vmem:[%s2190_s16 + $0x3a8] sm:$0xff] %v595_v14  ;;  %1272 = vst [vmem:[%s2190_s16 + $0x478] sm:$0xff] %v1599_v15 }
 0x1c3   : > { %v597_v16 = vpop.f32.mrf.mxu0  ;;  %v1040_v17 = vpop.f32.mrf.mxu1 }
 0x1c4   : > { %1247 = vst [vmem:[%s2190_s16 + $0x3b0] sm:$0xff] %v597_v16  ;;  %1269 = vst [vmem:[%s2190_s16 + $0x460] sm:$0xff] %v1040_v17 }
 0x1c5   : > { %v601_v18 = vpop.f32.mrf.mxu0  ;;  %v1602_v19 = vpop.f32.mrf.mxu1 }
 0x1c6   : > { %1249 = vst [vmem:[%s2190_s16 + $0x3c0] sm:$0xff] %v601_v18  ;;  %1278 = vst [vmem:[%s2190_s16 + $0x4a8] sm:$0xff] %v1602_v19 }
 0x1c7   : > { %v603_v20 = vpop.f32.mrf.mxu0  ;;  %v1050_v21 = vpop.f32.mrf.mxu1 }
 0x1c8   : > { %1250 = vst [vmem:[%s2190_s16 + $0x3c8] sm:$0xff] %v603_v20  ;;  %1275 = vst [vmem:[%s2190_s16 + $0x490] sm:$0xff] %v1050_v21 }
 0x1c9   : > { %v607_v22 = vpop.f32.mrf.mxu0  ;;  %v1605_v23 = vpop.f32.mrf.mxu1 }
 0x1ca   : > { %1252 = vst [vmem:[%s2190_s16 + $0x3d8] sm:$0xff] %v607_v22  ;;  %1284 = vst [vmem:[%s2190_s16 + $0x4d8] sm:$0xff] %v1605_v23 }
 0x1cb   : > { %v609_v24 = vpop.f32.mrf.mxu0  ;;  %v1060_v25 = vpop.f32.mrf.mxu1 }
 0x1cc   : > { %1253 = vst [vmem:[%s2190_s16 + $0x3e0] sm:$0xff] %v609_v24  ;;  %1281 = vst [vmem:[%s2190_s16 + $0x4c0] sm:$0xff] %v1060_v25 }
 0x1cd   : > { %v613_v26 = vpop.f32.mrf.mxu0  ;;  %v1608_v27 = vpop.f32.mrf.mxu1 }
 0x1ce   : > { %1255 = vst [vmem:[%s2190_s16 + $0x3f0] sm:$0xff] %v613_v26  ;;  %1290 = vst [vmem:[%s2190_s16 + $0x508] sm:$0xff] %v1608_v27 }
 0x1cf   : > { %v615_v28 = vpop.f32.mrf.mxu0  ;;  %v1070_v29 = vpop.f32.mrf.mxu1 }
 0x1d0   : > { %1256 = vst [vmem:[%s2190_s16 + $0x3f8] sm:$0xff] %v615_v28  ;;  %1287 = vst [vmem:[%s2190_s16 + $0x4f0] sm:$0xff] %v1070_v29 }
 0x1d1   : > { %v619_v30 = vpop.f32.mrf.mxu0  ;;  %v1611_v31 = vpop.f32.mrf.mxu1 }
 0x1d2   : > { %1258 = vst [vmem:[%s2190_s16 + $0x408] sm:$0xff] %v619_v30  ;;  %1296 = vst [vmem:[%s2190_s16 + $0x538] sm:$0xff] %v1611_v31 }
 0x1d3   : > { %v621_v32 = vpop.f32.mrf.mxu0  ;;  %v1080_v33 = vpop.f32.mrf.mxu1 }
 0x1d4   : > { %1259 = vst [vmem:[%s2190_s16 + $0x410] sm:$0xff] %v621_v32  ;;  %1293 = vst [vmem:[%s2190_s16 + $0x520] sm:$0xff] %v1080_v33 }
 0x1d5   : > { %v625_v35 = vpop.f32.mrf.mxu0  ;;  %v1614_v36 = vpop.f32.mrf.mxu1 }
 0x1d6   : > { %1261 = vst [vmem:[%s2190_s16 + $0x420] sm:$0xff] %v625_v35  ;;  %1302 = vst [vmem:[%s2190_s16 + $0x568] sm:$0xff] %v1614_v36 }
 0x1d7   : > { %v627_v37 = vpop.f32.mrf.mxu0  ;;  %v1090_v39 = vpop.f32.mrf.mxu1 }
 0x1d8   : > { %1262 = vst [vmem:[%s2190_s16 + $0x428] sm:$0xff] %v627_v37  ;;  %1299 = vst [vmem:[%s2190_s16 + $0x550] sm:$0xff] %v1090_v39 }
 0x1d9   : > { %v631_v40 = vpop.f32.mrf.mxu0  ;;  %v1617_v42 = vpop.f32.mrf.mxu1 }
 0x1da   : > { %1264 = vst [vmem:[%s2190_s16 + $0x438] sm:$0xff] %v631_v40  ;;  %1308 = vst [vmem:[%s2190_s16 + $0x598] sm:$0xff] %v1617_v42 }
 0x1db   : > { %v633_v43 = vpop.f32.mrf.mxu0  ;;  %v1100_v45 = vpop.f32.mrf.mxu1 }
 0x1dc   : > { %1265 = vst [vmem:[%s2190_s16 + $0x440] sm:$0xff] %v633_v43  ;;  %1305 = vst [vmem:[%s2190_s16 + $0x580] sm:$0xff] %v1100_v45 }
 0x1dd   : > { %v637_v46 = vpop.f32.mrf.mxu0  ;;  %v1620_v48 = vpop.f32.mrf.mxu1 }
 0x1de   : > { %1267 = vst [vmem:[%s2190_s16 + $0x450] sm:$0xff] %v637_v46  ;;  %1314 = vst [vmem:[%s2190_s16 + $0x5c8] sm:$0xff] %v1620_v48 }
 0x1df   : > { %v639_v49 = vpop.f32.mrf.mxu0  ;;  %v1110_v51 = vpop.f32.mrf.mxu1 }
 0x1e0   : > { %1268 = vst [vmem:[%s2190_s16 + $0x458] sm:$0xff] %v639_v49  ;;  %1311 = vst [vmem:[%s2190_s16 + $0x5b0] sm:$0xff] %v1110_v51 }
 0x1e1   : > { %v643_v52 = vpop.f32.mrf.mxu0  ;;  %v1623_v54 = vpop.f32.mrf.mxu1 }
 0x1e2   : > { %1270 = vst [vmem:[%s2190_s16 + $0x468] sm:$0xff] %v643_v52  ;;  %1320 = vst [vmem:[%s2190_s16 + $0x5f8] sm:$0xff] %v1623_v54 }
 0x1e3   : > { %v645_v55 = vpop.f32.mrf.mxu0  ;;  %v1120_v57 = vpop.f32.mrf.mxu1 }
 0x1e4   : > { %1271 = vst [vmem:[%s2190_s16 + $0x470] sm:$0xff] %v645_v55  ;;  %1317 = vst [vmem:[%s2190_s16 + $0x5e0] sm:$0xff] %v1120_v57 }
 0x1e5 PF: > { %p13_p7 = scmp.ge.s32.totalorder %s1875_s20, 4   ;;  %s2412_s9 = smov %s1796_s10 }
 0x1e6   : > { %s2413_s10 = smov %s1800_s11  ;;  %s2414_s11 = smov %s1892_s28 }
 0x1e7   : > { %s2415_s12 = smov %s1875_s20  ;;  %15 = sbr.rel (!%p13_p7) target bundleno = 4 (0x4), region = 72 }
 0x1ec   :  { %1345 = vsyncpa [#allocation3], 1 }
 0x1ed   :  { %1347 = vsyncpa [#allocation3 + $0x1], 1 }
 0x1ee   :  { %1348 = vsyncpa [#allocation5], 1 }

// kernel: msa_block_forward.4
= control target key start
LH: loop header
LB: loop body
LE: loop exit
PB: predicated region body
PF: predicated region fallthrough
CT: control target
= control target key end

     0   :  { %s4939_s15 = smov 0   ;;  %s6392_s0 = inlined_call_operand.vmem [shape: f32[8,8,64,32], index: 0, kind: input, shape index: {}]   ;;  %s6393_s1 = inlined_call_operand.vmem [shape: f32[8,8,64,32], index: 1, kind: input, shape index: {}]   ;;  %s6394_s2 = inlined_call_operand.vmem [shape: f32[8,8,64,32], index: 2, kind: input, shape index: {}]   ;;  %s6395_s3 = inlined_call_operand.vmem [shape: f32[8,64,64], index: 3, kind: input, shape index: {}]   ;;  %s6396_s4 = inlined_call_operand.vmem [shape: f32[8,8,64,32], index: 4, kind: output, shape index: {}]  }
   0x1 LB: > { %s3727_s16 = sadd.s32 4294967295, %s4912_s15   ;;  %p3731_p0 = scmp.ge.s32.totalorder %s4912_s15, 1  ;;  %s4912_s15 = sphi %s4939_s15, %s14_s15  }
   0x2   : > { %p182_p1 = scmp.lt.s32.totalorder %s4912_s15, 9 }
   0x4   : > { %p183_p2 = pnand %p3731_p0, %p182_p1 }
   0x6   : > { %186 = sbr.rel (%p183_p2) target bundleno = 885 (0x375), region = 36 }
   0xb   : > { %p218_p3 = scmp.lt.s32.totalorder %s3727_s16, 7  ;;  %vm430_vm0 = vcmask 261120   ;;  %vm1847_vm1 = vcmask 523264  }
   0xd   : > { %s6482_s16 = smov (!%p218_p3, %s3727_s16), 7 }
   0xe   : > { %s4947_s17 = sshll.u32 %s6482_s16, 9 }
   0xf   : > { %s4953_s20 = scalar_lea.vmem %s6393_s1, %s4947_s17  ;;  %s4967_s23 = scalar_lea.vmem %s6392_s0, %s4947_s17 }
  0x10   : > { %v309_v0 = vld [vmem:[%s4953_s20 + $0x38] sm:$0xff]  ;;  %v308_v2 = vld [vmem:[%s4953_s20 + $0x30] sm:$0xff]  ;;  %v307_v4 = vld [vmem:[%s4953_s20 + $0x28] sm:$0xff]  ;;  %s5780_s8 = scalar_lea.vmem %s6394_s2, %s4947_s17  ;;  %s6259_s11 = scalar_lea.vmem %s6396_s4, %s4947_s17 }
  0x11   : > { %v317_v1 = vld [vmem:[%s4953_s20 + $0x78] sm:$0xff]  ;;  %4194 = vmatprep.subr.msk.mxu0 %vm430_vm0, %v309_v0  ;;  %v316_v3 = vld [vmem:[%s4953_s20 + $0x70] sm:$0xff]  ;;  %v315_v5 = vld [vmem:[%s4953_s20 + $0x68] sm:$0xff] }
  0x12   : > { %4222 = vmatprep.subr.msk.mxu1 %vm430_vm0, %v317_v1  ;;  %4195 = vmatpush3.xpose.msk.msra.mxu0 %vm430_vm0, %v309_v0  ;;  %v238_v6 = vld [vmem:[%s4967_s23] sm:$0xff]  ;;  %v305_v10 = vld [vmem:[%s4953_s20 + $0x18] sm:$0xff]  ;;  %v304_v12 = vld [vmem:[%s4953_s20 + $0x10] sm:$0xff] }
  0x13   : > { %4223 = vmatpush3.xpose.msk.msra.mxu1 %vm430_vm0, %v317_v1  ;;  %4196 = vmatprep.subr.msk.mxu0 %vm430_vm0, %v308_v2  ;;  %v246_v7 = vld [vmem:[%s4967_s23 + $0x40] sm:$0xff]  ;;  %v313_v11 = vld [vmem:[%s4953_s20 + $0x58] sm:$0xff]  ;;  %v312_v13 = vld [vmem:[%s4953_s20 + $0x50] sm:$0xff] }
  0x14   : > { %4224 = vmatprep.subr.msk.mxu1 %vm430_vm0, %v316_v3  ;;  %v306_v8 = vld [vmem:[%s4953_s20 + $0x20] sm:$0xff]  ;;  %4210 = vmatprep.mubr.msk.f32.mxu0 %vm430_vm0, %v238_v6  ;;  %v303_v14 = vld [vmem:[%s4953_s20 + $0x8] sm:$0xff]  ;;  %v325_v18 = vld [vmem:[%s4953_s20 + $0xb8] sm:$0xff] }
  0x15   : > { %v314_v9 = vld [vmem:[%s4953_s20 + $0x60] sm:$0xff]  ;;  %4238 = vmatprep.mubr.msk.f32.mxu1 %vm430_vm0, %v246_v7  ;;  %v311_v15 = vld [vmem:[%s4953_s20 + $0x48] sm:$0xff]  ;;  %v333_v19 = vld [vmem:[%s4953_s20 + $0xf8] sm:$0xff] }
  0x16   : > { %4197 = vmatpush3.xpose.msk.msra.mxu0 %vm430_vm0, %v308_v2  ;;  %v302_v16 = vld [vmem:[%s4953_s20] sm:$0xff]  ;;  %v239_v20 = vld [vmem:[%s4967_s23 + $0x8] sm:$0xff]  ;;  %v324_v22 = vld [vmem:[%s4953_s20 + $0xb0] sm:$0xff] }
  0x17   : > { %4225 = vmatpush3.xpose.msk.msra.mxu1 %vm430_vm0, %v316_v3  ;;  %4198 = vmatprep.subr.msk.mxu0 %vm430_vm0, %v307_v4  ;;  %v310_v17 = vld [vmem:[%s4953_s20 + $0x40] sm:$0xff]  ;;  %v247_v21 = vld [vmem:[%s4967_s23 + $0x48] sm:$0xff]  ;;  %v332_v23 = vld [vmem:[%s4953_s20 + $0xf0] sm:$0xff] }
  0x18   : > { %4226 = vmatprep.subr.msk.mxu1 %vm430_vm0, %v315_v5  ;;  %v240_v24 = vld [vmem:[%s4967_s23 + $0x10] sm:$0xff]  ;;  %v241_v26 = vld [vmem:[%s4967_s23 + $0x18] sm:$0xff]  ;;  %v323_v28 = vld [vmem:[%s4953_s20 + $0xa8] sm:$0xff] }
  0x19   : > { %v248_v25 = vld [vmem:[%s4967_s23 + $0x50] sm:$0xff]  ;;  %v249_v27 = vld [vmem:[%s4967_s23 + $0x58] sm:$0xff]  ;;  %v331_v29 = vld [vmem:[%s4953_s20 + $0xe8] sm:$0xff] }
  0x1a   : > { %4199 = vmatpush3.xpose.msk.msra.mxu0 %vm430_vm0, %v307_v4  ;;  %v242_v30 = vld [vmem:[%s4967_s23 + $0x20] sm:$0xff]  ;;  %v243_v32 = vld [vmem:[%s4967_s23 + $0x28] sm:$0xff]  ;;  %v244_v36 = vld [vmem:[%s4967_s23 + $0x30] sm:$0xff] }
  0x1b   : > { %4227 = vmatpush3.xpose.msk.msra.mxu1 %vm430_vm0, %v315_v5  ;;  %4200 = vmatprep.subr.msk.mxu0 %vm430_vm0, %v306_v8  ;;  %v250_v31 = vld [vmem:[%s4967_s23 + $0x60] sm:$0xff]  ;;  %v251_v33 = vld [vmem:[%s4967_s23 + $0x68] sm:$0xff]  ;;  %v252_v37 = vld [vmem:[%s4967_s23 + $0x70] sm:$0xff] }
  0x1c   : > { %4228 = vmatprep.subr.msk.mxu1 %vm430_vm0, %v314_v9  ;;  %v322_v34 = vld [vmem:[%s4953_s20 + $0xa0] sm:$0xff]  ;;  %v245_v38 = vld [vmem:[%s4967_s23 + $0x38] sm:$0xff]  ;;  %v320_v44 = vld [vmem:[%s4953_s20 + $0x90] sm:$0xff] }
  0x1d   : > { %v330_v35 = vld [vmem:[%s4953_s20 + $0xe0] sm:$0xff]  ;;  %v253_v39 = vld [vmem:[%s4967_s23 + $0x78] sm:$0xff]  ;;  %v328_v45 = vld [vmem:[%s4953_s20 + $0xd0] sm:$0xff] }
  0x1e   : > { %4201 = vmatpush3.xpose.msk.msra.mxu0 %vm430_vm0, %v306_v8  ;;  %v321_v40 = vld [vmem:[%s4953_s20 + $0x98] sm:$0xff]  ;;  %v254_v42 = vld [vmem:[%s4967_s23 + $0x80] sm:$0xff]  ;;  %v319_v46 = vld [vmem:[%s4953_s20 + $0x88] sm:$0xff] }
  0x1f   : > { %4229 = vmatpush3.xpose.msk.msra.mxu1 %vm430_vm0, %v314_v9  ;;  %4202 = vmatprep.subr.msk.mxu0 %vm430_vm0, %v305_v10  ;;  %v329_v41 = vld [vmem:[%s4953_s20 + $0xd8] sm:$0xff]  ;;  %v262_v43 = vld [vmem:[%s4967_s23 + $0xc0] sm:$0xff]  ;;  %v327_v47 = vld [vmem:[%s4953_s20 + $0xc8] sm:$0xff] }
  0x20   : > { %4230 = vmatprep.subr.msk.mxu1 %vm430_vm0, %v313_v11  ;;  %v318_v48 = vld [vmem:[%s4953_s20 + $0x80] sm:$0xff]  ;;  %v341_v50 = vld [vmem:[%s4953_s20 + $0x138] sm:$0xff]  ;;  %v255_v52 = vld [vmem:[%s4967_s23 + $0x88] sm:$0xff] }
  0x21   : > { %v326_v49 = vld [vmem:[%s4953_s20 + $0xc0] sm:$0xff]  ;;  %v349_v51 = vld [vmem:[%s4953_s20 + $0x178] sm:$0xff]  ;;  %v263_v53 = vld [vmem:[%s4967_s23 + $0xc8] sm:$0xff] }
  0x22   : > { %4203 = vmatpush3.xpose.msk.msra.mxu0 %vm430_vm0, %v305_v10  ;;  %v340_v54 = vld [vmem:[%s4953_s20 + $0x130] sm:$0xff]  ;;  %v257_v58 = vld [vmem:[%s4967_s23 + $0x98] sm:$0xff]  ;;  %v339_v60 = vld [vmem:[%s4953_s20 + $0x128] sm:$0xff] }
  0x23   : > { %4231 = vmatpush3.xpose.msk.msra.mxu1 %vm430_vm0, %v313_v11  ;;  %4204 = vmatprep.subr.msk.mxu0 %vm430_vm0, %v304_v12  ;;  %v348_v55 = vld [vmem:[%s4953_s20 + $0x170] sm:$0xff]  ;;  %v265_v59 = vld [vmem:[%s4967_s23 + $0xd8] sm:$0xff]  ;;  %v347_v61 = vld [vmem:[%s4953_s20 + $0x168] sm:$0xff] }
  0x24   : > { %4232 = vmatprep.subr.msk.mxu1 %vm430_vm0, %v312_v13  ;;  %v256_v56 = vld [vmem:[%s4967_s23 + $0x90] sm:$0xff]  ;;  %v258_v62 = vld [vmem:[%s4967_s23 + $0xa0] sm:$0xff]  ;;  %v259_v0 = vld [vmem:[%s4967_s23 + $0xa8] sm:$0xff] }
  0x25   : > { %v264_v57 = vld [vmem:[%s4967_s23 + $0xd0] sm:$0xff]  ;;  %v266_v63 = vld [vmem:[%s4967_s23 + $0xe0] sm:$0xff]  ;;  %v267_v1 = vld [vmem:[%s4967_s23 + $0xe8] sm:$0xff] }
  0x26   : > { %4205 = vmatpush3.xpose.msk.msra.mxu0 %vm430_vm0, %v304_v12  ;;  %v338_v2 = vld [vmem:[%s4953_s20 + $0x120] sm:$0xff]  ;;  %v260_v4 = vld [vmem:[%s4967_s23 + $0xb0] sm:$0xff]  ;;  %v261_v6 = vld [vmem:[%s4967_s23 + $0xb8] sm:$0xff] }
  0x27   : > { %4233 = vmatpush3.xpose.msk.msra.mxu1 %vm430_vm0, %v312_v13  ;;  %4206 = vmatprep.subr.msk.mxu0 %vm430_vm0, %v303_v14  ;;  %v346_v3 = vld [vmem:[%s4953_s20 + $0x160] sm:$0xff]  ;;  %v268_v5 = vld [vmem:[%s4967_s23 + $0xf0] sm:$0xff]  ;;  %v269_v7 = vld [vmem:[%s4967_s23 + $0xf8] sm:$0xff] }
  0x28   : > { %4234 = vmatprep.subr.msk.mxu1 %vm430_vm0, %v311_v15  ;;  %v337_v8 = vld [vmem:[%s4953_s20 + $0x118] sm:$0xff]  ;;  %v270_v10 = vld [vmem:[%s4967_s23 + $0x100] sm:$0xff]  ;;  %v336_v12 = vld [vmem:[%s4953_s20 + $0x110] sm:$0xff] }
  0x29   : > { %v345_v9 = vld [vmem:[%s4953_s20 + $0x158] sm:$0xff]  ;;  %v278_v11 = vld [vmem:[%s4967_s23 + $0x140] sm:$0xff]  ;;  %v344_v13 = vld [vmem:[%s4953_s20 + $0x150] sm:$0xff] }
  0x2a   : > { %4207 = vmatpush3.xpose.msk.msra.mxu0 %vm430_vm0, %v303_v14  ;;  %v335_v14 = vld [vmem:[%s4953_s20 + $0x108] sm:$0xff] }
  0x2b   : > { %4235 = vmatpush3.xpose.msk.msra.mxu1 %vm430_vm0, %v311_v15  ;;  %4208 = vmatprep.subr.msk.mxu0 %vm430_vm0, %v302_v16  ;;  %v343_v15 = vld [vmem:[%s4953_s20 + $0x148] sm:$0xff] }
  0x2c   : > { %4236 = vmatprep.subr.msk.mxu1 %vm430_vm0, %v310_v17 }
  0x2e   : > { %4209 = vmatpush3.xpose.msk.msra.mxu0 %vm430_vm0, %v302_v16  ;;  %v334_v16 = vld [vmem:[%s4953_s20 + $0x100] sm:$0xff] }
  0x2f   : > { %4237 = vmatpush3.xpose.msk.msra.mxu1 %vm430_vm0, %v310_v17  ;;  %4250 = vmatprep.subr.msk.mxu0 %vm430_vm0, %v325_v18  ;;  %v342_v17 = vld [vmem:[%s4953_s20 + $0x140] sm:$0xff] }
  0x30   : > { %4278 = vmatprep.subr.msk.mxu1 %vm430_vm0, %v333_v19 }
  0x31   : > { %4211 = vmatmul.mubr.msk.f32.vlgmr.msra.gmra.mxu0 %vm430_vm0, %v239_v20  ;;  %v271_v20 = vld [vmem:[%s4967_s23 + $0x108] sm:$0xff] }
  0x32   : > { %4239 = vmatmul.mubr.msk.f32.vlgmr.msra.gmra.mxu1 %vm430_vm0, %v247_v21  ;;  %4251 = vmatpush3.xpose.msk.msra.mxu0 %vm430_vm0, %v325_v18  ;;  %v357_v18 = vld [vmem:[%s4953_s20 + $0x1b8] sm:$0xff]  ;;  %v279_v21 = vld [vmem:[%s4967_s23 + $0x148] sm:$0xff] }
  0x33   : > { %4279 = vmatpush3.xpose.msk.msra.mxu1 %vm430_vm0, %v333_v19  ;;  %4252 = vmatprep.subr.msk.mxu0 %vm430_vm0, %v324_v22  ;;  %v365_v19 = vld [vmem:[%s4953_s20 + $0x1f8] sm:$0xff] }
  0x34   : > { %4280 = vmatprep.subr.msk.mxu1 %vm430_vm0, %v332_v23  ;;  %4213 = vmatprep.mubr.msk.f32.mxu0 %vm430_vm0, %v240_v24  ;;  %v272_v24 = vld [vmem:[%s4967_s23 + $0x110] sm:$0xff] }
  0x35   : > { %4241 = vmatprep.mubr.msk.f32.mxu1 %vm430_vm0, %v248_v25  ;;  %4214 = vmatmul.mubr.msk.f32.gmra.mxu0 %vm430_vm0, %v241_v26  ;;  %v280_v25 = vld [vmem:[%s4967_s23 + $0x150] sm:$0xff]  ;;  %v273_v26 = vld [vmem:[%s4967_s23 + $0x118] sm:$0xff] }
  0x36   : > { %4242 = vmatmul.mubr.msk.f32.gmra.mxu1 %vm430_vm0, %v249_v27  ;;  %4253 = vmatpush3.xpose.msk.msra.mxu0 %vm430_vm0, %v324_v22  ;;  %v356_v22 = vld [vmem:[%s4953_s20 + $0x1b0] sm:$0xff]  ;;  %v281_v27 = vld [vmem:[%s4967_s23 + $0x158] sm:$0xff] }
  0x37   : > { %4281 = vmatpush3.xpose.msk.msra.mxu1 %vm430_vm0, %v332_v23  ;;  %4254 = vmatprep.subr.msk.mxu0 %vm430_vm0, %v323_v28  ;;  %v364_v23 = vld [vmem:[%s4953_s20 + $0x1f0] sm:$0xff] }
  0x38   : > { %4282 = vmatprep.subr.msk.mxu1 %vm430_vm0, %v331_v29  ;;  %4216 = vmatprep.mubr.msk.f32.mxu0 %vm430_vm0, %v242_v30  ;;  %v274_v30 = vld [vmem:[%s4967_s23 + $0x120] sm:$0xff] }
  0x39   : > { %4244 = vmatprep.mubr.msk.f32.mxu1 %vm430_vm0, %v250_v31  ;;  %4217 = vmatmul.mubr.msk.f32.gmra.mxu0 %vm430_vm0, %v243_v32  ;;  %v282_v31 = vld [vmem:[%s4967_s23 + $0x160] sm:$0xff]  ;;  %v275_v32 = vld [vmem:[%s4967_s23 + $0x128] sm:$0xff] }
  0x3a   : > { %4245 = vmatmul.mubr.msk.f32.gmra.mxu1 %vm430_vm0, %v251_v33  ;;  %4255 = vmatpush3.xpose.msk.msra.mxu0 %vm430_vm0, %v323_v28  ;;  %v355_v28 = vld [vmem:[%s4953_s20 + $0x1a8] sm:$0xff] }
  0x3b   : > { %4283 = vmatpush3.xpose.msk.msra.mxu1 %vm430_vm0, %v331_v29  ;;  %4256 = vmatprep.subr.msk.mxu0 %vm430_vm0, %v322_v34  ;;  %v363_v29 = vld [vmem:[%s4953_s20 + $0x1e8] sm:$0xff] }
  0x3c   : > { %4284 = vmatprep.subr.msk.mxu1 %vm430_vm0, %v330_v35  ;;  %4219 = vmatprep.mubr.msk.f32.mxu0 %vm430_vm0, %v244_v36  ;;  %v283_v33 = vld [vmem:[%s4967_s23 + $0x168] sm:$0xff]  ;;  %v276_v36 = vld [vmem:[%s4967_s23 + $0x130] sm:$0xff] }
  0x3d   : > { %4247 = vmatprep.mubr.msk.f32.mxu1 %vm430_vm0, %v252_v37  ;;  %4220 = vmatmul.mubr.msk.f32.gmra.mxu0 %vm430_vm0, %v245_v38  ;;  %v284_v37 = vld [vmem:[%s4967_s23 + $0x170] sm:$0xff]  ;;  %v277_v38 = vld [vmem:[%s4967_s23 + $0x138] sm:$0xff] }
  0x3e   : > { %4248 = vmatmul.mubr.msk.f32.gmra.mxu1 %vm430_vm0, %v253_v39  ;;  %4257 = vmatpush3.xpose.msk.msra.mxu0 %vm430_vm0, %v322_v34  ;;  %v354_v34 = vld [vmem:[%s4953_s20 + $0x1a0] sm:$0xff]  ;;  %v285_v39 = vld [vmem:[%s4967_s23 + $0x178] sm:$0xff] }
  0x3f   : > { %4285 = vmatpush3.xpose.msk.msra.mxu1 %vm430_vm0, %v330_v35  ;;  %4258 = vmatprep.subr.msk.mxu0 %vm430_vm0, %v321_v40  ;;  %v362_v35 = vld [vmem:[%s4953_s20 + $0x1e0] sm:$0xff] }
  0x40   : > { %4286 = vmatprep.subr.msk.mxu1 %vm430_vm0, %v329_v41  ;;  %4266 = vmatprep.mubr.msk.f32.mxu0 %vm430_vm0, %v254_v42  ;;  %v286_v42 = vld [vmem:[%s4967_s23 + $0x180] sm:$0xff] }
  0x41   : > { %4294 = vmatprep.mubr.msk.f32.mxu1 %vm430_vm0, %v262_v43  ;;  %v294_v43 = vld [vmem:[%s4967_s23 + $0x1c0] sm:$0xff] }
  0x42   : > { %4259 = vmatpush3.xpose.msk.msra.mxu0 %vm430_vm0, %v321_v40  ;;  %v353_v40 = vld [vmem:[%s4953_s20 + $0x198] sm:$0xff] }
  0x43   : > { %4287 = vmatpush3.xpose.msk.msra.mxu1 %vm430_vm0, %v329_v41  ;;  %4260 = vmatprep.subr.msk.mxu0 %vm430_vm0, %v320_v44  ;;  %v361_v41 = vld [vmem:[%s4953_s20 + $0x1d8] sm:$0xff] }
  0x44   : > { %4288 = vmatprep.subr.msk.mxu1 %vm430_vm0, %v328_v45 }
  0x46   : > { %4261 = vmatpush3.xpose.msk.msra.mxu0 %vm430_vm0, %v320_v44  ;;  %v352_v44 = vld [vmem:[%s4953_s20 + $0x190] sm:$0xff] }
  0x47   : > { %4289 = vmatpush3.xpose.msk.msra.mxu1 %vm430_vm0, %v328_v45  ;;  %4262 = vmatprep.subr.msk.mxu0 %vm430_vm0, %v319_v46  ;;  %v360_v45 = vld [vmem:[%s4953_s20 + $0x1d0] sm:$0xff] }
  0x48   : > { %4290 = vmatprep.subr.msk.mxu1 %vm430_vm0, %v327_v47 }
  0x4a   : > { %4263 = vmatpush3.xpose.msk.msra.mxu0 %vm430_vm0, %v319_v46  ;;  %v351_v46 = vld [vmem:[%s4953_s20 + $0x188] sm:$0xff] }
  0x4b   : > { %4291 = vmatpush3.xpose.msk.msra.mxu1 %vm430_vm0, %v327_v47  ;;  %4264 = vmatprep.subr.msk.mxu0 %vm430_vm0, %v318_v48  ;;  %v359_v47 = vld [vmem:[%s4953_s20 + $0x1c8] sm:$0xff] }
  0x4c   : > { %4292 = vmatprep.subr.msk.mxu1 %vm430_vm0, %v326_v49 }
  0x4e   : > { %4265 = vmatpush3.xpose.msk.msra.mxu0 %vm430_vm0, %v318_v48  ;;  %v350_v48 = vld [vmem:[%s4953_s20 + $0x180] sm:$0xff] }
  0x4f   : > { %4293 = vmatpush3.xpose.msk.msra.mxu1 %vm430_vm0, %v326_v49  ;;  %4306 = vmatprep.subr.msk.mxu0 %vm430_vm0, %v341_v50  ;;  %v358_v49 = vld [vmem:[%s4953_s20 + $0x1c0] sm:$0xff] }
  0x50   : > { %4334 = vmatprep.subr.msk.mxu1 %vm430_vm0, %v349_v51 }
  0x51   : > { %4267 = vmatmul.mubr.msk.f32.vlgmr.msra.gmra.mxu0 %vm430_vm0, %v255_v52  ;;  %v288_v52 = vld [vmem:[%s4967_s23 + $0x190] sm:$0xff] }
  0x52   : > { %4295 = vmatmul.mubr.msk.f32.vlgmr.msra.gmra.mxu1 %vm430_vm0, %v263_v53  ;;  %4307 = vmatpush3.xpose.msk.msra.mxu0 %vm430_vm0, %v341_v50  ;;  %v287_v50 = vld [vmem:[%s4967_s23 + $0x188] sm:$0xff]  ;;  %v296_v53 = vld [vmem:[%s4967_s23 + $0x1d0] sm:$0xff] }
  0x53   : > { %4335 = vmatpush3.xpose.msk.msra.mxu1 %vm430_vm0, %v349_v51  ;;  %4308 = vmatprep.subr.msk.mxu0 %vm430_vm0, %v340_v54  ;;  %v295_v51 = vld [vmem:[%s4967_s23 + $0x1c8] sm:$0xff] }
  0x54   : > { %4336 = vmatprep.subr.msk.mxu1 %vm430_vm0, %v348_v55  ;;  %4269 = vmatprep.mubr.msk.f32.mxu0 %vm430_vm0, %v256_v56  ;;  %v290_v56 = vld [vmem:[%s4967_s23 + $0x1a0] sm:$0xff] }
  0x55   : > { %4297 = vmatprep.mubr.msk.f32.mxu1 %vm430_vm0, %v264_v57  ;;  %4270 = vmatmul.mubr.msk.f32.gmra.mxu0 %vm430_vm0, %v257_v58  ;;  %v298_v57 = vld [vmem:[%s4967_s23 + $0x1e0] sm:$0xff]  ;;  %v291_v58 = vld [vmem:[%s4967_s23 + $0x1a8] sm:$0xff] }
  0x56   : > { %4298 = vmatmul.mubr.msk.f32.gmra.mxu1 %vm430_vm0, %v265_v59  ;;  %4309 = vmatpush3.xpose.msk.msra.mxu0 %vm430_vm0, %v340_v54  ;;  %v289_v54 = vld [vmem:[%s4967_s23 + $0x198] sm:$0xff]  ;;  %v299_v59 = vld [vmem:[%s4967_s23 + $0x1e8] sm:$0xff] }
  0x57   : > { %4337 = vmatpush3.xpose.msk.msra.mxu1 %vm430_vm0, %v348_v55  ;;  %4310 = vmatprep.subr.msk.mxu0 %vm430_vm0, %v339_v60  ;;  %v297_v55 = vld [vmem:[%s4967_s23 + $0x1d8] sm:$0xff] }
  0x58   : > { %4338 = vmatprep.subr.msk.mxu1 %vm430_vm0, %v347_v61  ;;  %4272 = vmatprep.mubr.msk.f32.mxu0 %vm430_vm0, %v258_v62  ;;  %v293_v62 = vld [vmem:[%s4967_s23 + $0x1b8] sm:$0xff] }
  0x59   : > { %4300 = vmatprep.mubr.msk.f32.mxu1 %vm430_vm0, %v266_v63  ;;  %4273 = vmatmul.mubr.msk.f32.gmra.mxu0 %vm430_vm0, %v259_v0  ;;  %v301_v63 = vld [vmem:[%s4967_s23 + $0x1f8] sm:$0xff] }
  0x5a   : > { %4301 = vmatmul.mubr.msk.f32.gmra.mxu1 %vm430_vm0, %v267_v1  ;;  %4311 = vmatpush3.xpose.msk.msra.mxu0 %vm430_vm0, %v339_v60  ;;  %v292_v60 = vld [vmem:[%s4967_s23 + $0x1b0] sm:$0xff] }
  0x5b   : > { %4339 = vmatpush3.xpose.msk.msra.mxu1 %vm430_vm0, %v347_v61  ;;  %4312 = vmatprep.subr.msk.mxu0 %vm430_vm0, %v338_v2  ;;  %v300_v61 = vld [vmem:[%s4967_s23 + $0x1f0] sm:$0xff] }
  0x5c   : > { %4340 = vmatprep.subr.msk.mxu1 %vm430_vm0, %v346_v3  ;;  %4275 = vmatprep.mubr.msk.f32.mxu0 %vm430_vm0, %v260_v4 }
  0x5d   : > { %4303 = vmatprep.mubr.msk.f32.mxu1 %vm430_vm0, %v268_v5  ;;  %4276 = vmatmul.mubr.msk.f32.gmra.mxu0 %vm430_vm0, %v261_v6 }
  0x5e   : > { %4304 = vmatmul.mubr.msk.f32.gmra.mxu1 %vm430_vm0, %v269_v7  ;;  %4313 = vmatpush3.xpose.msk.msra.mxu0 %vm430_vm0, %v338_v2  ;;  %v1720_v2 = vld [vmem:[%s6395_s3 + $0x8] sm:$0xff] }
  0x5f   : > { %4341 = vmatpush3.xpose.msk.msra.mxu1 %vm430_vm0, %v346_v3  ;;  %4314 = vmatprep.subr.msk.mxu0 %vm430_vm0, %v337_v8  ;;  %v1728_v3 = vld [vmem:[%s6395_s3 + $0x48] sm:$0xff] }
  0x60   : > { %4342 = vmatprep.subr.msk.mxu1 %vm430_vm0, %v345_v9  ;;  %4322 = vmatprep.mubr.msk.f32.mxu0 %vm430_vm0, %v270_v10 }
  0x61   : > { %4350 = vmatprep.mubr.msk.f32.mxu1 %vm430_vm0, %v278_v11 }
  0x62   : > { %4315 = vmatpush3.xpose.msk.msra.mxu0 %vm430_vm0, %v337_v8  ;;  %v1719_v8 = vld [vmem:[%s6395_s3] sm:$0xff] }
  0x63   : > { %4343 = vmatpush3.xpose.msk.msra.mxu1 %vm430_vm0, %v345_v9  ;;  %4316 = vmatprep.subr.msk.mxu0 %vm430_vm0, %v336_v12 }
  0x64   : > { %4344 = vmatprep.subr.msk.mxu1 %vm430_vm0, %v344_v13 }
  0x66   : > { %4317 = vmatpush3.xpose.msk.msra.mxu0 %vm430_vm0, %v336_v12 }
  0x67   : > { %4345 = vmatpush3.xpose.msk.msra.mxu1 %vm430_vm0, %v344_v13  ;;  %4318 = vmatprep.subr.msk.mxu0 %vm430_vm0, %v335_v14 }
  0x68   : > { %4346 = vmatprep.subr.msk.mxu1 %vm430_vm0, %v343_v15 }
  0x6a   : > { %4319 = vmatpush3.xpose.msk.msra.mxu0 %vm430_vm0, %v335_v14 }
  0x6b   : > { %4347 = vmatpush3.xpose.msk.msra.mxu1 %vm430_vm0, %v343_v15  ;;  %4320 = vmatprep.subr.msk.mxu0 %vm430_vm0, %v334_v16  ;;  %v1727_v15 = vld [vmem:[%s6395_s3 + $0x40] sm:$0xff] }
  0x6c   : > { %4348 = vmatprep.subr.msk.mxu1 %vm430_vm0, %v342_v17 }
  0x6e   : > { %4321 = vmatpush3.xpose.msk.msra.mxu0 %vm430_vm0, %v334_v16  ;;  %v1730_v16 = vld [vmem:[%s6395_s3 + $0x58] sm:$0xff] }
  0x6f   : > { %4349 = vmatpush3.xpose.msk.msra.mxu1 %vm430_vm0, %v342_v17  ;;  %4362 = vmatprep.subr.msk.mxu0 %vm430_vm0, %v357_v18 }
  0x70   : > { %4390 = vmatprep.subr.msk.mxu1 %vm430_vm0, %v365_v19 }
  0x71   : > { %4323 = vmatmul.mubr.msk.f32.vlgmr.msra.gmra.mxu0 %vm430_vm0, %v271_v20 }
  0x72   : > { %4351 = vmatmul.mubr.msk.f32.vlgmr.msra.gmra.mxu1 %vm430_vm0, %v279_v21  ;;  %4363 = vmatpush3.xpose.msk.msra.mxu0 %vm430_vm0, %v357_v18 }
  0x73   : > { %4391 = vmatpush3.xpose.msk.msra.mxu1 %vm430_vm0, %v365_v19  ;;  %4364 = vmatprep.subr.msk.mxu0 %vm430_vm0, %v356_v22 }
  0x74   : > { %4392 = vmatprep.subr.msk.mxu1 %vm430_vm0, %v364_v23  ;;  %4325 = vmatprep.mubr.msk.f32.mxu0 %vm430_vm0, %v272_v24 }
  0x75   : > { %4353 = vmatprep.mubr.msk.f32.mxu1 %vm430_vm0, %v280_v25  ;;  %4326 = vmatmul.mubr.msk.f32.gmra.mxu0 %vm430_vm0, %v273_v26 }
  0x76   : > { %4354 = vmatmul.mubr.msk.f32.gmra.mxu1 %vm430_vm0, %v281_v27  ;;  %4365 = vmatpush3.xpose.msk.msra.mxu0 %vm430_vm0, %v356_v22  ;;  %v1722_v22 = vld [vmem:[%s6395_s3 + $0x18] sm:$0xff] }
  0x77   : > { %4393 = vmatpush3.xpose.msk.msra.mxu1 %vm430_vm0, %v364_v23  ;;  %4366 = vmatprep.subr.msk.mxu0 %vm430_vm0, %v355_v28 }
  0x78   : > { %4394 = vmatprep.subr.msk.mxu1 %vm430_vm0, %v363_v29  ;;  %4328 = vmatprep.mubr.msk.f32.mxu0 %vm430_vm0, %v274_v30 }
  0x79   : > { %4356 = vmatprep.mubr.msk.f32.mxu1 %vm430_vm0, %v282_v31  ;;  %4329 = vmatmul.mubr.msk.f32.gmra.mxu0 %vm430_vm0, %v275_v32  ;;  %v1729_v31 = vld [vmem:[%s6395_s3 + $0x50] sm:$0xff] }
  0x7a   : > { %4357 = vmatmul.mubr.msk.f32.gmra.mxu1 %vm430_vm0, %v283_v33  ;;  %4367 = vmatpush3.xpose.msk.msra.mxu0 %vm430_vm0, %v355_v28 }
  0x7b   : > { %4395 = vmatpush3.xpose.msk.msra.mxu1 %vm430_vm0, %v363_v29  ;;  %4368 = vmatprep.subr.msk.mxu0 %vm430_vm0, %v354_v34 }
  0x7c   : > { %4396 = vmatprep.subr.msk.mxu1 %vm430_vm0, %v362_v35  ;;  %4331 = vmatprep.mubr.msk.f32.mxu0 %vm430_vm0, %v276_v36 }
  0x7d   : > { %4359 = vmatprep.mubr.msk.f32.mxu1 %vm430_vm0, %v284_v37  ;;  %4332 = vmatmul.mubr.msk.f32.gmra.mxu0 %vm430_vm0, %v277_v38  ;;  %v1721_v37 = vld [vmem:[%s6395_s3 + $0x10] sm:$0xff]  ;;  %v1732_v38 = vld [vmem:[%s6395_s3 + $0x68] sm:$0xff] }
  0x7e   : > { %4360 = vmatmul.mubr.msk.f32.gmra.mxu1 %vm430_vm0, %v285_v39  ;;  %4369 = vmatpush3.xpose.msk.msra.mxu0 %vm430_vm0, %v354_v34 }
  0x7f   : > { %4397 = vmatpush3.xpose.msk.msra.mxu1 %vm430_vm0, %v362_v35  ;;  %4370 = vmatprep.subr.msk.mxu0 %vm430_vm0, %v353_v40 }
  0x80   : > { %4398 = vmatprep.subr.msk.mxu1 %vm430_vm0, %v361_v41  ;;  %4378 = vmatprep.mubr.msk.f32.mxu0 %vm430_vm0, %v286_v42 }
  0x81   : > { %4406 = vmatprep.mubr.msk.f32.mxu1 %vm430_vm0, %v294_v43  ;;  %v1724_v43 = vld [vmem:[%s6395_s3 + $0x28] sm:$0xff] }
  0x82   : > { %4371 = vmatpush3.xpose.msk.msra.mxu0 %vm430_vm0, %v353_v40 }
  0x83   : > { %4399 = vmatpush3.xpose.msk.msra.mxu1 %vm430_vm0, %v361_v41  ;;  %4372 = vmatprep.subr.msk.mxu0 %vm430_vm0, %v352_v44 }
  0x84   : > { %4400 = vmatprep.subr.msk.mxu1 %vm430_vm0, %v360_v45 }
  0x86   : > { %4373 = vmatpush3.xpose.msk.msra.mxu0 %vm430_vm0, %v352_v44 }
  0x87   : > { %4401 = vmatpush3.xpose.msk.msra.mxu1 %vm430_vm0, %v360_v45  ;;  %4374 = vmatprep.subr.msk.mxu0 %vm430_vm0, %v351_v46 }
  0x88   : > { %4402 = vmatprep.subr.msk.mxu1 %vm430_vm0, %v359_v47 }
  0x8a   : > { %4375 = vmatpush3.xpose.msk.msra.mxu0 %vm430_vm0, %v351_v46 }
  0x8b   : > { %4403 = vmatpush3.xpose.msk.msra.mxu1 %vm430_vm0, %v359_v47  ;;  %4376 = vmatprep.subr.msk.mxu0 %vm430_vm0, %v350_v48 }
  0x8c   : > { %4404 = vmatprep.subr.msk.mxu1 %vm430_vm0, %v358_v49 }
  0x8e   : > { %4377 = vmatpush3.xpose.msk.msra.mxu0 %vm430_vm0, %v350_v48 }
  0x8f   : > { %4405 = vmatpush3.xpose.msk.msra.mxu1 %vm430_vm0, %v358_v49 }
  0x91   : > { %4379 = vmatmul.mubr.msk.f32.vlgmr.msra.gmra.mxu0 %vm430_vm0, %v287_v50 }
  0x92   : > { %4407 = vmatmul.mubr.msk.f32.vlgmr.msra.gmra.mxu1 %vm430_vm0, %v295_v51  ;;  %4381 = vmatprep.mubr.msk.f32.mxu0 %vm430_vm0, %v288_v52  ;;  %v1731_v51 = vld [vmem:[%s6395_s3 + $0x60] sm:$0xff] }
  0x93   : > { %4409 = vmatprep.mubr.msk.f32.mxu1 %vm430_vm0, %v296_v53 }
  0x95   : > { %4382 = vmatmul.mubr.msk.f32.gmra.mxu0 %vm430_vm0, %v289_v54 }
  0x96   : > { %4410 = vmatmul.mubr.msk.f32.gmra.mxu1 %vm430_vm0, %v297_v55  ;;  %4384 = vmatprep.mubr.msk.f32.mxu0 %vm430_vm0, %v290_v56 }
  0x97   : > { %4412 = vmatprep.mubr.msk.f32.mxu1 %vm430_vm0, %v298_v57  ;;  %v1723_v57 = vld [vmem:[%s6395_s3 + $0x20] sm:$0xff] }
  0x99   : > { %4385 = vmatmul.mubr.msk.f32.gmra.mxu0 %vm430_vm0, %v291_v58  ;;  %v1734_v58 = vld [vmem:[%s6395_s3 + $0x78] sm:$0xff] }
  0x9a   : > { %4413 = vmatmul.mubr.msk.f32.gmra.mxu1 %vm430_vm0, %v299_v59  ;;  %4387 = vmatprep.mubr.msk.f32.mxu0 %vm430_vm0, %v292_v60 }
  0x9b   : > { %4415 = vmatprep.mubr.msk.f32.mxu1 %vm430_vm0, %v300_v61 }
  0x9d   : > { %4388 = vmatmul.mubr.msk.f32.gmra.mxu0 %vm430_vm0, %v293_v62 }
  0x9e   : > { %4416 = vmatmul.mubr.msk.f32.gmra.mxu1 %vm430_vm0, %v301_v63  ;;  %v1726_v63 = vld [vmem:[%s6395_s3 + $0x38] sm:$0xff] }
  0xf1   : > { %v4212_v0 = vpop.f32.mrf.mxu0 }
  0xf2   : > { %v4240_v1 = vpop.f32.mrf.mxu1  ;;  %v1656_v4 = vmul.f32 0.17677669, %v4212_v0 }
  0xf3   : > { %v1664_v5 = vmul.f32 0.17677669, %v4240_v1  ;;  %v545_v6 = vpop.f32.mrf.mxu0 }
  0xf4   : > { %v698_v7 = vpop.f32.mrf.mxu1  ;;  %v1655_v9 = vmul.f32 0.17677669, %v545_v6  ;;  %v5290_v11 = vadd.f32 %v1720_v2, %v1656_v4 }
  0xf5   : > { %v1663_v10 = vmul.f32 0.17677669, %v698_v7  ;;  %v5292_v12 = vadd.f32 %v1728_v3, %v1664_v5  ;;  %v4215_v14 = vpop.f32.mrf.mxu0  ;;  %v1733_v7 = vld [vmem:[%s6395_s3 + $0x70] sm:$0xff] }
  0xf6   : > { %v4243_v13 = vpop.f32.mrf.mxu1  ;;  %v1851_v17 = vsel %vm1847_vm1, %v5290_v11, -inf  ;;  %v5302_v19 = vadd.f32 %v1719_v8, %v1655_v9  ;;  %v1658_v20 = vmul.f32 0.17677669, %v4215_v14 }
  0xf7   : > { %v1666_v18 = vmul.f32 0.17677669, %v4243_v13  ;;  %1852 = vmax.xlane.f32.xlu1 %v1851_v17  ;;  %v1875_v24 = vsel %vm1847_vm1, %v5292_v12, -inf  ;;  %v5311_v25 = vadd.f32 %v1727_v15, %v1663_v10  ;;  %v555_v27 = vpop.f32.mrf.mxu0  ;;  %v1725_v10 = vld [vmem:[%s6395_s3 + $0x30] sm:$0xff] }
  0xf8   : > { %v708_v21 = vpop.f32.mrf.mxu1  ;;  %v1848_v23 = vsel %vm1847_vm1, %v5302_v19, -inf  ;;  %v5315_v30 = vadd.f32 %v1722_v22, %v1658_v20  ;;  %v1657_v32 = vmul.f32 0.17677669, %v555_v27  ;;  %v1736_v20 = vld [vmem:[%s6395_s3 + $0x88] sm:$0xff] }
  0xf9   : > { %v5313_v26 = vadd.f32 %v1730_v16, %v1666_v18  ;;  %1849 = vmax.xlane.f32.xlu0 %v1848_v23  ;;  %v1665_v29 = vmul.f32 0.17677669, %v708_v21  ;;  %v1872_v33 = vsel %vm1847_vm1, %v5311_v25, -inf  ;;  %v4218_v36 = vpop.f32.mrf.mxu0  ;;  %v1744_v18 = vld [vmem:[%s6395_s3 + $0xc8] sm:$0xff] }
  0xfa   : > { %v4246_v28 = vpop.f32.mrf.mxu1  ;;  %v1857_v39 = vsel %vm1847_vm1, %v5315_v30, -inf  ;;  %v1660_v40 = vmul.f32 0.17677669, %v4218_v36  ;;  %v5337_v44 = vadd.f32 %v1721_v37, %v1657_v32  ;;  %v1735_v37 = vld [vmem:[%s6395_s3 + $0x80] sm:$0xff] }
  0xfb   : > { %1876 = vmax.xlane.f32.xlu1 %v1875_v24  ;;  %v1881_v34 = vsel %vm1847_vm1, %v5313_v26, -inf  ;;  %v1668_v35 = vmul.f32 0.17677669, %v4246_v28  ;;  %v5332_v41 = vadd.f32 %v1729_v31, %v1665_v29  ;;  %v565_v46 = vpop.f32.mrf.mxu0 }
  0xfc   : > { %v718_v42 = vpop.f32.mrf.mxu1  ;;  %v5343_v50 = vadd.f32 %v1724_v43, %v1660_v40  ;;  %v1659_v52 = vmul.f32 0.17677669, %v565_v46  ;;  %v1854_v53 = vsel %vm1847_vm1, %v5337_v44, -inf }
  0xfd   : > { %1873 = vmax.xlane.f32.xlu0 %v1872_v33  ;;  %v5339_v45 = vadd.f32 %v1732_v38, %v1668_v35  ;;  %v1667_v48 = vmul.f32 0.17677669, %v718_v42  ;;  %v1878_v49 = vsel %vm1847_vm1, %v5332_v41, -inf  ;;  %v4221_v56 = vpop.f32.mrf.mxu0  ;;  %v1746_v38 = vld [vmem:[%s6395_s3 + $0xd8] sm:$0xff] }
  0xfe   : > { %v4249_v47 = vpop.f32.mrf.mxu1  ;;  %v1863_v59 = vsel %vm1847_vm1, %v5343_v50, -inf  ;;  %v1662_v60 = vmul.f32 0.17677669, %v4221_v56  ;;  %v5365_v1 = vadd.f32 %v1723_v57, %v1659_v52  ;;  %v1745_v57 = vld [vmem:[%s6395_s3 + $0xd0] sm:$0xff] }
  0xff   : > { %1882 = vmax.xlane.f32.xlu1 %v1881_v34  ;;  %v1887_v54 = vsel %vm1847_vm1, %v5339_v45, -inf  ;;  %v1670_v55 = vmul.f32 0.17677669, %v4249_v47  ;;  %v5360_v61 = vadd.f32 %v1731_v51, %v1667_v48  ;;  %v575_v0 = vpop.f32.mrf.mxu0  ;;  %v1743_v34 = vld [vmem:[%s6395_s3 + $0xc0] sm:$0xff]  ;;  %v1738_v48 = vld [vmem:[%s6395_s3 + $0x98] sm:$0xff] }
 0x100   : > { %v728_v62 = vpop.f32.mrf.mxu1  ;;  %v5371_v5 = vadd.f32 %v1726_v63, %v1662_v60  ;;  %v1661_v6 = vmul.f32 0.17677669, %v575_v0  ;;  %v1860_v8 = vsel %vm1847_vm1, %v5365_v1, -inf  ;;  %v1737_v0 = vld [vmem:[%s6395_s3 + $0x90] sm:$0xff] }
 0x101   : > { %1858 = vmax.xlane.f32.xlu0 %v1857_v39  ;;  %v5367_v2 = vadd.f32 %v1734_v58, %v1670_v55  ;;  %v1669_v3 = vmul.f32 0.17677669, %v728_v62  ;;  %v1884_v4 = vsel %vm1847_vm1, %v5360_v61, -inf }
 0x102   : > { %v1869_v13 = vsel %vm1847_vm1, %v5371_v5, -inf  ;;  %v5387_v15 = vadd.f32 %v1725_v10, %v1661_v6 }
 0x103   : > { %1879 = vmax.xlane.f32.xlu1 %v1878_v49  ;;  %v1893_v9 = vsel %vm1847_vm1, %v5367_v2, -inf  ;;  %v5385_v14 = vadd.f32 %v1733_v7, %v1669_v3  ;;  %v1748_v3 = vld [vmem:[%s6395_s3 + $0xe8] sm:$0xff] }
 0x104   : > { %v1866_v28 = vsel %vm1847_vm1, %v5387_v15, -inf }
 0x105   : > { %1855 = vmax.xlane.f32.xlu0 %v1854_v53  ;;  %v1890_v23 = vsel %vm1847_vm1, %v5385_v14, -inf }
 0x107   : > { %1888 = vmax.xlane.f32.xlu1 %v1887_v54 }
 0x109   : > { %1864 = vmax.xlane.f32.xlu0 %v1863_v59 }
 0x10b   : > { %1885 = vmax.xlane.f32.xlu1 %v1884_v4 }
 0x10d   : > { %1861 = vmax.xlane.f32.xlu0 %v1860_v8 }
 0x10f   : > { %1894 = vmax.xlane.f32.xlu1 %v1893_v9  ;;  %v1740_v9 = vld [vmem:[%s6395_s3 + $0xa8] sm:$0xff] }
 0x111   : > { %1870 = vmax.xlane.f32.xlu0 %v1869_v13  ;;  %v4268_v17 = vpop.f32.mrf.mxu0 }
 0x112   : > { %v4296_v16 = vpop.f32.mrf.mxu1  ;;  %v1672_v22 = vmul.f32 0.17677669, %v4268_v17 }
 0x113   : > { %v1680_v21 = vmul.f32 0.17677669, %v4296_v16  ;;  %1891 = vmax.xlane.f32.xlu1 %v1890_v23  ;;  %v851_v27 = vpop.f32.mrf.mxu0 }
 0x114   : > { %v1004_v24 = vpop.f32.mrf.mxu1  ;;  %v1671_v31 = vmul.f32 0.17677669, %v851_v27  ;;  %v5401_v33 = vadd.f32 %v1736_v20, %v1672_v22  ;;  %v1747_v22 = vld [vmem:[%s6395_s3 + $0xe0] sm:$0xff] }
 0x115   : > { %v1679_v29 = vmul.f32 0.17677669, %v1004_v24  ;;  %v5399_v32 = vadd.f32 %v1744_v18, %v1680_v21  ;;  %1867 = vmax.xlane.f32.xlu0 %v1866_v28  ;;  %v4271_v36 = vpop.f32.mrf.mxu0 }
 0x116   : > { %v4299_v35 = vpop.f32.mrf.mxu1  ;;  %v1899_v42 = vsel %vm1847_vm1, %v5401_v33, -inf  ;;  %v1674_v43 = vmul.f32 0.17677669, %v4271_v36  ;;  %v5421_v49 = vadd.f32 %v1735_v37, %v1671_v31  ;;  %v1739_v31 = vld [vmem:[%s6395_s3 + $0xa0] sm:$0xff] }
 0x117   : > { %v1923_v39 = vsel %vm1847_vm1, %v5399_v32, -inf  ;;  %v1682_v40 = vmul.f32 0.17677669, %v4299_v35  ;;  %v5416_v47 = vadd.f32 %v1743_v34, %v1679_v29  ;;  %v861_v52 = vpop.f32.mrf.mxu0  ;;  %v1750_v34 = vld [vmem:[%s6395_s3 + $0xf8] sm:$0xff] }
 0x118   : > { %1924 = vmax.xlane.f32.xlu1 %v1923_v39  ;;  %v1014_v46 = vpop.f32.mrf.mxu1  ;;  %v5427_v56 = vadd.f32 %v1738_v48, %v1674_v43  ;;  %v1673_v58 = vmul.f32 0.17677669, %v861_v52  ;;  %v1896_v59 = vsel %vm1847_vm1, %v5421_v49, -inf  ;;  %v1742_v39 = vld [vmem:[%s6395_s3 + $0xb8] sm:$0xff] }
 0x119   : > { %v5423_v51 = vadd.f32 %v1746_v38, %v1682_v40  ;;  %1900 = vmax.xlane.f32.xlu0 %v1899_v42  ;;  %v1681_v54 = vmul.f32 0.17677669, %v1014_v46  ;;  %v1920_v55 = vsel %vm1847_vm1, %v5416_v47, -inf  ;;  %v4274_v63 = vpop.f32.mrf.mxu0 }
 0x11a   : > { %v4302_v53 = vpop.f32.mrf.mxu1  ;;  %v1905_v4 = vsel %vm1847_vm1, %v5427_v56, -inf  ;;  %v1676_v6 = vmul.f32 0.17677669, %v4274_v63  ;;  %v5449_v10 = vadd.f32 %v1737_v0, %v1673_v58  ;;  %v1741_v58 = vld [vmem:[%s6395_s3 + $0xb0] sm:$0xff] }
 0x11b   : > { %v1929_v60 = vsel %vm1847_vm1, %v5423_v51, -inf  ;;  %v1684_v62 = vmul.f32 0.17677669, %v4302_v53  ;;  %v5444_v7 = vadd.f32 %v1745_v57, %v1681_v54  ;;  %v871_v16 = vpop.f32.mrf.mxu0  ;;  %v1749_v54 = vld [vmem:[%s6395_s3 + $0xf0] sm:$0xff] }
 0x11c   : > { %1921 = vmax.xlane.f32.xlu1 %v1920_v55  ;;  %v1024_v8 = vpop.f32.mrf.mxu1  ;;  %v5455_v21 = vadd.f32 %v1740_v9, %v1676_v6  ;;  %v1675_v23 = vmul.f32 0.17677669, %v871_v16  ;;  %v1902_v24 = vsel %vm1847_vm1, %v5449_v10, -inf }
 0x11d   : > { %1897 = vmax.xlane.f32.xlu0 %v1896_v59  ;;  %v5451_v13 = vadd.f32 %v1748_v3, %v1684_v62  ;;  %v1683_v18 = vmul.f32 0.17677669, %v1024_v8  ;;  %v1926_v20 = vsel %vm1847_vm1, %v5444_v7, -inf  ;;  %v4277_v29 = vpop.f32.mrf.mxu0  ;;  %v1760_v3 = vld [vmem:[%s6395_s3 + $0x148] sm:$0xff] }
 0x11e   : > { %v4305_v17 = vpop.f32.mrf.mxu1  ;;  %v1911_v35 = vsel %vm1847_vm1, %v5455_v21, -inf  ;;  %v1678_v36 = vmul.f32 0.17677669, %v4277_v29  ;;  %v5477_v42 = vadd.f32 %v1739_v31, %v1675_v23  ;;  %v1751_v31 = vld [vmem:[%s6395_s3 + $0x100] sm:$0xff] }
 0x11f   : > { %v1935_v27 = vsel %vm1847_vm1, %v5451_v13, -inf  ;;  %v1686_v28 = vmul.f32 0.17677669, %v4305_v17  ;;  %v5472_v37 = vadd.f32 %v1747_v22, %v1683_v18  ;;  %v881_v40 = vpop.f32.mrf.mxu0 }
 0x120   : > { %1930 = vmax.xlane.f32.xlu1 %v1929_v60  ;;  %v1034_v38 = vpop.f32.mrf.mxu1  ;;  %v5483_v52 = vadd.f32 %v1742_v39, %v1678_v36  ;;  %v1677_v53 = vmul.f32 0.17677669, %v881_v40  ;;  %v1908_v55 = vsel %vm1847_vm1, %v5477_v42, -inf }
 0x121   : > { %1906 = vmax.xlane.f32.xlu0 %v1905_v4  ;;  %v5479_v43 = vadd.f32 %v1750_v34, %v1686_v28  ;;  %v1685_v46 = vmul.f32 0.17677669, %v1034_v38  ;;  %v1932_v48 = vsel %vm1847_vm1, %v5472_v37, -inf  ;;  %v1752_v4 = vld [vmem:[%s6395_s3 + $0x108] sm:$0xff]  ;;  %v1762_v34 = vld [vmem:[%s6395_s3 + $0x158] sm:$0xff] }
 0x122   : > { %v1917_v59 = vsel %vm1847_vm1, %v5483_v52, -inf  ;;  %v5499_v62 = vadd.f32 %v1741_v58, %v1677_v53 }
 0x123   : > { %v1941_v57 = vsel %vm1847_vm1, %v5479_v43, -inf  ;;  %v5497_v60 = vadd.f32 %v1749_v54, %v1685_v46 }
 0x124   : > { %1927 = vmax.xlane.f32.xlu1 %v1926_v20  ;;  %v1914_v18 = vsel %vm1847_vm1, %v5499_v62, -inf }
 0x125   : > { %1903 = vmax.xlane.f32.xlu0 %v1902_v24  ;;  %v1938_v9 = vsel %vm1847_vm1, %v5497_v60, -inf }
 0x128   : > { %1936 = vmax.xlane.f32.xlu1 %v1935_v27  ;;  %v1759_v27 = vld [vmem:[%s6395_s3 + $0x140] sm:$0xff] }
 0x129   : > { %1912 = vmax.xlane.f32.xlu0 %v1911_v35 }
 0x12c   : > { %1933 = vmax.xlane.f32.xlu1 %v1932_v48  ;;  %v1754_v48 = vld [vmem:[%s6395_s3 + $0x118] sm:$0xff] }
 0x12d   : > { %1909 = vmax.xlane.f32.xlu0 %v1908_v55 }
 0x130   : > { %1942 = vmax.xlane.f32.xlu1 %v1941_v57 }
 0x131   : > { %1918 = vmax.xlane.f32.xlu0 %v1917_v59  ;;  %v4324_v0 = vpop.f32.mrf.mxu0 }
 0x132   : > { %v4352_v63 = vpop.f32.mrf.mxu1  ;;  %v1688_v8 = vmul.f32 0.17677669, %v4324_v0  ;;  %v1761_v0 = vld [vmem:[%s6395_s3 + $0x150] sm:$0xff] }
 0x133   : > { %v1696_v6 = vmul.f32 0.17677669, %v4352_v63  ;;  %v1157_v17 = vpop.f32.mrf.mxu0 }
 0x134   : > { %v1310_v16 = vpop.f32.mrf.mxu1  ;;  %1939 = vmax.xlane.f32.xlu1 %v1938_v9  ;;  %v1687_v22 = vmul.f32 0.17677669, %v1157_v17  ;;  %v5513_v24 = vadd.f32 %v1752_v4, %v1688_v8  ;;  %v1764_v17 = vld [vmem:[%s6395_s3 + $0x168] sm:$0xff] }
 0x135   : > { %v1695_v20 = vmul.f32 0.17677669, %v1310_v16  ;;  %v5511_v23 = vadd.f32 %v1760_v3, %v1696_v6  ;;  %1915 = vmax.xlane.f32.xlu0 %v1914_v18  ;;  %v4327_v29 = vpop.f32.mrf.mxu0  ;;  %v1753_v16 = vld [vmem:[%s6395_s3 + $0x110] sm:$0xff] }
 0x136   : > { %v4355_v28 = vpop.f32.mrf.mxu1  ;;  %v1947_v38 = vsel %vm1847_vm1, %v5513_v24, -inf  ;;  %v1690_v39 = vmul.f32 0.17677669, %v4327_v29  ;;  %v5533_v53 = vadd.f32 %v1751_v31, %v1687_v22 }
 0x137   : > { %v1971_v35 = vsel %vm1847_vm1, %v5511_v23, -inf  ;;  %v1698_v36 = vmul.f32 0.17677669, %v4355_v28  ;;  %v5528_v46 = vadd.f32 %v1759_v27, %v1695_v20  ;;  %v1167_v55 = vpop.f32.mrf.mxu0  ;;  %v1756_v28 = vld [vmem:[%s6395_s3 + $0x128] sm:$0xff] }
 0x138   : > { %1972 = vmax.xlane.f32.xlu1 %v1971_v35  ;;  %v1320_v40 = vpop.f32.mrf.mxu1  ;;  %v5539_v63 = vadd.f32 %v1754_v48, %v1690_v39  ;;  %v1689_v3 = vmul.f32 0.17677669, %v1167_v55  ;;  %v1944_v4 = vsel %vm1847_vm1, %v5533_v53, -inf }
 0x139   : > { %v5535_v54 = vadd.f32 %v1762_v34, %v1698_v36  ;;  %1948 = vmax.xlane.f32.xlu0 %v1947_v38  ;;  %v1697_v58 = vmul.f32 0.17677669, %v1320_v40  ;;  %v1968_v59 = vsel %vm1847_vm1, %v5528_v46, -inf  ;;  %v4330_v9 = vpop.f32.mrf.mxu0  ;;  %v1763_v40 = vld [vmem:[%s6395_s3 + $0x160] sm:$0xff] }
 0x13a   : > { %v4358_v57 = vpop.f32.mrf.mxu1  ;;  %v1953_v18 = vsel %vm1847_vm1, %v5539_v63, -inf  ;;  %v1692_v20 = vmul.f32 0.17677669, %v4330_v9  ;;  %v5561_v29 = vadd.f32 %v1753_v16, %v1689_v3  ;;  %v1766_v3 = vld [vmem:[%s6395_s3 + $0x178] sm:$0xff] }
 0x13b   : > { %v1977_v6 = vsel %vm1847_vm1, %v5535_v54, -inf  ;;  %v1700_v8 = vmul.f32 0.17677669, %v4358_v57  ;;  %v5556_v22 = vadd.f32 %v1761_v0, %v1697_v58  ;;  %v1177_v34 = vpop.f32.mrf.mxu0  ;;  %v1755_v0 = vld [vmem:[%s6395_s3 + $0x120] sm:$0xff]  ;;  %v1758_v16 = vld [vmem:[%s6395_s3 + $0x138] sm:$0xff] }
 0x13c   : > { %1969 = vmax.xlane.f32.xlu1 %v1968_v59  ;;  %v1330_v27 = vpop.f32.mrf.mxu1  ;;  %v5567_v39 = vadd.f32 %v1756_v28, %v1692_v20  ;;  %v1691_v48 = vmul.f32 0.17677669, %v1177_v34  ;;  %v1950_v55 = vsel %vm1847_vm1, %v5561_v29, -inf }
 0x13d   : > { %1945 = vmax.xlane.f32.xlu0 %v1944_v4  ;;  %v5563_v31 = vadd.f32 %v1764_v17, %v1700_v8  ;;  %v1699_v36 = vmul.f32 0.17677669, %v1330_v27  ;;  %v1974_v38 = vsel %vm1847_vm1, %v5556_v22, -inf  ;;  %v4333_v59 = vpop.f32.mrf.mxu0 }
 0x13e   : > { %v4361_v35 = vpop.f32.mrf.mxu1  ;;  %v1959_v4 = vsel %vm1847_vm1, %v5567_v39, -inf }
 0x13f   : > { %v1983_v57 = vsel %vm1847_vm1, %v5563_v31, -inf  ;;  %v1702_v58 = vmul.f32 0.17677669, %v4361_v35  ;;  %v5584_v8 = vadd.f32 %v1763_v40, %v1699_v36  ;;  %v1187_v17 = vpop.f32.mrf.mxu0  ;;  %v1765_v36 = vld [vmem:[%s6395_s3 + $0x170] sm:$0xff] }
 0x140   : > { %1978 = vmax.xlane.f32.xlu1 %v1977_v6  ;;  %v1694_v6 = vmul.f32 0.17677669, %v4333_v59  ;;  %v1340_v9 = vpop.f32.mrf.mxu1  ;;  %v1693_v35 = vmul.f32 0.17677669, %v1187_v17 }
 0x141   : > { %1954 = vmax.xlane.f32.xlu0 %v1953_v18  ;;  %v5589_v18 = vadd.f32 %v1755_v0, %v1691_v48  ;;  %v5591_v20 = vadd.f32 %v1766_v3, %v1702_v58  ;;  %v1701_v27 = vmul.f32 0.17677669, %v1340_v9  ;;  %v1980_v28 = vsel %vm1847_vm1, %v5584_v8, -inf  ;;  %v1757_v48 = vld [vmem:[%s6395_s3 + $0x130] sm:$0xff]  ;;  %v1776_v3 = vld [vmem:[%s6395_s3 + $0x1c8] sm:$0xff] }
 0x142   : > { %v5595_v34 = vadd.f32 %v1758_v16, %v1694_v6  ;;  %v5611_v58 = vadd.f32 %v1757_v48, %v1693_v35  ;;  %v1775_v48 = vld [vmem:[%s6395_s3 + $0x1c0] sm:$0xff] }
 0x143   : > { %v1989_v40 = vsel %vm1847_vm1, %v5591_v20, -inf }
 0x144   : > { %1975 = vmax.xlane.f32.xlu1 %v1974_v38  ;;  %6425 = vst [vmem:[#allocation2_spill] sm:$0xff] %v5595_v34  ;;  %v1956_v38 = vsel %vm1847_vm1, %v5589_v18, -inf  ;;  %6427 = vst [vmem:[#allocation4_spill] sm:$0xff] %v5611_v58 }
 0x145   : > { %1951 = vmax.xlane.f32.xlu0 %v1950_v55  ;;  %v1965_v55 = vsel %vm1847_vm1, %v5595_v34, -inf }
 0x148   : > { %1984 = vmax.xlane.f32.xlu1 %v1983_v57  ;;  %v5609_v57 = vadd.f32 %v1765_v36, %v1701_v27 }
 0x149   : > { %1960 = vmax.xlane.f32.xlu0 %v1959_v4  ;;  %v1768_v4 = vld [vmem:[%s6395_s3 + $0x188] sm:$0xff] }
 0x14a   : > { %6426 = vst [vmem:[#allocation3_spill] sm:$0xff] %v5609_v57  ;;  %v1986_v16 = vsel %vm1847_vm1, %v5609_v57, -inf }
 0x14c   : > { %1981 = vmax.xlane.f32.xlu1 %v1980_v28  ;;  %v1962_v28 = vsel %vm1847_vm1, %v5611_v58, -inf }
 0x14d   : > { %1957 = vmax.xlane.f32.xlu0 %v1956_v38 }
 0x150   : > { %1990 = vmax.xlane.f32.xlu1 %v1989_v40 }
 0x151   : > { %1966 = vmax.xlane.f32.xlu0 %v1965_v55  ;;  %v4380_v0 = vpop.f32.mrf.mxu0 }
 0x152   : > { %v4408_v59 = vpop.f32.mrf.mxu1  ;;  %v1704_v9 = vmul.f32 0.17677669, %v4380_v0  ;;  %v1767_v0 = vld [vmem:[%s6395_s3 + $0x180] sm:$0xff] }
 0x153   : > { %v1712_v6 = vmul.f32 0.17677669, %v4408_v59  ;;  %v1463_v27 = vpop.f32.mrf.mxu0 }
 0x154   : > { %v1616_v17 = vpop.f32.mrf.mxu1  ;;  %1987 = vmax.xlane.f32.xlu1 %v1986_v16  ;;  %v1703_v36 = vmul.f32 0.17677669, %v1463_v27  ;;  %v5625_v40 = vadd.f32 %v1768_v4, %v1704_v9  ;;  %v1778_v16 = vld [vmem:[%s6395_s3 + $0x1d8] sm:$0xff] }
 0x155   : > { %v1711_v35 = vmul.f32 0.17677669, %v1616_v17  ;;  %v5623_v38 = vadd.f32 %v1776_v3, %v1712_v6  ;;  %1963 = vmax.xlane.f32.xlu0 %v1962_v28  ;;  %v4383_v59 = vpop.f32.mrf.mxu0  ;;  %v1770_v28 = vld [vmem:[%s6395_s3 + $0x198] sm:$0xff] }
 0x156   : > { %6429 = vst [vmem:[#allocation6_spill] sm:$0xff] %v5625_v40  ;;  %v4411_v55 = vpop.f32.mrf.mxu1  ;;  %v1995_v6 = vsel %vm1847_vm1, %v5625_v40, -inf  ;;  %v1706_v9 = vmul.f32 0.17677669, %v4383_v59  ;;  %v5645_v58 = vadd.f32 %v1767_v0, %v1703_v36 }
 0x157   : > { %6428 = vst [vmem:[#allocation5_spill] sm:$0xff] %v5623_v38  ;;  %v2019_v3 = vsel %vm1847_vm1, %v5623_v38, -inf  ;;  %v1714_v4 = vmul.f32 0.17677669, %v4411_v55  ;;  %v5640_v27 = vadd.f32 %v1775_v48, %v1711_v35  ;;  %v1473_v34 = vpop.f32.mrf.mxu0  ;;  %v1777_v35 = vld [vmem:[%s6395_s3 + $0x1d0] sm:$0xff] }
 0x158   : > { %2020 = vmax.xlane.f32.xlu1 %v2019_v3  ;;  %v1626_v17 = vpop.f32.mrf.mxu1  ;;  %6431 = vst [vmem:[#allocation8_spill] sm:$0xff] %v5645_v58  ;;  %v5651_v59 = vadd.f32 %v1770_v28, %v1706_v9  ;;  %v1705_v48 = vmul.f32 0.17677669, %v1473_v34  ;;  %v1992_v36 = vsel %vm1847_vm1, %v5645_v58, -inf }
 0x159   : > { %6430 = vst [vmem:[#allocation7_spill] sm:$0xff] %v5640_v27  ;;  %v5647_v57 = vadd.f32 %v1778_v16, %v1714_v4  ;;  %1996 = vmax.xlane.f32.xlu0 %v1995_v6  ;;  %v1713_v55 = vmul.f32 0.17677669, %v1626_v17  ;;  %v2016_v40 = vsel %vm1847_vm1, %v5640_v27, -inf  ;;  %v4386_v3 = vpop.f32.mrf.mxu0  ;;  %v1769_v4 = vld [vmem:[%s6395_s3 + $0x190] sm:$0xff] }
 0x15a   : > { %v4414_v38 = vpop.f32.mrf.mxu1  ;;  %6433 = vst [vmem:[#allocation10_spill] sm:$0xff] %v5651_v59  ;;  %v2001_v34 = vsel %vm1847_vm1, %v5651_v59, -inf  ;;  %v1708_v6 = vmul.f32 0.17677669, %v4386_v3  ;;  %v5673_v28 = vadd.f32 %v1769_v4, %v1705_v48 }
 0x15b   : > { %6432 = vst [vmem:[#allocation9_spill] sm:$0xff] %v5647_v57  ;;  %v2025_v0 = vsel %vm1847_vm1, %v5647_v57, -inf  ;;  %v1716_v16 = vmul.f32 0.17677669, %v4414_v38  ;;  %v5668_v9 = vadd.f32 %v1777_v35, %v1713_v55  ;;  %v1772_v38 = vld [vmem:[%s6395_s3 + $0x1a8] sm:$0xff]  ;;  %v1483_v57 = vpop.f32.mrf.mxu0  ;;  %v1779_v55 = vld [vmem:[%s6395_s3 + $0x1e0] sm:$0xff] }
 0x15c   : > { %2017 = vmax.xlane.f32.xlu1 %v2016_v40  ;;  %v1780_v40 = vld [vmem:[%s6395_s3 + $0x1e8] sm:$0xff]  ;;  %v1636_v17 = vpop.f32.mrf.mxu1  ;;  %6435 = vst [vmem:[#allocation12_spill] sm:$0xff] %v5673_v28  ;;  %v5679_v3 = vadd.f32 %v1772_v38, %v1708_v6  ;;  %v1707_v35 = vmul.f32 0.17677669, %v1483_v57  ;;  %v1998_v48 = vsel %vm1847_vm1, %v5673_v28, -inf }
 0x15d   : > { %1993 = vmax.xlane.f32.xlu0 %v1992_v36  ;;  %6434 = vst [vmem:[#allocation11_spill] sm:$0xff] %v5668_v9  ;;  %v5675_v36 = vadd.f32 %v1780_v40, %v1716_v16  ;;  %v1715_v27 = vmul.f32 0.17677669, %v1636_v17  ;;  %v2022_v59 = vsel %vm1847_vm1, %v5668_v9, -inf  ;;  %v4389_v4 = vpop.f32.mrf.mxu0  ;;  %v1771_v40 = vld [vmem:[%s6395_s3 + $0x1a0] sm:$0xff] }
 0x15e   : > { %v4417_v58 = vpop.f32.mrf.mxu1  ;;  %6437 = vst [vmem:[#allocation14_spill] sm:$0xff] %v5679_v3  ;;  %v2007_v57 = vsel %vm1847_vm1, %v5679_v3, -inf  ;;  %v5701_v38 = vadd.f32 %v1771_v40, %v1707_v35 }
 0x15f   : > { %6436 = vst [vmem:[#allocation13_spill] sm:$0xff] %v5675_v36  ;;  %v1718_v16 = vmul.f32 0.17677669, %v4417_v58  ;;  %v5696_v6 = vadd.f32 %v1779_v55, %v1715_v27  ;;  %v1774_v58 = vld [vmem:[%s6395_s3 + $0x1b8] sm:$0xff]  ;;  %v1781_v27 = vld [vmem:[%s6395_s3 + $0x1f0] sm:$0xff] }
 0x160   : > { %2026 = vmax.xlane.f32.xlu1 %v2025_v0  ;;  %v2031_v0 = vsel %vm1847_vm1, %v5675_v36, -inf  ;;  %v1646_v17 = vpop.f32.mrf.mxu1  ;;  %v1493_v36 = vpop.f32.mrf.mxu0  ;;  %v2004_v35 = vsel %vm1847_vm1, %v5701_v38, -inf }
 0x161   : > { %2002 = vmax.xlane.f32.xlu0 %v2001_v34  ;;  %v1710_v34 = vmul.f32 0.17677669, %v4389_v4  ;;  %v1717_v28 = vmul.f32 0.17677669, %v1646_v17  ;;  %v2028_v9 = vsel %vm1847_vm1, %v5696_v6, -inf }
 0x162   : > { %v1709_v55 = vmul.f32 0.17677669, %v1493_v36 }
 0x163   : > { %v5707_v3 = vadd.f32 %v1774_v58, %v1710_v34 }
 0x164   : > { %2023 = vmax.xlane.f32.xlu1 %v2022_v59  ;;  %v1782_v59 = vld [vmem:[%s6395_s3 + $0x1f8] sm:$0xff] }
 0x165   : > { %1999 = vmax.xlane.f32.xlu0 %v1998_v48  ;;  %v5703_v48 = vadd.f32 %v1782_v59, %v1718_v16  ;;  %v1773_v16 = vld [vmem:[%s6395_s3 + $0x1b0] sm:$0xff]  ;;  %v2013_v4 = vsel %vm1847_vm1, %v5707_v3, -inf }
 0x166   : > { %v5723_v40 = vadd.f32 %v1773_v16, %v1709_v55 }
 0x168   : > { %2032 = vmax.xlane.f32.xlu1 %v2031_v0  ;;  %v2037_v0 = vsel %vm1847_vm1, %v5703_v48, -inf  ;;  %6438 = vst [vmem:[#allocation15_spill] sm:$0xff] %v5723_v40  ;;  %v2010_v59 = vsel %vm1847_vm1, %v5723_v40, -inf }
 0x169   : > { %2008 = vmax.xlane.f32.xlu0 %v2007_v57 }
 0x16c   : > { %2029 = vmax.xlane.f32.xlu1 %v2028_v9  ;;  %v5721_v9 = vadd.f32 %v1781_v27, %v1717_v28 }
 0x16d   : > { %2005 = vmax.xlane.f32.xlu0 %v2004_v35 }
 0x16e   : > { %v2034_v36 = vsel %vm1847_vm1, %v5721_v9, -inf }
 0x170   : > { %2038 = vmax.xlane.f32.xlu1 %v2037_v0 }
 0x171   : > { %2014 = vmax.xlane.f32.xlu0 %v2013_v4 }
 0x174   : > { %2035 = vmax.xlane.f32.xlu1 %v2034_v36 }
 0x175   : > { %2011 = vmax.xlane.f32.xlu0 %v2010_v59 }
 0x180   : > { %v1853_v57 = vpop.xlane.xlu1 %1852 }
 0x181   : > { %v2041_v34 = vsub.f32 %v5290_v11, %v1853_v57 }
 0x182   : > { %v1850_v17 = vpop.xlane.xlu0 %1849 }
 0x183   : > { %v2106_v58 = vmul.f32 1.442695, %v2041_v34  ;;  %v2040_v28 = vsub.f32 %v5302_v19, %v1850_v17 }
 0x184   : > { %v1877_v27 = vpop.xlane.xlu1 %1876 }
 0x185   : > { %4650 = vpow2.f32 %v2106_v58  ;;  %v2104_v55 = vmul.f32 1.442695, %v2040_v28  ;;  %v2049_v35 = vsub.f32 %v5292_v12, %v1877_v27 }
 0x186   : > { %v1874_v0 = vpop.xlane.xlu0 %1873 }
 0x187   : > { %4652 = vpow2.f32 %v2104_v55  ;;  %v2122_v16 = vmul.f32 1.442695, %v2049_v35  ;;  %v2048_v4 = vsub.f32 %v5311_v25, %v1874_v0 }
 0x188   : > { %v1883_v36 = vpop.xlane.xlu1 %1882 }
 0x189   : > { %4654 = vpow2.f32 %v2122_v16  ;;  %v2120_v59 = vmul.f32 1.442695, %v2048_v4  ;;  %v2051_v40 = vsub.f32 %v5313_v26, %v1883_v36 }
 0x18a   : > { %v1859_v11 = vpop.xlane.xlu0 %1858 }
 0x18b   : > { %4656 = vpow2.f32 %v2120_v59  ;;  %v2126_v57 = vmul.f32 1.442695, %v2051_v40  ;;  %v2043_v19 = vsub.f32 %v5315_v30, %v1859_v11 }
 0x18c   : > { %v1880_v34 = vpop.xlane.xlu1 %1879 }
 0x18d   : > { %v2110_v17 = vmul.f32 1.442695, %v2043_v19  ;;  %v2050_v58 = vsub.f32 %v5332_v41, %v1880_v34  ;;  %4658 = vpow2.f32 %v2126_v57 }
 0x18e   : > { %v1856_v12 = vpop.xlane.xlu0 %1855 }
 0x18f   : > { %4660 = vpow2.f32 %v2110_v17  ;;  %v2124_v28 = vmul.f32 1.442695, %v2050_v58  ;;  %v2042_v25 = vsub.f32 %v5337_v44, %v1856_v12 }
 0x190   : > { %v1889_v27 = vpop.xlane.xlu1 %1888 }
 0x191   : > { %v2108_v55 = vmul.f32 1.442695, %v2042_v25  ;;  %v2053_v35 = vsub.f32 %v5339_v45, %v1889_v27  ;;  %4662 = vpow2.f32 %v2124_v28 }
 0x192   : > { %v5738_v26 = vpop.eup %4650  ;;  %v1865_v40 = vpop.xlane.xlu0 %1864 }
 0x193   : > { %4664 = vpow2.f32 %v2108_v55  ;;  %v2130_v30 = vmul.f32 1.442695, %v2053_v35  ;;  %v2045_v0 = vsub.f32 %v5343_v50, %v1865_v40  ;;  %v2235_v41 = vsel %vm1847_vm1, %v5738_v26, 0.0 }
 0x194   : > { %v5743_v16 = vpop.eup %4652  ;;  %v1886_v4 = vpop.xlane.xlu1 %1885  ;;  %2236 = vadd.xlane.f32.xlu0 %v2235_v41 }
 0x195   : > { %v2114_v44 = vmul.f32 1.442695, %v2045_v0  ;;  %v2052_v36 = vsub.f32 %v5360_v61, %v1886_v4  ;;  %4666 = vpow2.f32 %v2130_v30  ;;  %v2232_v11 = vsel %vm1847_vm1, %v5743_v16, 0.0 }
 0x196   : > { %v5746_v59 = vpop.eup %4654  ;;  %v1862_v45 = vpop.xlane.xlu0 %1861 }
 0x197   : > { %4668 = vpow2.f32 %v2114_v44  ;;  %v2128_v57 = vmul.f32 1.442695, %v2052_v36  ;;  %v2044_v50 = vsub.f32 %v5365_v1, %v1862_v45  ;;  %v2259_v19 = vsel %vm1847_vm1, %v5746_v59, 0.0 }
 0x198   : > { %v5753_v34 = vpop.eup %4656  ;;  %2260 = vadd.xlane.f32.xlu1 %v2259_v19  ;;  %v1895_v17 = vpop.xlane.xlu1 %1894  ;;  %2233 = vadd.xlane.f32.xlu0 %v2232_v11 }
 0x199   : > { %v2112_v61 = vmul.f32 1.442695, %v2044_v50  ;;  %v2055_v58 = vsub.f32 %v5367_v2, %v1895_v17  ;;  %4670 = vpow2.f32 %v2128_v57  ;;  %v2256_v1 = vsel %vm1847_vm1, %v5753_v34, 0.0 }
 0x19a   : > { %v1871_v12 = vpop.xlane.xlu0 %1870  ;;  %v5756_v28 = vpop.eup %4658 }
 0x19b   : > { %4672 = vpow2.f32 %v2112_v61  ;;  %v2134_v25 = vmul.f32 1.442695, %v2055_v58  ;;  %v2047_v27 = vsub.f32 %v5371_v5, %v1871_v12  ;;  %v2265_v44 = vsel %vm1847_vm1, %v5756_v28, 0.0  ;;  %v373_v61 = vld [vmem:[%s5780_s8 + $0x38] sm:$0xff] }
 0x19c   : > { %v5761_v55 = vpop.eup %4660  ;;  %v1892_v35 = vpop.xlane.xlu1 %1891  ;;  %2257 = vadd.xlane.f32.xlu1 %v2256_v1  ;;  %4418 = vmatprep.subr.mxu0 %v373_v61 }
 0x19d   : > { %v2118_v40 = vmul.f32 1.442695, %v2047_v27  ;;  %v2054_v30 = vsub.f32 %v5385_v14, %v1892_v35  ;;  %v2241_v2 = vsel %vm1847_vm1, %v5761_v55, 0.0  ;;  %4674 = vpow2.f32 %v2134_v25  ;;  %4419 = vmatpush3.msra.mxu0 %v373_v61  ;;  %v372_v35 = vld [vmem:[%s5780_s8 + $0x30] sm:$0xff]  ;;  %v369_v61 = vld [vmem:[%s5780_s8 + $0x18] sm:$0xff] }
 0x19e   : > { %v1868_v0 = vpop.xlane.xlu0 %1867  ;;  %2242 = vadd.xlane.f32.xlu0 %v2241_v2  ;;  %v5766_v41 = vpop.eup %4662  ;;  %4420 = vmatprep.subr.mxu0 %v372_v35 }
 0x19f   : > { %4676 = vpow2.f32 %v2118_v40  ;;  %v2132_v5 = vmul.f32 1.442695, %v2054_v30  ;;  %v2046_v4 = vsub.f32 %v5387_v15, %v1868_v0  ;;  %4421 = vmatpush3.msra.mxu0 %v372_v35  ;;  %v371_v0 = vld [vmem:[%s5780_s8 + $0x28] sm:$0xff] }
 0x1a0   : > { %v5771_v36 = vpop.eup %4664  ;;  %2266 = vadd.xlane.f32.xlu1 %v2265_v44  ;;  %4422 = vmatprep.subr.mxu0 %v371_v0 }
 0x1a1   : > { %v1925_v45 = vpop.xlane.xlu1 %1924  ;;  %v2116_v14 = vmul.f32 1.442695, %v2046_v4  ;;  %v2238_v57 = vsel %vm1847_vm1, %v5771_v36, 0.0  ;;  %4678 = vpow2.f32 %v2132_v5  ;;  %v381_v5 = vld [vmem:[%s5780_s8 + $0x78] sm:$0xff]  ;;  %4423 = vmatpush3.msra.mxu0 %v371_v0 }
 0x1a2   : > { %v2065_v11 = vsub.f32 %v5399_v32, %v1925_v45  ;;  %v1901_v50 = vpop.xlane.xlu0 %1900  ;;  %2239 = vadd.xlane.f32.xlu0 %v2238_v57  ;;  %v5782_v15 = vpop.eup %4666  ;;  %v2262_v32 = vsel %vm1847_vm1, %v5766_v41, 0.0  ;;  %4446 = vmatprep.subr.mxu1 %v381_v5  ;;  %v380_v57 = vld [vmem:[%s5780_s8 + $0x70] sm:$0xff] }
 0x1a3   : > { %4680 = vpow2.f32 %v2116_v14  ;;  %v2057_v17 = vsub.f32 %v5401_v33, %v1901_v50  ;;  %4447 = vmatpush3.msra.mxu1 %v381_v5 }
 0x1a4   : > { %v2154_v19 = vmul.f32 1.442695, %v2065_v11  ;;  %v5788_v58 = vpop.eup %4668  ;;  %2263 = vadd.xlane.f32.xlu1 %v2262_v32  ;;  %4448 = vmatprep.subr.mxu1 %v380_v57 }
 0x1a5   : > { %v1922_v12 = vpop.xlane.xlu1 %1921  ;;  %v2138_v25 = vmul.f32 1.442695, %v2057_v17  ;;  %v2247_v1 = vsel %vm1847_vm1, %v5788_v58, 0.0  ;;  %4449 = vmatpush3.msra.mxu1 %v380_v57 }
 0x1a6   : > { %v2064_v27 = vsub.f32 %v5416_v47, %v1922_v12  ;;  %4682 = vpow2.f32 %v2154_v19  ;;  %v1898_v33 = vpop.xlane.xlu0 %1897  ;;  %2248 = vadd.xlane.f32.xlu0 %v2247_v1  ;;  %v5794_v40 = vpop.eup %4670  ;;  %v2271_v47 = vsel %vm1847_vm1, %v5782_v15, 0.0  ;;  %v379_v12 = vld [vmem:[%s5780_s8 + $0x68] sm:$0xff] }
 0x1a7   : > { %4684 = vpow2.f32 %v2138_v25  ;;  %v2056_v2 = vsub.f32 %v5421_v49, %v1898_v33  ;;  %v370_v49 = vld [vmem:[%s5780_s8 + $0x20] sm:$0xff]  ;;  %v2268_v32 = vsel %vm1847_vm1, %v5794_v40, 0.0  ;;  %4450 = vmatprep.subr.mxu1 %v379_v12 }
 0x1a8   : > { %v2152_v30 = vmul.f32 1.442695, %v2064_v27  ;;  %v5801_v4 = vpop.eup %4672  ;;  %2272 = vadd.xlane.f32.xlu1 %v2271_v47  ;;  %4424 = vmatprep.subr.mxu0 %v370_v49 }
 0x1a9   : > { %v1931_v44 = vpop.xlane.xlu1 %1930  ;;  %v2136_v45 = vmul.f32 1.442695, %v2056_v2  ;;  %v2244_v11 = vsel %vm1847_vm1, %v5801_v4, 0.0  ;;  %4425 = vmatpush3.msra.mxu0 %v370_v49  ;;  %v378_v2 = vld [vmem:[%s5780_s8 + $0x60] sm:$0xff]  ;;  %4451 = vmatpush3.msra.mxu1 %v379_v12  ;;  %v376_v12 = vld [vmem:[%s5780_s8 + $0x50] sm:$0xff] }
 0x1aa   : > { %v2067_v14 = vsub.f32 %v5423_v51, %v1931_v44  ;;  %4686 = vpow2.f32 %v2152_v30  ;;  %v1907_v50 = vpop.xlane.xlu0 %1906  ;;  %2245 = vadd.xlane.f32.xlu0 %v2244_v11  ;;  %v5808_v19 = vpop.eup %4674  ;;  %4426 = vmatprep.subr.mxu0 %v369_v61  ;;  %v377_v11 = vld [vmem:[%s5780_s8 + $0x58] sm:$0xff] }
 0x1ab   : > { %4688 = vpow2.f32 %v2136_v45  ;;  %v2059_v51 = vsub.f32 %v5427_v56, %v1907_v50  ;;  %v368_v56 = vld [vmem:[%s5780_s8 + $0x10] sm:$0xff]  ;;  %4427 = vmatpush3.msra.mxu0 %v369_v61  ;;  %4452 = vmatprep.subr.mxu1 %v378_v2 }
 0x1ac   : > { %v2158_v17 = vmul.f32 1.442695, %v2067_v14  ;;  %v5815_v25 = vpop.eup %4676  ;;  %2269 = vadd.xlane.f32.xlu1 %v2268_v32  ;;  %4428 = vmatprep.subr.mxu0 %v368_v56  ;;  %v367_v14 = vld [vmem:[%s5780_s8 + $0x8] sm:$0xff] }
 0x1ad   : > { %v1928_v27 = vpop.xlane.xlu1 %1927  ;;  %v2142_v1 = vmul.f32 1.442695, %v2059_v51  ;;  %v2253_v33 = vsel %vm1847_vm1, %v5815_v25, 0.0  ;;  %4429 = vmatpush3.msra.mxu0 %v368_v56  ;;  %4453 = vmatpush3.msra.mxu1 %v378_v2 }
 0x1ae   : > { %v2066_v35 = vsub.f32 %v5444_v7, %v1928_v27  ;;  %4690 = vpow2.f32 %v2158_v17  ;;  %v1904_v30 = vpop.xlane.xlu0 %1903  ;;  %2254 = vadd.xlane.f32.xlu0 %v2253_v33  ;;  %v5822_v47 = vpop.eup %4678  ;;  %v2277_v7 = vsel %vm1847_vm1, %v5808_v19, 0.0  ;;  %v366_v17 = vld [vmem:[%s5780_s8] sm:$0xff]  ;;  %4430 = vmatprep.subr.mxu0 %v367_v14 }
 0x1af   : > { %4692 = vpow2.f32 %v2142_v1  ;;  %v2058_v5 = vsub.f32 %v5449_v10, %v1904_v30  ;;  %4454 = vmatprep.subr.mxu1 %v377_v11  ;;  %4431 = vmatpush3.msra.mxu0 %v367_v14 }
 0x1b0   : > { %v2156_v0 = vmul.f32 1.442695, %v2066_v35  ;;  %v5827_v44 = vpop.eup %4680  ;;  %2278 = vadd.xlane.f32.xlu1 %v2277_v7  ;;  %4455 = vmatpush3.msra.mxu1 %v377_v11  ;;  %v374_v7 = vld [vmem:[%s5780_s8 + $0x40] sm:$0xff] }
 0x1b1   : > { %v1937_v45 = vpop.xlane.xlu1 %1936  ;;  %v2140_v49 = vmul.f32 1.442695, %v2058_v5  ;;  %v2250_v10 = vsel %vm1847_vm1, %v5827_v44, 0.0  ;;  %4432 = vmatprep.subr.mxu0 %v366_v17  ;;  %4456 = vmatprep.subr.mxu1 %v376_v12 }
 0x1b2   : > { %v2069_v57 = vsub.f32 %v5451_v13, %v1937_v45  ;;  %4694 = vpow2.f32 %v2156_v0  ;;  %v1913_v50 = vpop.xlane.xlu0 %1912  ;;  %2251 = vadd.xlane.f32.xlu0 %v2250_v10  ;;  %v2274_v13 = vsel %vm1847_vm1, %v5822_v47, 0.0  ;;  %4433 = vmatpush3.msra.mxu0 %v366_v17 }
 0x1b3   : > { %v5835_v51 = vpop.eup %4682  ;;  %4696 = vpow2.f32 %v2140_v49  ;;  %v2061_v61 = vsub.f32 %v5455_v21, %v1913_v50  ;;  %v375_v21 = vld [vmem:[%s5780_s8 + $0x48] sm:$0xff]  ;;  %4457 = vmatpush3.msra.mxu1 %v376_v12 }
 0x1b4   : > { %v2162_v32 = vmul.f32 1.442695, %v2069_v57  ;;  %v5841_v27 = vpop.eup %4684  ;;  %2275 = vadd.xlane.f32.xlu1 %v2274_v13  ;;  %4458 = vmatprep.subr.mxu1 %v375_v21 }
 0x1b5   : > { %v1934_v1 = vpop.xlane.xlu1 %1933  ;;  %v2146_v35 = vmul.f32 1.442695, %v2061_v61  ;;  %v2283_v56 = vsel %vm1847_vm1, %v5841_v27, 0.0  ;;  %4459 = vmatpush3.msra.mxu1 %v375_v21 }
 0x1b6   : > { %v2068_v33 = vsub.f32 %v5472_v37, %v1934_v1  ;;  %4698 = vpow2.f32 %v2162_v32  ;;  %v1910_v30 = vpop.xlane.xlu0 %1909  ;;  %2284 = vadd.xlane.f32.xlu0 %v2283_v56  ;;  %v2307_v37 = vsel %vm1847_vm1, %v5835_v51, 0.0  ;;  %4460 = vmatprep.subr.mxu1 %v374_v7 }
 0x1b7   : > { %v5847_v2 = vpop.eup %4686  ;;  %4700 = vpow2.f32 %v2146_v35  ;;  %v2060_v5 = vsub.f32 %v5477_v42, %v1910_v30  ;;  %4461 = vmatpush3.msra.mxu1 %v374_v7 }
 0x1b8   : > { %v2160_v0 = vmul.f32 1.442695, %v2068_v33  ;;  %v5853_v45 = vpop.eup %4688  ;;  %2308 = vadd.xlane.f32.xlu1 %v2307_v37  ;;  %v2304_v32 = vsel %vm1847_vm1, %v5847_v2, 0.0 }
 0x1b9   : > { %v1943_v14 = vpop.xlane.xlu1 %1942  ;;  %v2144_v11 = vmul.f32 1.442695, %v2060_v5  ;;  %v2280_v57 = vsel %vm1847_vm1, %v5853_v45, 0.0 }
 0x1ba   : > { %v2071_v49 = vsub.f32 %v5479_v43, %v1943_v14  ;;  %4702 = vpow2.f32 %v2160_v0  ;;  %v1919_v42 = vpop.xlane.xlu0 %1918  ;;  %2281 = vadd.xlane.f32.xlu0 %v2280_v57 }
 0x1bb   : > { %v5858_v10 = vpop.eup %4690  ;;  %4704 = vpow2.f32 %v2144_v11  ;;  %v2063_v17 = vsub.f32 %v5483_v52, %v1919_v42 }
 0x1bc   : > { %v2166_v50 = vmul.f32 1.442695, %v2071_v49  ;;  %v5863_v61 = vpop.eup %4692  ;;  %2305 = vadd.xlane.f32.xlu1 %v2304_v32  ;;  %v2313_v21 = vsel %vm1847_vm1, %v5858_v10, 0.0  ;;  %v5889_v32 = vld [vmem:[%s5780_s8 + $0xb8] sm:$0xff] }
 0x1bd   : > { %v1940_v43 = vpop.xlane.xlu1 %1939  ;;  %v2150_v13 = vmul.f32 1.442695, %v2063_v17  ;;  %v2289_v1 = vsel %vm1847_vm1, %v5863_v61, 0.0  ;;  %4474 = vmatprep.subr.mxu0 %v5889_v32 }
 0x1be   : > { %v2070_v12 = vsub.f32 %v5497_v60, %v1940_v43  ;;  %4706 = vpow2.f32 %v2166_v50  ;;  %v1916_v35 = vpop.xlane.xlu0 %1915  ;;  %2290 = vadd.xlane.f32.xlu0 %v2289_v1 }
 0x1bf   : > { %v5868_v33 = vpop.eup %4694  ;;  %4708 = vpow2.f32 %v2150_v13  ;;  %v2062_v56 = vsub.f32 %v5499_v62, %v1916_v35 }
 0x1c0   : > { %v2164_v52 = vmul.f32 1.442695, %v2070_v12  ;;  %v5873_v30 = vpop.eup %4696  ;;  %2314 = vadd.xlane.f32.xlu1 %v2313_v21  ;;  %v2310_v49 = vsel %vm1847_vm1, %v5868_v33, 0.0 }
 0x1c1   : > { %v1973_v0 = vpop.xlane.xlu1 %1972  ;;  %v2148_v60 = vmul.f32 1.442695, %v2062_v56  ;;  %v2286_v37 = vsel %vm1847_vm1, %v5873_v30, 0.0 }
 0x1c2   : > { %v2081_v5 = vsub.f32 %v5511_v23, %v1973_v0  ;;  %4710 = vpow2.f32 %v2164_v52  ;;  %v1949_v7 = vpop.xlane.xlu0 %1948  ;;  %2287 = vadd.xlane.f32.xlu0 %v2286_v37 }
 0x1c3   : > { %v5878_v14 = vpop.eup %4698  ;;  %4712 = vpow2.f32 %v2148_v60  ;;  %v2073_v11 = vsub.f32 %v5513_v24, %v1949_v7 }
 0x1c4   : > { %v2186_v62 = vmul.f32 1.442695, %v2081_v5  ;;  %v5883_v57 = vpop.eup %4700  ;;  %2311 = vadd.xlane.f32.xlu1 %v2310_v49  ;;  %v2319_v1 = vsel %vm1847_vm1, %v5878_v14, 0.0 }
 0x1c5   : > { %v1970_v23 = vpop.xlane.xlu1 %1969  ;;  %v2170_v42 = vmul.f32 1.442695, %v2073_v11  ;;  %v2295_v17 = vsel %vm1847_vm1, %v5883_v57, 0.0 }
 0x1c6   : > { %v2080_v50 = vsub.f32 %v5528_v46, %v1970_v23  ;;  %4714 = vpow2.f32 %v2186_v62  ;;  %v1946_v43 = vpop.xlane.xlu0 %1945  ;;  %2296 = vadd.xlane.f32.xlu0 %v2295_v17  ;;  %v5898_v46 = vld [vmem:[%s5780_s8 + $0xf8] sm:$0xff] }
 0x1c7   : > { %v5892_v24 = vpop.eup %4702  ;;  %4716 = vpow2.f32 %v2170_v42  ;;  %v2072_v12 = vsub.f32 %v5533_v53, %v1946_v43  ;;  %4502 = vmatprep.subr.mxu1 %v5898_v46 }
 0x1c8   : > { %v2184_v13 = vmul.f32 1.442695, %v2080_v50  ;;  %v5900_v35 = vpop.eup %4704  ;;  %2320 = vadd.xlane.f32.xlu1 %v2319_v1  ;;  %v2316_v7 = vsel %vm1847_vm1, %v5892_v24, 0.0 }
 0x1c9   : > { %v1979_v52 = vpop.xlane.xlu1 %1978  ;;  %v2168_v56 = vmul.f32 1.442695, %v2072_v12  ;;  %v2292_v0 = vsel %vm1847_vm1, %v5900_v35, 0.0 }
 0x1ca   : > { %v2083_v21 = vsub.f32 %v5535_v54, %v1979_v52  ;;  %4718 = vpow2.f32 %v2184_v13  ;;  %v1955_v60 = vpop.xlane.xlu0 %1954  ;;  %2293 = vadd.xlane.f32.xlu0 %v2292_v0 }
 0x1cb   : > { %v5906_v53 = vpop.eup %4706  ;;  %4720 = vpow2.f32 %v2168_v56  ;;  %v2075_v37 = vsub.f32 %v5539_v63, %v1955_v60 }
 0x1cc   : > { %v2190_v5 = vmul.f32 1.442695, %v2083_v21  ;;  %v5911_v62 = vpop.eup %4708  ;;  %2317 = vadd.xlane.f32.xlu1 %v2316_v7  ;;  %v2325_v43 = vsel %vm1847_vm1, %v5906_v53, 0.0 }
 0x1cd   : > { %v1976_v11 = vpop.xlane.xlu1 %1975  ;;  %v2174_v54 = vmul.f32 1.442695, %v2075_v37  ;;  %v2301_v23 = vsel %vm1847_vm1, %v5911_v62, 0.0 }
 0x1ce   : > { %v2082_v49 = vsub.f32 %v5556_v22, %v1976_v11  ;;  %4722 = vpow2.f32 %v2190_v5  ;;  %v1952_v42 = vpop.xlane.xlu0 %1951  ;;  %2302 = vadd.xlane.f32.xlu0 %v2301_v23 }
 0x1cf   : > { %v5916_v50 = vpop.eup %4710  ;;  %4724 = vpow2.f32 %v2174_v54  ;;  %v2074_v17 = vsub.f32 %v5561_v29, %v1952_v42 }
 0x1d0   : > { %v2188_v63 = vmul.f32 1.442695, %v2082_v49  ;;  %v5921_v13 = vpop.eup %4712  ;;  %2326 = vadd.xlane.f32.xlu1 %v2325_v43  ;;  %v2322_v60 = vsel %vm1847_vm1, %v5916_v50, 0.0 }
 0x1d1   : > { %v1985_v12 = vpop.xlane.xlu1 %1984  ;;  %v2172_v22 = vmul.f32 1.442695, %v2074_v17  ;;  %v2298_v52 = vsel %vm1847_vm1, %v5921_v13, 0.0 }
 0x1d2   : > { %v2085_v1 = vsub.f32 %v5563_v31, %v1985_v12  ;;  %4726 = vpow2.f32 %v2188_v63  ;;  %v1961_v56 = vpop.xlane.xlu0 %1960  ;;  %2299 = vadd.xlane.f32.xlu0 %v2298_v52  ;;  %v6439_v52 = vld [vmem:[#allocation2_spill] sm:$0xff] }
 0x1d3   : > { %v5926_v21 = vpop.eup %4714  ;;  %4728 = vpow2.f32 %v2172_v22  ;;  %v2077_v0 = vsub.f32 %v5567_v39, %v1961_v56 }
 0x1d4   : > { %v2194_v29 = vmul.f32 1.442695, %v2085_v1  ;;  %v5931_v5 = vpop.eup %4716  ;;  %2323 = vadd.xlane.f32.xlu1 %v2322_v60  ;;  %v2355_v42 = vsel %vm1847_vm1, %v5926_v21, 0.0 }
 0x1d5   : > { %v1982_v37 = vpop.xlane.xlu1 %1981  ;;  %v2178_v31 = vmul.f32 1.442695, %v2077_v0  ;;  %v2331_v11 = vsel %vm1847_vm1, %v5931_v5, 0.0 }
 0x1d6   : > { %v2084_v7 = vsub.f32 %v5584_v8, %v1982_v37  ;;  %4730 = vpow2.f32 %v2194_v29  ;;  %v1958_v54 = vpop.xlane.xlu0 %1957  ;;  %2332 = vadd.xlane.f32.xlu0 %v2331_v11  ;;  %v6440_v37 = vld [vmem:[#allocation3_spill] sm:$0xff] }
 0x1d7   : > { %v5936_v49 = vpop.eup %4718  ;;  %4732 = vpow2.f32 %v2178_v31  ;;  %v2076_v23 = vsub.f32 %v5589_v18, %v1958_v54 }
 0x1d8   : > { %v2192_v39 = vmul.f32 1.442695, %v2084_v7  ;;  %v5941_v63 = vpop.eup %4720  ;;  %2356 = vadd.xlane.f32.xlu1 %v2355_v42  ;;  %v2352_v29 = vsel %vm1847_vm1, %v5936_v49, 0.0 }
 0x1d9   : > { %v1991_v17 = vpop.xlane.xlu1 %1990  ;;  %v2176_v8 = vmul.f32 1.442695, %v2076_v23  ;;  %v2328_v12 = vsel %vm1847_vm1, %v5941_v63, 0.0  ;;  %v6441_v23 = vld [vmem:[#allocation4_spill] sm:$0xff] }
 0x1da   : > { %v2087_v43 = vsub.f32 %v5591_v20, %v1991_v17  ;;  %4734 = vpow2.f32 %v2192_v39  ;;  %v1967_v22 = vpop.xlane.xlu0 %1966  ;;  %2329 = vadd.xlane.f32.xlu0 %v2328_v12 }
 0x1db   : > { %v5946_v1 = vpop.eup %4722  ;;  %4736 = vpow2.f32 %v2176_v8  ;;  %v2079_v56 = vsub.f32 %v6439_v52, %v1967_v22  ;;  %v6442_v22 = vld [vmem:[#allocation5_spill] sm:$0xff] }
 0x1dc   : > { %v2198_v18 = vmul.f32 1.442695, %v2087_v43  ;;  %v5951_v0 = vpop.eup %4724  ;;  %2353 = vadd.xlane.f32.xlu1 %v2352_v29  ;;  %v2361_v17 = vsel %vm1847_vm1, %v5946_v1, 0.0 }
 0x1dd   : > { %v1988_v60 = vpop.xlane.xlu1 %1987  ;;  %v2182_v20 = vmul.f32 1.442695, %v2079_v56  ;;  %v2337_v7 = vsel %vm1847_vm1, %v5951_v0, 0.0 }
 0x1de   : > { %v2086_v31 = vsub.f32 %v6440_v37, %v1988_v60  ;;  %4738 = vpow2.f32 %v2198_v18  ;;  %v1964_v11 = vpop.xlane.xlu0 %1963  ;;  %2338 = vadd.xlane.f32.xlu0 %v2337_v7 }
 0x1df   : > { %v5956_v54 = vpop.eup %4726  ;;  %4740 = vpow2.f32 %v2182_v20  ;;  %v2078_v42 = vsub.f32 %v6441_v23, %v1964_v11  ;;  %v6444_v20 = vld [vmem:[#allocation6_spill] sm:$0xff] }
 0x1e0   : > { %v2196_v39 = vmul.f32 1.442695, %v2086_v31  ;;  %v5961_v8 = vpop.eup %4728  ;;  %2362 = vadd.xlane.f32.xlu1 %v2361_v17  ;;  %v2358_v31 = vsel %vm1847_vm1, %v5956_v54, 0.0 }
 0x1e1   : > { %v2021_v43 = vpop.xlane.xlu1 %2020  ;;  %v2180_v12 = vmul.f32 1.442695, %v2078_v42  ;;  %v2334_v18 = vsel %vm1847_vm1, %v5961_v8, 0.0  ;;  %v6446_v42 = vld [vmem:[#allocation7_spill] sm:$0xff] }
 0x1e2   : > { %v2097_v52 = vsub.f32 %v6442_v22, %v2021_v43  ;;  %4742 = vpow2.f32 %v2196_v39  ;;  %v1997_v56 = vpop.xlane.xlu0 %1996  ;;  %2335 = vadd.xlane.f32.xlu0 %v2334_v18 }
 0x1e3   : > { %v5966_v29 = vpop.eup %4730  ;;  %4744 = vpow2.f32 %v2180_v12  ;;  %v2089_v37 = vsub.f32 %v6444_v20, %v1997_v56 }
 0x1e4   : > { %6443 = vst [vmem:[#allocation2_spill] sm:$0xff] %v5966_v29  ;;  %v2218_v60 = vmul.f32 1.442695, %v2097_v52  ;;  %v5971_v7 = vpop.eup %4732  ;;  %2359 = vadd.xlane.f32.xlu1 %v2358_v31  ;;  %v6448_v52 = vld [vmem:[#allocation8_spill] sm:$0xff]  ;;  %v2367_v56 = vsel %vm1847_vm1, %v5966_v29, 0.0 }
 0x1e5   : > { %6445 = vst [vmem:[#allocation3_spill] sm:$0xff] %v5971_v7  ;;  %v2018_v11 = vpop.xlane.xlu1 %2017  ;;  %v2202_v23 = vmul.f32 1.442695, %v2089_v37  ;;  %v2343_v39 = vsel %vm1847_vm1, %v5971_v7, 0.0 }
 0x1e6   : > { %v2096_v17 = vsub.f32 %v6446_v42, %v2018_v11  ;;  %4746 = vpow2.f32 %v2218_v60  ;;  %v1994_v43 = vpop.xlane.xlu0 %1993  ;;  %2344 = vadd.xlane.f32.xlu0 %v2343_v39  ;;  %v6450_v11 = vld [vmem:[#allocation9_spill] sm:$0xff] }
 0x1e7   : > { %v5976_v12 = vpop.eup %4734  ;;  %4748 = vpow2.f32 %v2202_v23  ;;  %v2088_v18 = vsub.f32 %v6448_v52, %v1994_v43  ;;  %v6452_v43 = vld [vmem:[#allocation10_spill] sm:$0xff] }
 0x1e8   : > { %6447 = vst [vmem:[#allocation4_spill] sm:$0xff] %v5976_v12  ;;  %v2216_v22 = vmul.f32 1.442695, %v2096_v17  ;;  %v5981_v20 = vpop.eup %4736  ;;  %2368 = vadd.xlane.f32.xlu1 %v2367_v56  ;;  %v2364_v29 = vsel %vm1847_vm1, %v5976_v12, 0.0 }
 0x1e9   : > { %6449 = vst [vmem:[#allocation5_spill] sm:$0xff] %v5981_v20  ;;  %v2027_v37 = vpop.xlane.xlu1 %2026  ;;  %v2200_v31 = vmul.f32 1.442695, %v2088_v18  ;;  %v2340_v60 = vsel %vm1847_vm1, %v5981_v20, 0.0 }
 0x1ea   : > { %v2099_v42 = vsub.f32 %v6450_v11, %v2027_v37  ;;  %4750 = vpow2.f32 %v2216_v22  ;;  %v2003_v39 = vpop.xlane.xlu0 %2002  ;;  %2341 = vadd.xlane.f32.xlu0 %v2340_v60  ;;  %v6454_v37 = vld [vmem:[#allocation11_spill] sm:$0xff] }
 0x1eb   : > { %v5986_v23 = vpop.eup %4738  ;;  %4752 = vpow2.f32 %v2200_v31  ;;  %v2091_v52 = vsub.f32 %v6452_v43, %v2003_v39  ;;  %v6455_v39 = vld [vmem:[#allocation12_spill] sm:$0xff] }
 0x1ec   : > { %6451 = vst [vmem:[#allocation6_spill] sm:$0xff] %v5986_v23  ;;  %v2222_v17 = vmul.f32 1.442695, %v2099_v42  ;;  %v5991_v7 = vpop.eup %4740  ;;  %2365 = vadd.xlane.f32.xlu1 %v2364_v29  ;;  %v2373_v12 = vsel %vm1847_vm1, %v5986_v23, 0.0 }
 0x1ed   : > { %6453 = vst [vmem:[#allocation7_spill] sm:$0xff] %v5991_v7  ;;  %v2024_v18 = vpop.xlane.xlu1 %2023  ;;  %v2206_v56 = vmul.f32 1.442695, %v2091_v52  ;;  %v2349_v22 = vsel %vm1847_vm1, %v5991_v7, 0.0 }
 0x1ee   : > { %v2098_v11 = vsub.f32 %v6454_v37, %v2024_v18  ;;  %4754 = vpow2.f32 %v2222_v17  ;;  %v2000_v60 = vpop.xlane.xlu0 %1999  ;;  %2350 = vadd.xlane.f32.xlu0 %v2349_v22  ;;  %v6456_v18 = vld [vmem:[#allocation13_spill] sm:$0xff] }
 0x1ef   : > { %v5996_v31 = vpop.eup %4742  ;;  %4756 = vpow2.f32 %v2206_v56  ;;  %v2090_v43 = vsub.f32 %v6455_v39, %v2000_v60  ;;  %v6458_v60 = vld [vmem:[#allocation14_spill] sm:$0xff] }
 0x1f0   : > { %v2220_v42 = vmul.f32 1.442695, %v2098_v11  ;;  %v6001_v20 = vpop.eup %4744  ;;  %2374 = vadd.xlane.f32.xlu1 %v2373_v12  ;;  %v2370_v23 = vsel %vm1847_vm1, %v5996_v31, 0.0 }
 0x1f1   : > { %v2033_v29 = vpop.xlane.xlu1 %2032  ;;  %v2204_v52 = vmul.f32 1.442695, %v2090_v43  ;;  %v2346_v17 = vsel %vm1847_vm1, %v6001_v20, 0.0 }
 0x1f2   : > { %v2101_v37 = vsub.f32 %v6456_v18, %v2033_v29  ;;  %4758 = vpow2.f32 %v2220_v42  ;;  %v2009_v22 = vpop.xlane.xlu0 %2008  ;;  %2347 = vadd.xlane.f32.xlu0 %v2346_v17 }
 0x1f3   : > { %v6006_v56 = vpop.eup %4746  ;;  %4760 = vpow2.f32 %v2204_v52  ;;  %v2093_v39 = vsub.f32 %v6458_v60, %v2009_v22 }
 0x1f4   : > { %6457 = vst [vmem:[#allocation8_spill] sm:$0xff] %v6006_v56  ;;  %v2226_v11 = vmul.f32 1.442695, %v2101_v37  ;;  %v6011_v7 = vpop.eup %4748  ;;  %2371 = vadd.xlane.f32.xlu1 %v2370_v23  ;;  %v2403_v22 = vsel %vm1847_vm1, %v6006_v56, 0.0 }
 0x1f5   : > { %6459 = vst [vmem:[#allocation9_spill] sm:$0xff] %v6011_v7  ;;  %v2030_v12 = vpop.xlane.xlu1 %2029  ;;  %v2210_v43 = vmul.f32 1.442695, %v2093_v39  ;;  %v2379_v42 = vsel %vm1847_vm1, %v6011_v7, 0.0 }
 0x1f6   : > { %v2100_v29 = vsub.f32 %v5696_v6, %v2030_v12  ;;  %4762 = vpow2.f32 %v2226_v11  ;;  %v2006_v18 = vpop.xlane.xlu0 %2005  ;;  %2380 = vadd.xlane.f32.xlu0 %v2379_v42 }
 0x1f7   : > { %v6016_v52 = vpop.eup %4750  ;;  %4764 = vpow2.f32 %v2210_v43  ;;  %v2092_v17 = vsub.f32 %v5701_v38, %v2006_v18 }
 0x1f8   : > { %6460 = vst [vmem:[#allocation10_spill] sm:$0xff] %v6016_v52  ;;  %v2224_v37 = vmul.f32 1.442695, %v2100_v29  ;;  %v6021_v60 = vpop.eup %4752  ;;  %2404 = vadd.xlane.f32.xlu1 %v2403_v22  ;;  %v2400_v38 = vsel %vm1847_vm1, %v6016_v52, 0.0 }
 0x1f9   : > { %v2039_v23 = vpop.xlane.xlu1 %2038  ;;  %v2208_v6 = vmul.f32 1.442695, %v2092_v17  ;;  %v2376_v39 = vsel %vm1847_vm1, %v6021_v60, 0.0 }
 0x1fa   : > { %4766 = vpow2.f32 %v2224_v37  ;;  %v2103_v11 = vsub.f32 %v5703_v48, %v2039_v23  ;;  %v2015_v12 = vpop.xlane.xlu0 %2014  ;;  %2377 = vadd.xlane.f32.xlu0 %v2376_v39  ;;  %v6461_v39 = vld [vmem:[#allocation15_spill] sm:$0xff] }
 0x1fb   : > { %v6026_v43 = vpop.eup %4754  ;;  %4768 = vpow2.f32 %v2208_v6  ;;  %v2095_v18 = vsub.f32 %v5707_v3, %v2015_v12 }
 0x1fc   : > { %v6030_v29 = vpop.eup %4756  ;;  %2401 = vadd.xlane.f32.xlu1 %v2400_v38  ;;  %v2230_v48 = vmul.f32 1.442695, %v2103_v11  ;;  %v2409_v52 = vsel %vm1847_vm1, %v6026_v43, 0.0 }
 0x1fd   : > { %v2036_v42 = vpop.xlane.xlu1 %2035  ;;  %v2385_v37 = vsel %vm1847_vm1, %v6030_v29, 0.0  ;;  %v2214_v3 = vmul.f32 1.442695, %v2095_v18 }
 0x1fe   : > { %v2102_v17 = vsub.f32 %v5721_v9, %v2036_v42  ;;  %2386 = vadd.xlane.f32.xlu0 %v2385_v37  ;;  %v2012_v22 = vpop.xlane.xlu0 %2011 }
 0x1ff   : > { %v6036_v23 = vpop.eup %4758  ;;  %v2094_v56 = vsub.f32 %v6461_v39, %v2012_v22 }
 0x200   : > { %v2228_v6 = vmul.f32 1.442695, %v2102_v17  ;;  %v6041_v7 = vpop.eup %4760  ;;  %2410 = vadd.xlane.f32.xlu1 %v2409_v52  ;;  %v2406_v38 = vsel %vm1847_vm1, %v6036_v23, 0.0 }
 0x201   : > { %v2212_v9 = vmul.f32 1.442695, %v2094_v56  ;;  %v2382_v12 = vsel %vm1847_vm1, %v6041_v7, 0.0 }
 0x202   : > { %4770 = vpow2.f32 %v2228_v6  ;;  %2383 = vadd.xlane.f32.xlu0 %v2382_v12 }
 0x203   : > { %4772 = vpow2.f32 %v2230_v48  ;;  %v6045_v11 = vpop.eup %4762 }
 0x204   : > { %6462 = vst [vmem:[#allocation11_spill] sm:$0xff] %v6045_v11  ;;  %4774 = vpow2.f32 %v2212_v9  ;;  %v6049_v42 = vpop.eup %4764  ;;  %2407 = vadd.xlane.f32.xlu1 %v2406_v38  ;;  %v2415_v18 = vsel %vm1847_vm1, %v6045_v11, 0.0 }
 0x205   : > { %4776 = vpow2.f32 %v2214_v3  ;;  %v2391_v52 = vsel %vm1847_vm1, %v6049_v42, 0.0 }
 0x206   : > { %2392 = vadd.xlane.f32.xlu0 %v2391_v52 }
 0x207   : > { %v6053_v56 = vpop.eup %4766 }
 0x208   : > { %v6057_v17 = vpop.eup %4768  ;;  %2416 = vadd.xlane.f32.xlu1 %v2415_v18  ;;  %v2412_v48 = vsel %vm1847_vm1, %v6053_v56, 0.0 }
 0x209   : > { %v2388_v37 = vsel %vm1847_vm1, %v6057_v17, 0.0 }
 0x20a   : > { %2389 = vadd.xlane.f32.xlu0 %v2388_v37 }
 0x20c   : > { %2413 = vadd.xlane.f32.xlu1 %v2412_v48 }
 0x20f   : > { %v6063_v22 = vpop.eup %4770 }
 0x210   : > { %6463 = vst [vmem:[#allocation12_spill] sm:$0xff] %v6063_v22  ;;  %v6065_v6 = vpop.eup %4772  ;;  %v2418_v39 = vsel %vm1847_vm1, %v6063_v22, 0.0 }
 0x211   : > { %6464 = vst [vmem:[#allocation13_spill] sm:$0xff] %v6065_v6  ;;  %v6069_v3 = vpop.eup %4774  ;;  %2419 = vadd.xlane.f32.xlu1 %v2418_v39  ;;  %v2421_v38 = vsel %vm1847_vm1, %v6065_v6, 0.0 }
 0x212   : > { %6465 = vst [vmem:[#allocation14_spill] sm:$0xff] %v6069_v3  ;;  %v2394_v9 = vsel %vm1847_vm1, %v6069_v3, 0.0  ;;  %v6073_v12 = vpop.eup %4776 }
 0x213   : > { %6466 = vst [vmem:[#allocation15_spill] sm:$0xff] %v6073_v12  ;;  %2395 = vadd.xlane.f32.xlu0 %v2394_v9  ;;  %v2397_v52 = vsel %vm1847_vm1, %v6073_v12, 0.0 }
 0x215   : > { %2422 = vadd.xlane.f32.xlu1 %v2421_v38 }
 0x217   : > { %2398 = vadd.xlane.f32.xlu0 %v2397_v52 }
 0x21d   : > { %v2237_v18 = vpop.xlane.xlu0 %2236 }
 0x21e   : > { %4778 = vrcp.f32 %v2237_v18 }
 0x221   : > { %v2261_v37 = vpop.xlane.xlu1 %2260  ;;  %v2234_v48 = vpop.xlane.xlu0 %2233 }
 0x222   : > { %4780 = vrcp.f32 %v2234_v48 }
 0x223   : > { %4782 = vrcp.f32 %v2261_v37 }
 0x225   : > { %v2258_v39 = vpop.xlane.xlu1 %2257 }
 0x226   : > { %4784 = vrcp.f32 %v2258_v39 }
 0x227   : > { %v2243_v3 = vpop.xlane.xlu0 %2242 }
 0x228   : > { %4786 = vrcp.f32 %v2243_v3 }
 0x229   : > { %v2267_v22 = vpop.xlane.xlu1 %2266 }
 0x22b   : > { %v2240_v9 = vpop.xlane.xlu0 %2239  ;;  %v4779_v6 = vpop.eup %4778 }
 0x22c   : > { %4788 = vrcp.f32 %v2240_v9  ;;  %v2427_v37 = vmul.f32 %v4779_v6, %v5738_v26  ;;  %v388_v9 = vld [vmem:[%s5780_s8 + $0xb0] sm:$0xff]  ;;  %v387_v26 = vld [vmem:[%s5780_s8 + $0xa8] sm:$0xff] }
 0x22d   : > { %4790 = vrcp.f32 %v2267_v22  ;;  %v2264_v38 = vpop.xlane.xlu1 %2263  ;;  %v396_v6 = vld [vmem:[%s5780_s8 + $0xf0] sm:$0xff] }
 0x22e   : > { %4792 = vrcp.f32 %v2264_v38 }
 0x22f   : > { %v2249_v12 = vpop.xlane.xlu0 %2248  ;;  %v4781_v52 = vpop.eup %4780 }
 0x230   : > { %v2425_v18 = vmul.f32 %v4781_v52, %v5743_v16  ;;  %v4783_v48 = vpop.eup %4782  ;;  %4794 = vrcp.f32 %v2249_v12  ;;  %v386_v52 = vld [vmem:[%s5780_s8 + $0xa0] sm:$0xff] }
 0x231   : > { %v2273_v11 = vpop.xlane.xlu1 %2272  ;;  %v2443_v38 = vmul.f32 %v4783_v48, %v5746_v59  ;;  %v395_v59 = vld [vmem:[%s5780_s8 + $0xe8] sm:$0xff] }
 0x232   : > { %4434 = vmatprep.mubr.msk.f32.mxu0 %vm1847_vm1, %v2425_v18 }
 0x233   : > { %v4785_v39 = vpop.eup %4784  ;;  %v2246_v3 = vpop.xlane.xlu0 %2245  ;;  %4435 = vmatmul.mubr.msk.f32.vlgmr.msra.gmra.mxu0 %vm1847_vm1, %v2427_v37  ;;  %v394_v37 = vld [vmem:[%s5780_s8 + $0xe0] sm:$0xff] }
 0x234   : > { %4796 = vrcp.f32 %v2246_v3  ;;  %v2441_v22 = vmul.f32 %v4785_v39, %v5753_v34  ;;  %4475 = vmatpush3.msra.mxu0 %v5889_v32 }
 0x235   : > { %4798 = vrcp.f32 %v2273_v11  ;;  %v2270_v16 = vpop.xlane.xlu1 %2269  ;;  %4476 = vmatprep.subr.mxu0 %v388_v9  ;;  %v4787_v34 = vpop.eup %4786 }
 0x236   : > { %4800 = vrcp.f32 %v2270_v16  ;;  %4462 = vmatprep.mubr.msk.f32.mxu1 %vm1847_vm1, %v2441_v22  ;;  %4477 = vmatpush3.msra.mxu0 %v388_v9  ;;  %v2431_v9 = vmul.f32 %v4787_v34, %v5761_v55  ;;  %v384_v55 = vld [vmem:[%s5780_s8 + $0x90] sm:$0xff]  ;;  %v393_v16 = vld [vmem:[%s5780_s8 + $0xd8] sm:$0xff] }
 0x237   : > { %4463 = vmatmul.mubr.msk.f32.vlgmr.msra.gmra.mxu1 %vm1847_vm1, %v2443_v38  ;;  %v2255_v12 = vpop.xlane.xlu0 %2254  ;;  %4478 = vmatprep.subr.mxu0 %v387_v26 }
 0x238   : > { %4503 = vmatpush3.msra.mxu1 %v5898_v46  ;;  %4479 = vmatpush3.msra.mxu0 %v387_v26  ;;  %4802 = vrcp.f32 %v2255_v12  ;;  %v385_v46 = vld [vmem:[%s5780_s8 + $0x98] sm:$0xff]  ;;  %v392_v12 = vld [vmem:[%s5780_s8 + $0xd0] sm:$0xff] }
 0x239   : > { %v4789_v11 = vpop.eup %4788  ;;  %v2279_v32 = vpop.xlane.xlu1 %2278  ;;  %4504 = vmatprep.subr.mxu1 %v396_v6  ;;  %4480 = vmatprep.subr.mxu0 %v386_v52 }
 0x23a   : > { %v4791_v18 = vpop.eup %4790  ;;  %v2429_v48 = vmul.f32 %v4789_v11, %v5771_v36  ;;  %4505 = vmatpush3.msra.mxu1 %v396_v6  ;;  %4481 = vmatpush3.msra.mxu0 %v386_v52  ;;  %v382_v11 = vld [vmem:[%s5780_s8 + $0x80] sm:$0xff] }
 0x23b   : > { %v4793_v39 = vpop.eup %4792  ;;  %v2252_v3 = vpop.xlane.xlu0 %2251  ;;  %4506 = vmatprep.subr.mxu1 %v395_v59  ;;  %v2447_v38 = vmul.f32 %v4791_v18, %v5756_v28  ;;  %4482 = vmatprep.subr.mxu0 %v385_v46 }
 0x23c   : > { %4804 = vrcp.f32 %v2252_v3  ;;  %4437 = vmatprep.mubr.msk.f32.mxu0 %vm1847_vm1, %v2429_v48  ;;  %v2445_v22 = vmul.f32 %v4793_v39, %v5766_v41  ;;  %4507 = vmatpush3.msra.mxu1 %v395_v59  ;;  %v383_v41 = vld [vmem:[%s5780_s8 + $0x88] sm:$0xff] }
 0x23d   : > { %4806 = vrcp.f32 %v2279_v32  ;;  %v2276_v36 = vpop.xlane.xlu1 %2275  ;;  %4438 = vmatmul.mubr.msk.f32.gmra.mxu0 %vm1847_vm1, %v2431_v9  ;;  %4508 = vmatprep.subr.mxu1 %v394_v37  ;;  %v4795_v6 = vpop.eup %4794  ;;  %v405_v9 = vld [vmem:[%s5780_s8 + $0x138] sm:$0xff] }
 0x23e   : > { %4808 = vrcp.f32 %v2276_v36  ;;  %4465 = vmatprep.mubr.msk.f32.mxu1 %vm1847_vm1, %v2445_v22  ;;  %4483 = vmatpush3.msra.mxu0 %v385_v46  ;;  %v2435_v48 = vmul.f32 %v4795_v6, %v5788_v58  ;;  %v390_v58 = vld [vmem:[%s5780_s8 + $0xc0] sm:$0xff]  ;;  %v413_v22 = vld [vmem:[%s5780_s8 + $0x178] sm:$0xff] }
 0x23f   : > { %4466 = vmatmul.mubr.msk.f32.gmra.mxu1 %vm1847_vm1, %v2447_v38  ;;  %v2285_v26 = vpop.xlane.xlu0 %2284  ;;  %4484 = vmatprep.subr.mxu0 %v384_v55 }
 0x240   : > { %4509 = vmatpush3.msra.mxu1 %v394_v37  ;;  %4485 = vmatpush3.msra.mxu0 %v384_v55  ;;  %4810 = vrcp.f32 %v2285_v26  ;;  %v391_v37 = vld [vmem:[%s5780_s8 + $0xc8] sm:$0xff] }
 0x241   : > { %v4797_v52 = vpop.eup %4796  ;;  %v2309_v28 = vpop.xlane.xlu1 %2308  ;;  %4510 = vmatprep.subr.mxu1 %v393_v16  ;;  %4486 = vmatprep.subr.mxu0 %v383_v41 }
 0x242   : > { %v4799_v34 = vpop.eup %4798  ;;  %v2433_v59 = vmul.f32 %v4797_v52, %v5801_v4  ;;  %4511 = vmatpush3.msra.mxu1 %v393_v16  ;;  %4487 = vmatpush3.msra.mxu0 %v383_v41 }
 0x243   : > { %v4801_v32 = vpop.eup %4800  ;;  %v2282_v18 = vpop.xlane.xlu0 %2281  ;;  %4512 = vmatprep.subr.mxu1 %v392_v12  ;;  %v2451_v3 = vmul.f32 %v4799_v34, %v5782_v15  ;;  %4488 = vmatprep.subr.mxu0 %v382_v11 }
 0x244   : > { %4812 = vrcp.f32 %v2282_v18  ;;  %4440 = vmatprep.mubr.msk.f32.mxu0 %vm1847_vm1, %v2433_v59  ;;  %v2449_v39 = vmul.f32 %v4801_v32, %v5794_v40  ;;  %4513 = vmatpush3.msra.mxu1 %v392_v12 }
 0x245   : > { %4814 = vrcp.f32 %v2309_v28  ;;  %v2306_v4 = vpop.xlane.xlu1 %2305  ;;  %4441 = vmatmul.mubr.msk.f32.gmra.mxu0 %vm1847_vm1, %v2435_v48  ;;  %4514 = vmatprep.subr.mxu1 %v391_v37  ;;  %v4803_v40 = vpop.eup %4802  ;;  %v404_v48 = vld [vmem:[%s5780_s8 + $0x130] sm:$0xff] }
 0x246   : > { %4816 = vrcp.f32 %v2306_v4  ;;  %4468 = vmatprep.mubr.msk.f32.mxu1 %vm1847_vm1, %v2449_v39  ;;  %4489 = vmatpush3.msra.mxu0 %v382_v11  ;;  %v2439_v41 = vmul.f32 %v4803_v40, %v5815_v25 }
 0x247   : > { %4469 = vmatmul.mubr.msk.f32.gmra.mxu1 %vm1847_vm1, %v2451_v3  ;;  %v2291_v46 = vpop.xlane.xlu0 %2290  ;;  %4530 = vmatprep.subr.mxu0 %v405_v9  ;;  %v402_v3 = vld [vmem:[%s5780_s8 + $0x120] sm:$0xff] }
 0x248   : > { %4515 = vmatpush3.msra.mxu1 %v391_v37  ;;  %4818 = vrcp.f32 %v2291_v46 }
 0x249   : > { %v4805_v36 = vpop.eup %4804  ;;  %v2315_v38 = vpop.xlane.xlu1 %2314  ;;  %4516 = vmatprep.subr.mxu1 %v390_v58 }
 0x24a   : > { %v4807_v55 = vpop.eup %4806  ;;  %v2437_v15 = vmul.f32 %v4805_v36, %v5827_v44  ;;  %4517 = vmatpush3.msra.mxu1 %v390_v58 }
 0x24b   : > { %v4809_v16 = vpop.eup %4808  ;;  %v2288_v26 = vpop.xlane.xlu0 %2287  ;;  %4558 = vmatprep.subr.mxu1 %v413_v22  ;;  %v2455_v52 = vmul.f32 %v4807_v55, %v5808_v19 }
 0x24c   : > { %4820 = vrcp.f32 %v2288_v26  ;;  %4443 = vmatprep.mubr.msk.f32.mxu0 %vm1847_vm1, %v2437_v15  ;;  %v2453_v6 = vmul.f32 %v4809_v16, %v5822_v47  ;;  %v401_v16 = vld [vmem:[%s5780_s8 + $0x118] sm:$0xff]  ;;  %v400_v26 = vld [vmem:[%s5780_s8 + $0x110] sm:$0xff] }
 0x24d   : > { %4822 = vrcp.f32 %v2315_v38  ;;  %v2312_v12 = vpop.xlane.xlu1 %2311  ;;  %4444 = vmatmul.mubr.msk.f32.gmra.mxu0 %vm1847_vm1, %v2439_v41  ;;  %v4811_v25 = vpop.eup %4810  ;;  %v409_v41 = vld [vmem:[%s5780_s8 + $0x158] sm:$0xff] }
 0x24e   : > { %4824 = vrcp.f32 %v2312_v12  ;;  %4471 = vmatprep.mubr.msk.f32.mxu1 %vm1847_vm1, %v2453_v6  ;;  %v2459_v32 = vmul.f32 %v4811_v25, %v5841_v27  ;;  %v412_v27 = vld [vmem:[%s5780_s8 + $0x170] sm:$0xff] }
 0x24f   : > { %4472 = vmatmul.mubr.msk.f32.gmra.mxu1 %vm1847_vm1, %v2455_v52  ;;  %v2297_v44 = vpop.xlane.xlu0 %2296  ;;  %v408_v12 = vld [vmem:[%s5780_s8 + $0x150] sm:$0xff]  ;;  %v399_v52 = vld [vmem:[%s5780_s8 + $0x108] sm:$0xff] }
 0x250   : > { %4826 = vrcp.f32 %v2297_v44 }
 0x251   : > { %v4813_v28 = vpop.eup %4812  ;;  %v2321_v34 = vpop.xlane.xlu1 %2320 }
 0x252   : > { %v4815_v59 = vpop.eup %4814  ;;  %v2457_v11 = vmul.f32 %v4813_v28, %v5853_v45  ;;  %v403_v45 = vld [vmem:[%s5780_s8 + $0x128] sm:$0xff] }
 0x253   : > { %v4817_v47 = vpop.eup %4816  ;;  %v2294_v19 = vpop.xlane.xlu0 %2293  ;;  %v2475_v37 = vmul.f32 %v4815_v59, %v5835_v51  ;;  %v411_v51 = vld [vmem:[%s5780_s8 + $0x168] sm:$0xff] }
 0x254   : > { %4828 = vrcp.f32 %v2294_v19  ;;  %4490 = vmatprep.mubr.msk.f32.mxu0 %vm1847_vm1, %v2457_v11  ;;  %v2473_v18 = vmul.f32 %v4817_v47, %v5847_v2  ;;  %v398_v47 = vld [vmem:[%s5780_s8 + $0x100] sm:$0xff]  ;;  %v407_v19 = vld [vmem:[%s5780_s8 + $0x148] sm:$0xff] }
 0x255   : > { %4830 = vrcp.f32 %v2321_v34  ;;  %v2318_v39 = vpop.xlane.xlu1 %2317  ;;  %4491 = vmatmul.mubr.msk.f32.vlgmr.msra.gmra.mxu0 %vm1847_vm1, %v2459_v32  ;;  %v4819_v2 = vpop.eup %4818 }
 0x256   : > { %4832 = vrcp.f32 %v2318_v39  ;;  %4518 = vmatprep.mubr.msk.f32.mxu1 %vm1847_vm1, %v2473_v18  ;;  %4531 = vmatpush3.msra.mxu0 %v405_v9  ;;  %v2463_v55 = vmul.f32 %v4819_v2, %v5863_v61  ;;  %v429_v39 = vld [vmem:[%s5780_s8 + $0x1f8] sm:$0xff] }
 0x257   : > { %4519 = vmatmul.mubr.msk.f32.vlgmr.msra.gmra.mxu1 %vm1847_vm1, %v2475_v37  ;;  %v2303_v4 = vpop.xlane.xlu0 %2302  ;;  %4532 = vmatprep.subr.mxu0 %v404_v48 }
 0x258   : > { %4533 = vmatpush3.msra.mxu0 %v404_v48  ;;  %4559 = vmatpush3.msra.mxu1 %v413_v22  ;;  %4834 = vrcp.f32 %v2303_v4  ;;  %v410_v22 = vld [vmem:[%s5780_s8 + $0x160] sm:$0xff]  ;;  %v421_v48 = vld [vmem:[%s5780_s8 + $0x1b8] sm:$0xff] }
 0x259   : > { %v4821_v58 = vpop.eup %4820  ;;  %v2327_v46 = vpop.xlane.xlu1 %2326  ;;  %4560 = vmatprep.subr.mxu1 %v412_v27  ;;  %4534 = vmatprep.subr.mxu0 %v403_v45 }
 0x25a   : > { %v4823_v40 = vpop.eup %4822  ;;  %v2461_v9 = vmul.f32 %v4821_v58, %v5873_v30  ;;  %4535 = vmatpush3.msra.mxu0 %v403_v45  ;;  %4561 = vmatpush3.msra.mxu1 %v412_v27 }
 0x25b   : > { %v4825_v36 = vpop.eup %4824  ;;  %v2300_v38 = vpop.xlane.xlu0 %2299  ;;  %4536 = vmatprep.subr.mxu0 %v402_v3  ;;  %4562 = vmatprep.subr.mxu1 %v411_v51  ;;  %v2479_v61 = vmul.f32 %v4823_v40, %v5858_v10 }
 0x25c   : > { %4836 = vrcp.f32 %v2300_v38  ;;  %4493 = vmatprep.mubr.msk.f32.mxu0 %vm1847_vm1, %v2461_v9  ;;  %v2477_v15 = vmul.f32 %v4825_v36, %v5868_v33  ;;  %4537 = vmatpush3.msra.mxu0 %v402_v3 }
 0x25d   : > { %4838 = vrcp.f32 %v2327_v46  ;;  %v2324_v30 = vpop.xlane.xlu1 %2323  ;;  %4494 = vmatmul.mubr.msk.f32.gmra.mxu0 %vm1847_vm1, %v2463_v55  ;;  %4563 = vmatpush3.msra.mxu1 %v411_v51  ;;  %v4827_v6 = vpop.eup %4826 }
 0x25e   : > { %4840 = vrcp.f32 %v2324_v30  ;;  %4521 = vmatprep.mubr.msk.f32.mxu1 %vm1847_vm1, %v2477_v15  ;;  %4564 = vmatprep.subr.mxu1 %v410_v22  ;;  %v2467_v11 = vmul.f32 %v4827_v6, %v5883_v57  ;;  %v406_v57 = vld [vmem:[%s5780_s8 + $0x140] sm:$0xff] }
 0x25f   : > { %4522 = vmatmul.mubr.msk.f32.gmra.mxu1 %vm1847_vm1, %v2479_v61  ;;  %v2333_v33 = vpop.xlane.xlu0 %2332  ;;  %4538 = vmatprep.subr.mxu0 %v401_v16 }
 0x260   : > { %4539 = vmatpush3.msra.mxu0 %v401_v16  ;;  %4565 = vmatpush3.msra.mxu1 %v410_v22  ;;  %4842 = vrcp.f32 %v2333_v33  ;;  %v420_v16 = vld [vmem:[%s5780_s8 + $0x1b0] sm:$0xff] }
 0x261   : > { %v4829_v44 = vpop.eup %4828  ;;  %v2357_v25 = vpop.xlane.xlu1 %2356  ;;  %4540 = vmatprep.subr.mxu0 %v400_v26  ;;  %4566 = vmatprep.subr.mxu1 %v409_v41 }
 0x262   : > { %v4831_v10 = vpop.eup %4830  ;;  %v2465_v28 = vmul.f32 %v4829_v44, %v5900_v35  ;;  %4541 = vmatpush3.msra.mxu0 %v400_v26  ;;  %4567 = vmatpush3.msra.mxu1 %v409_v41  ;;  %v418_v41 = vld [vmem:[%s5780_s8 + $0x1a0] sm:$0xff] }
 0x263   : > { %v4833_v34 = vpop.eup %4832  ;;  %v2330_v59 = vpop.xlane.xlu0 %2329  ;;  %4568 = vmatprep.subr.mxu1 %v408_v12  ;;  %4542 = vmatprep.subr.mxu0 %v399_v52  ;;  %v2483_v18 = vmul.f32 %v4831_v10, %v5878_v14 }
 0x264   : > { %4844 = vrcp.f32 %v2330_v59  ;;  %4496 = vmatprep.mubr.msk.f32.mxu0 %vm1847_vm1, %v2465_v28  ;;  %v2481_v32 = vmul.f32 %v4833_v34, %v5892_v24  ;;  %4543 = vmatpush3.msra.mxu0 %v399_v52  ;;  %v426_v28 = vld [vmem:[%s5780_s8 + $0x1e0] sm:$0xff]  ;;  %v417_v59 = vld [vmem:[%s5780_s8 + $0x198] sm:$0xff] }
 0x265   : > { %4846 = vrcp.f32 %v2357_v25  ;;  %v2354_v35 = vpop.xlane.xlu1 %2353  ;;  %4497 = vmatmul.mubr.msk.f32.gmra.mxu0 %vm1847_vm1, %v2467_v11  ;;  %4569 = vmatpush3.msra.mxu1 %v408_v12  ;;  %v4835_v24 = vpop.eup %4834  ;;  %v416_v11 = vld [vmem:[%s5780_s8 + $0x190] sm:$0xff] }
 0x266   : > { %4848 = vrcp.f32 %v2354_v35  ;;  %4524 = vmatprep.mubr.msk.f32.mxu1 %vm1847_vm1, %v2481_v32  ;;  %4544 = vmatprep.subr.mxu0 %v398_v47  ;;  %v2471_v51 = vmul.f32 %v4835_v24, %v5911_v62  ;;  %v415_v35 = vld [vmem:[%s5780_s8 + $0x188] sm:$0xff] }
 0x267   : > { %4525 = vmatmul.mubr.msk.f32.gmra.mxu1 %vm1847_vm1, %v2483_v18  ;;  %v2339_v37 = vpop.xlane.xlu0 %2338  ;;  %4570 = vmatprep.subr.mxu1 %v407_v19 }
 0x268   : > { %4545 = vmatpush3.msra.mxu0 %v398_v47  ;;  %4571 = vmatpush3.msra.mxu1 %v407_v19  ;;  %4850 = vrcp.f32 %v2339_v37  ;;  %v425_v47 = vld [vmem:[%s5780_s8 + $0x1d8] sm:$0xff]  ;;  %v424_v19 = vld [vmem:[%s5780_s8 + $0x1d0] sm:$0xff] }
 0x269   : > { %v4837_v27 = vpop.eup %4836  ;;  %v2363_v45 = vpop.xlane.xlu1 %2362  ;;  %4572 = vmatprep.subr.mxu1 %v406_v57  ;;  %4586 = vmatprep.subr.mxu0 %v421_v48 }
 0x26a   : > { %v4839_v14 = vpop.eup %4838  ;;  %v2469_v4 = vmul.f32 %v4837_v27, %v5921_v13  ;;  %4573 = vmatpush3.msra.mxu1 %v406_v57  ;;  %v6468_v27 = vld [vmem:[#allocation3_spill] sm:$0xff] }
 0x26b   : > { %v4841_v2 = vpop.eup %4840  ;;  %v2336_v3 = vpop.xlane.xlu0 %2335  ;;  %4614 = vmatprep.subr.mxu1 %v429_v39  ;;  %v2487_v40 = vmul.f32 %v4839_v14, %v5906_v53  ;;  %v414_v14 = vld [vmem:[%s5780_s8 + $0x180] sm:$0xff] }
 0x26c   : > { %4852 = vrcp.f32 %v2336_v3  ;;  %4499 = vmatprep.mubr.msk.f32.mxu0 %vm1847_vm1, %v2469_v4  ;;  %v2485_v58 = vmul.f32 %v4841_v2, %v5916_v50  ;;  %v6469_v4 = vld [vmem:[#allocation4_spill] sm:$0xff]  ;;  %v423_v3 = vld [vmem:[%s5780_s8 + $0x1c8] sm:$0xff] }
 0x26d   : > { %4854 = vrcp.f32 %v2363_v45  ;;  %v2360_v46 = vpop.xlane.xlu1 %2359  ;;  %4500 = vmatmul.mubr.msk.f32.gmra.mxu0 %vm1847_vm1, %v2471_v51  ;;  %v4843_v62 = vpop.eup %4842 }
 0x26e   : > { %4856 = vrcp.f32 %v2360_v46  ;;  %4527 = vmatprep.mubr.msk.f32.mxu1 %vm1847_vm1, %v2485_v58  ;;  %v2491_v22 = vmul.f32 %v4843_v62, %v5931_v5  ;;  %v428_v5 = vld [vmem:[%s5780_s8 + $0x1f0] sm:$0xff]  ;;  %v6470_v58 = vld [vmem:[#allocation2_spill] sm:$0xff] }
 0x26f   : > { %4528 = vmatmul.mubr.msk.f32.gmra.mxu1 %vm1847_vm1, %v2487_v40  ;;  %v2345_v13 = vpop.xlane.xlu0 %2344  ;;  %v422_v40 = vld [vmem:[%s5780_s8 + $0x1c0] sm:$0xff] }
 0x270   : > { %4858 = vrcp.f32 %v2345_v13 }
 0x271   : > { %v4845_v9 = vpop.eup %4844  ;;  %v2369_v36 = vpop.xlane.xlu1 %2368 }
 0x272   : > { %v4847_v38 = vpop.eup %4846  ;;  %v2489_v55 = vmul.f32 %v4845_v9, %v5941_v63  ;;  %v419_v63 = vld [vmem:[%s5780_s8 + $0x1a8] sm:$0xff] }
 0x273   : > { %v4849_v50 = vpop.eup %4848  ;;  %v2342_v53 = vpop.xlane.xlu0 %2341  ;;  %v2507_v30 = vmul.f32 %v4847_v38, %v5926_v21  ;;  %v427_v21 = vld [vmem:[%s5780_s8 + $0x1e8] sm:$0xff] }
 0x274   : > { %4860 = vrcp.f32 %v2342_v53  ;;  %4546 = vmatprep.mubr.msk.f32.mxu0 %vm1847_vm1, %v2489_v55  ;;  %v2505_v15 = vmul.f32 %v4849_v50, %v5936_v49  ;;  %v6471_v53 = vld [vmem:[#allocation7_spill] sm:$0xff] }
 0x275   : > { %4862 = vrcp.f32 %v2369_v36  ;;  %v2366_v61 = vpop.xlane.xlu1 %2365  ;;  %4547 = vmatmul.mubr.msk.f32.vlgmr.msra.gmra.mxu0 %vm1847_vm1, %v2491_v22  ;;  %v4851_v49 = vpop.eup %4850 }
 0x276   : > { %4864 = vrcp.f32 %v2366_v61  ;;  %4574 = vmatprep.mubr.msk.f32.mxu1 %vm1847_vm1, %v2505_v15  ;;  %4587 = vmatpush3.msra.mxu0 %v421_v48  ;;  %v2495_v10 = vmul.f32 %v4851_v49, %v5951_v0  ;;  %v6467_v48 = vld [vmem:[#allocation5_spill] sm:$0xff]  ;;  %v6472_v61 = vld [vmem:[#allocation6_spill] sm:$0xff] }
 0x277   : > { %4575 = vmatmul.mubr.msk.f32.vlgmr.msra.gmra.mxu1 %vm1847_vm1, %v2507_v30  ;;  %v2351_v26 = vpop.xlane.xlu0 %2350  ;;  %4588 = vmatprep.subr.mxu0 %v420_v16 }
 0x278   : > { %4589 = vmatpush3.msra.mxu0 %v420_v16  ;;  %4615 = vmatpush3.msra.mxu1 %v429_v39  ;;  %4866 = vrcp.f32 %v2351_v26 }
 0x279   : > { %v4853_v33 = vpop.eup %4852  ;;  %v2375_v6 = vpop.xlane.xlu1 %2374  ;;  %4616 = vmatprep.subr.mxu1 %v428_v5  ;;  %4590 = vmatprep.subr.mxu0 %v419_v63 }
 0x27a   : > { %v4855_v12 = vpop.eup %4854  ;;  %v2493_v52 = vmul.f32 %v4853_v33, %v5961_v8  ;;  %4591 = vmatpush3.msra.mxu0 %v419_v63  ;;  %4617 = vmatpush3.msra.mxu1 %v428_v5 }
 0x27b   : > { %v4857_v44 = vpop.eup %4856  ;;  %v2348_v25 = vpop.xlane.xlu0 %2347  ;;  %4592 = vmatprep.subr.mxu0 %v418_v41  ;;  %4618 = vmatprep.subr.mxu1 %v427_v21  ;;  %v2511_v0 = vmul.f32 %v4855_v12, %v5946_v1 }
 0x27c   : > { %4868 = vrcp.f32 %v2348_v25  ;;  %4549 = vmatprep.mubr.msk.f32.mxu0 %vm1847_vm1, %v2493_v52  ;;  %v2509_v34 = vmul.f32 %v4857_v44, %v5956_v54  ;;  %4593 = vmatpush3.msra.mxu0 %v418_v41  ;;  %v6474_v52 = vld [vmem:[#allocation10_spill] sm:$0xff]  ;;  %v6475_v25 = vld [vmem:[#allocation8_spill] sm:$0xff] }
 0x27d   : > { %4870 = vrcp.f32 %v2375_v6  ;;  %v2372_v8 = vpop.xlane.xlu1 %2371  ;;  %4550 = vmatmul.mubr.msk.f32.gmra.mxu0 %vm1847_vm1, %v2495_v10  ;;  %4619 = vmatpush3.msra.mxu1 %v427_v21  ;;  %v4859_v32 = vpop.eup %4858 }
 0x27e   : > { %4872 = vrcp.f32 %v2372_v8  ;;  %4577 = vmatprep.mubr.msk.f32.mxu1 %vm1847_vm1, %v2509_v34  ;;  %4620 = vmatprep.subr.mxu1 %v426_v28  ;;  %v2499_v45 = vmul.f32 %v4859_v32, %v6468_v27  ;;  %v6477_v27 = vld [vmem:[#allocation12_spill] sm:$0xff] }
 0x27f   : > { %4578 = vmatmul.mubr.msk.f32.gmra.mxu1 %vm1847_vm1, %v2511_v0  ;;  %v2381_v54 = vpop.xlane.xlu0 %2380  ;;  %4594 = vmatprep.subr.mxu0 %v417_v59 }
 0x280   : > { %4595 = vmatpush3.msra.mxu0 %v417_v59  ;;  %4621 = vmatpush3.msra.mxu1 %v426_v28  ;;  %4874 = vrcp.f32 %v2381_v54 }
 0x281   : > { %v4861_v18 = vpop.eup %4860  ;;  %v2405_v57 = vpop.xlane.xlu1 %2404  ;;  %4596 = vmatprep.subr.mxu0 %v416_v11  ;;  %4622 = vmatprep.subr.mxu1 %v425_v47 }
 0x282   : > { %v4863_v1 = vpop.eup %4862  ;;  %v2497_v37 = vmul.f32 %v4861_v18, %v6467_v48  ;;  %4597 = vmatpush3.msra.mxu0 %v416_v11  ;;  %4623 = vmatpush3.msra.mxu1 %v425_v47 }
 0x283   : > { %v4865_v24 = vpop.eup %4864  ;;  %v2378_v39 = vpop.xlane.xlu0 %2377  ;;  %4624 = vmatprep.subr.mxu1 %v424_v19  ;;  %4598 = vmatprep.subr.mxu0 %v415_v35  ;;  %v2515_v46 = vmul.f32 %v4863_v1, %v6470_v58 }
 0x284   : > { %4876 = vrcp.f32 %v2378_v39  ;;  %4552 = vmatprep.mubr.msk.f32.mxu0 %vm1847_vm1, %v2497_v37  ;;  %v2513_v2 = vmul.f32 %v4865_v24, %v6469_v4  ;;  %4599 = vmatpush3.msra.mxu0 %v415_v35 }
 0x285   : > { %4878 = vrcp.f32 %v2405_v57  ;;  %v2402_v51 = vpop.xlane.xlu1 %2401  ;;  %4553 = vmatmul.mubr.msk.f32.gmra.mxu0 %vm1847_vm1, %v2499_v45  ;;  %4625 = vmatpush3.msra.mxu1 %v424_v19  ;;  %v4867_v62 = vpop.eup %4866 }
 0x286   : > { %4880 = vrcp.f32 %v2402_v51  ;;  %4580 = vmatprep.mubr.msk.f32.mxu1 %vm1847_vm1, %v2513_v2  ;;  %4600 = vmatprep.subr.mxu0 %v414_v14  ;;  %v2503_v15 = vmul.f32 %v4867_v62, %v6471_v53  ;;  %v6480_v51 = vld [vmem:[#allocation15_spill] sm:$0xff] }
 0x287   : > { %4581 = vmatmul.mubr.msk.f32.gmra.mxu1 %vm1847_vm1, %v2515_v46  ;;  %v2387_v13 = vpop.xlane.xlu0 %2386  ;;  %4626 = vmatprep.subr.mxu1 %v423_v3 }
 0x288   : > { %4601 = vmatpush3.msra.mxu0 %v414_v14  ;;  %4627 = vmatpush3.msra.mxu1 %v423_v3  ;;  %4882 = vrcp.f32 %v2387_v13 }
 0x289   : > { %v4869_v9 = vpop.eup %4868  ;;  %v2411_v36 = vpop.xlane.xlu1 %2410  ;;  %4628 = vmatprep.subr.mxu1 %v422_v40 }
 0x28a   : > { %v4871_v38 = vpop.eup %4870  ;;  %v2501_v55 = vmul.f32 %v4869_v9, %v6001_v20  ;;  %4629 = vmatpush3.msra.mxu1 %v422_v40 }
 0x28b   : > { %v4873_v50 = vpop.eup %4872  ;;  %v2384_v22 = vpop.xlane.xlu0 %2383  ;;  %v2519_v5 = vmul.f32 %v4871_v38, %v6472_v61 }
 0x28c   : > { %4884 = vrcp.f32 %v2384_v22  ;;  %4555 = vmatprep.mubr.msk.f32.mxu0 %vm1847_vm1, %v2501_v55  ;;  %v2517_v16 = vmul.f32 %v4873_v50, %v5996_v31  ;;  %v6473_v31 = vld [vmem:[#allocation9_spill] sm:$0xff] }
 0x28d   : > { %4886 = vrcp.f32 %v2411_v36  ;;  %v2408_v30 = vpop.xlane.xlu1 %2407  ;;  %4556 = vmatmul.mubr.msk.f32.gmra.mxu0 %vm1847_vm1, %v2503_v15  ;;  %v4875_v63 = vpop.eup %4874 }
 0x28e   : > { %4888 = vrcp.f32 %v2408_v30  ;;  %4583 = vmatprep.mubr.msk.f32.mxu1 %vm1847_vm1, %v2517_v16  ;;  %v2523_v6 = vmul.f32 %v4875_v63, %v6473_v31 }
 0x28f   : > { %4584 = vmatmul.mubr.msk.f32.gmra.mxu1 %vm1847_vm1, %v2519_v5  ;;  %v2393_v20 = vpop.xlane.xlu0 %2392 }
 0x290   : > { %4890 = vrcp.f32 %v2393_v20 }
 0x291   : > { %v4877_v26 = vpop.eup %4876  ;;  %v2417_v49 = vpop.xlane.xlu1 %2416 }
 0x292   : > { %v4879_v41 = vpop.eup %4878  ;;  %v2521_v21 = vmul.f32 %v4877_v26, %v6021_v60 }
 0x293   : > { %v4881_v33 = vpop.eup %4880  ;;  %v2390_v12 = vpop.xlane.xlu0 %2389  ;;  %v2539_v10 = vmul.f32 %v4879_v41, %v6475_v25 }
 0x294   : > { %4892 = vrcp.f32 %v2390_v12  ;;  %4602 = vmatprep.mubr.msk.f32.mxu0 %vm1847_vm1, %v2521_v21  ;;  %v2537_v44 = vmul.f32 %v4881_v33, %v6474_v52 }
 0x295   : > { %4894 = vrcp.f32 %v2417_v49  ;;  %v2414_v28 = vpop.xlane.xlu1 %2413  ;;  %4603 = vmatmul.mubr.msk.f32.vlgmr.msra.gmra.mxu0 %vm1847_vm1, %v2523_v6  ;;  %v4883_v60 = vpop.eup %4882 }
 0x296   : > { %4896 = vrcp.f32 %v2414_v28  ;;  %4630 = vmatprep.mubr.msk.f32.mxu1 %vm1847_vm1, %v2537_v44  ;;  %v2527_v54 = vmul.f32 %v4883_v60, %v6030_v29 }
 0x297   : > { %4631 = vmatmul.mubr.msk.f32.vlgmr.msra.gmra.mxu1 %vm1847_vm1, %v2539_v10 }
 0x299   : > { %v4885_v34 = vpop.eup %4884 }
 0x29a   : > { %v2420_v59 = vpop.xlane.xlu1 %2419  ;;  %v4887_v8 = vpop.eup %4886  ;;  %v2525_v0 = vmul.f32 %v4885_v34, %v6041_v7 }
 0x29b   : > { %4898 = vrcp.f32 %v2420_v59  ;;  %v4889_v11 = vpop.eup %4888  ;;  %v2543_v35 = vmul.f32 %v4887_v8, %v6026_v43  ;;  %v6476_v43 = vld [vmem:[#allocation11_spill] sm:$0xff] }
 0x29c   : > { %v2396_v47 = vpop.xlane.xlu0 %2395  ;;  %4605 = vmatprep.mubr.msk.f32.mxu0 %vm1847_vm1, %v2525_v0  ;;  %v2541_v32 = vmul.f32 %v4889_v11, %v6036_v23 }
 0x29d   : > { %4900 = vrcp.f32 %v2396_v47  ;;  %4606 = vmatmul.mubr.msk.f32.gmra.mxu0 %vm1847_vm1, %v2527_v54  ;;  %v4891_v18 = vpop.eup %4890 }
 0x29e   : > { %v2423_v19 = vpop.xlane.xlu1 %2422  ;;  %4633 = vmatprep.mubr.msk.f32.mxu1 %vm1847_vm1, %v2541_v32  ;;  %v2531_v23 = vmul.f32 %v4891_v18, %v6049_v42  ;;  %v6478_v42 = vld [vmem:[#allocation14_spill] sm:$0xff] }
 0x29f   : > { %4902 = vrcp.f32 %v2423_v19  ;;  %4634 = vmatmul.mubr.msk.f32.gmra.mxu1 %vm1847_vm1, %v2543_v35 }
 0x2a0   : > { %v2399_v7 = vpop.xlane.xlu0 %2398 }
 0x2a1   : > { %4904 = vrcp.f32 %v2399_v7  ;;  %v4893_v57 = vpop.eup %4892 }
 0x2a2   : > { %v4895_v29 = vpop.eup %4894  ;;  %v2529_v1 = vmul.f32 %v4893_v57, %v6057_v17 }
 0x2a3   : > { %v4897_v48 = vpop.eup %4896  ;;  %v2547_v24 = vmul.f32 %v4895_v29, %v6476_v43 }
 0x2a4   : > { %4608 = vmatprep.mubr.msk.f32.mxu0 %vm1847_vm1, %v2529_v1  ;;  %v2545_v37 = vmul.f32 %v4897_v48, %v6053_v56  ;;  %v6479_v56 = vld [vmem:[#allocation13_spill] sm:$0xff] }
 0x2a5   : > { %4609 = vmatmul.mubr.msk.f32.gmra.mxu0 %vm1847_vm1, %v2531_v23 }
 0x2a6   : > { %4636 = vmatprep.mubr.msk.f32.mxu1 %vm1847_vm1, %v2545_v37 }
 0x2a7   : > { %4637 = vmatmul.mubr.msk.f32.gmra.mxu1 %vm1847_vm1, %v2547_v24 }
 0x2a8   : > { %v4899_v39 = vpop.eup %4898 }
 0x2a9   : > { %v2549_v45 = vmul.f32 %v4899_v39, %v6477_v27 }
 0x2aa   : > { %v4901_v17 = vpop.eup %4900 }
 0x2ab   : > { %4639 = vmatprep.mubr.msk.f32.mxu1 %vm1847_vm1, %v2549_v45  ;;  %v2533_v14 = vmul.f32 %v4901_v17, %v6478_v42 }
 0x2ac   : > { %v4903_v4 = vpop.eup %4902 }
 0x2ad   : > { %4611 = vmatprep.mubr.msk.f32.mxu0 %vm1847_vm1, %v2533_v14  ;;  %v2551_v2 = vmul.f32 %v4903_v4, %v6479_v56 }
 0x2ae   : > { %v4905_v3 = vpop.eup %4904 }
 0x2af   : > { %4640 = vmatmul.mubr.msk.f32.gmra.mxu1 %vm1847_vm1, %v2551_v2  ;;  %v2535_v58 = vmul.f32 %v4905_v3, %v6480_v51 }
 0x2b1   : > { %4612 = vmatmul.mubr.msk.f32.gmra.mxu0 %vm1847_vm1, %v2535_v58 }
 0x2f3   : > { %v4436_v46 = vpop.f32.mrf.mxu0 }
 0x2f4   : > { %3585 = vst.msk [vmem:[%s6259_s11 + $0x8] sm:$0xff] %vm430_vm0, %v4436_v46 }
 0x2f5   : > { %v2642_v40 = vpop.f32.mrf.mxu0 }
 0x2f6   : > { %3584 = vst.msk [vmem:[%s6259_s11] sm:$0xff] %vm430_vm0, %v2642_v40 }
 0x2f7   : > { %v4464_v13 = vpop.f32.mrf.mxu1 }
 0x2f8   : > { %3593 = vst.msk [vmem:[%s6259_s11 + $0x48] sm:$0xff] %vm430_vm0, %v4464_v13 }
 0x2f9   : > { %v2771_v62 = vpop.f32.mrf.mxu1 }
 0x2fa   : > { %3592 = vst.msk [vmem:[%s6259_s11 + $0x40] sm:$0xff] %vm430_vm0, %v2771_v62 }
 0x2fd   : > { %v4439_v9 = vpop.f32.mrf.mxu0 }
 0x2fe   : > { %3587 = vst.msk [vmem:[%s6259_s11 + $0x18] sm:$0xff] %vm430_vm0, %v4439_v9 }
 0x2ff   : > { %v2652_v36 = vpop.f32.mrf.mxu0  ;;  %v4467_v38 = vpop.f32.mrf.mxu1 }
 0x300   : > { %3586 = vst.msk [vmem:[%s6259_s11 + $0x10] sm:$0xff] %vm430_vm0, %v2652_v36  ;;  %3595 = vst.msk [vmem:[%s6259_s11 + $0x58] sm:$0xff] %vm430_vm0, %v4467_v38 }
 0x301   : > { %v2781_v55 = vpop.f32.mrf.mxu1 }
 0x302   : > { %3594 = vst.msk [vmem:[%s6259_s11 + $0x50] sm:$0xff] %vm430_vm0, %v2781_v55 }
 0x305   : > { %v4442_v50 = vpop.f32.mrf.mxu0 }
 0x306   : > { %3589 = vst.msk [vmem:[%s6259_s11 + $0x28] sm:$0xff] %vm430_vm0, %v4442_v50 }
 0x307   : > { %v2662_v22 = vpop.f32.mrf.mxu0  ;;  %v4470_v53 = vpop.f32.mrf.mxu1 }
 0x308   : > { %3588 = vst.msk [vmem:[%s6259_s11 + $0x20] sm:$0xff] %vm430_vm0, %v2662_v22  ;;  %3597 = vst.msk [vmem:[%s6259_s11 + $0x68] sm:$0xff] %vm430_vm0, %v4470_v53 }
 0x309   : > { %v2791_v15 = vpop.f32.mrf.mxu1 }
 0x30a   : > { %3596 = vst.msk [vmem:[%s6259_s11 + $0x60] sm:$0xff] %vm430_vm0, %v2791_v15 }
 0x30d   : > { %v4445_v16 = vpop.f32.mrf.mxu0 }
 0x30e   : > { %3591 = vst.msk [vmem:[%s6259_s11 + $0x38] sm:$0xff] %vm430_vm0, %v4445_v16 }
 0x30f   : > { %v2672_v30 = vpop.f32.mrf.mxu0  ;;  %v4473_v61 = vpop.f32.mrf.mxu1 }
 0x310   : > { %3590 = vst.msk [vmem:[%s6259_s11 + $0x30] sm:$0xff] %vm430_vm0, %v2672_v30  ;;  %3599 = vst.msk [vmem:[%s6259_s11 + $0x78] sm:$0xff] %vm430_vm0, %v4473_v61 }
 0x311   : > { %v2801_v5 = vpop.f32.mrf.mxu1 }
 0x312   : > { %3598 = vst.msk [vmem:[%s6259_s11 + $0x70] sm:$0xff] %vm430_vm0, %v2801_v5 }
 0x315   : > { %v4492_v20 = vpop.f32.mrf.mxu0 }
 0x316   : > { %3601 = vst.msk [vmem:[%s6259_s11 + $0x88] sm:$0xff] %vm430_vm0, %v4492_v20 }
 0x317   : > { %v2900_v63 = vpop.f32.mrf.mxu0  ;;  %v4520_v26 = vpop.f32.mrf.mxu1 }
 0x318   : > { %3600 = vst.msk [vmem:[%s6259_s11 + $0x80] sm:$0xff] %vm430_vm0, %v2900_v63  ;;  %3609 = vst.msk [vmem:[%s6259_s11 + $0xc8] sm:$0xff] %vm430_vm0, %v4520_v26 }
 0x319   : > { %v3029_v49 = vpop.f32.mrf.mxu1 }
 0x31a   : > { %3608 = vst.msk [vmem:[%s6259_s11 + $0xc0] sm:$0xff] %vm430_vm0, %v3029_v49 }
 0x31d   : > { %v4495_v41 = vpop.f32.mrf.mxu0 }
 0x31e   : > { %3603 = vst.msk [vmem:[%s6259_s11 + $0x98] sm:$0xff] %vm430_vm0, %v4495_v41 }
 0x31f   : > { %v2910_v21 = vpop.f32.mrf.mxu0  ;;  %v4523_v33 = vpop.f32.mrf.mxu1 }
 0x320   : > { %3602 = vst.msk [vmem:[%s6259_s11 + $0x90] sm:$0xff] %vm430_vm0, %v2910_v21  ;;  %3611 = vst.msk [vmem:[%s6259_s11 + $0xd8] sm:$0xff] %vm430_vm0, %v4523_v33 }
 0x321   : > { %v3039_v31 = vpop.f32.mrf.mxu1 }
 0x322   : > { %3610 = vst.msk [vmem:[%s6259_s11 + $0xd0] sm:$0xff] %vm430_vm0, %v3039_v31 }
 0x325   : > { %v4498_v6 = vpop.f32.mrf.mxu0 }
 0x326   : > { %3605 = vst.msk [vmem:[%s6259_s11 + $0xa8] sm:$0xff] %vm430_vm0, %v4498_v6 }
 0x327   : > { %v2920_v12 = vpop.f32.mrf.mxu0  ;;  %v4526_v52 = vpop.f32.mrf.mxu1 }
 0x328   : > { %3604 = vst.msk [vmem:[%s6259_s11 + $0xa0] sm:$0xff] %vm430_vm0, %v2920_v12  ;;  %3613 = vst.msk [vmem:[%s6259_s11 + $0xe8] sm:$0xff] %vm430_vm0, %v4526_v52 }
 0x329   : > { %v3049_v44 = vpop.f32.mrf.mxu1 }
 0x32a   : > { %3612 = vst.msk [vmem:[%s6259_s11 + $0xe0] sm:$0xff] %vm430_vm0, %v3049_v44 }
 0x32d   : > { %v4501_v25 = vpop.f32.mrf.mxu0 }
 0x32e   : > { %3607 = vst.msk [vmem:[%s6259_s11 + $0xb8] sm:$0xff] %vm430_vm0, %v4501_v25 }
 0x32f   : > { %v2930_v10 = vpop.f32.mrf.mxu0  ;;  %v4529_v28 = vpop.f32.mrf.mxu1 }
 0x330   : > { %3606 = vst.msk [vmem:[%s6259_s11 + $0xb0] sm:$0xff] %vm430_vm0, %v2930_v10  ;;  %3615 = vst.msk [vmem:[%s6259_s11 + $0xf8] sm:$0xff] %vm430_vm0, %v4529_v28 }
 0x331   : > { %v3059_v60 = vpop.f32.mrf.mxu1 }
 0x332   : > { %3614 = vst.msk [vmem:[%s6259_s11 + $0xf0] sm:$0xff] %vm430_vm0, %v3059_v60 }
 0x335   : > { %v4548_v34 = vpop.f32.mrf.mxu0 }
 0x336   : > { %3617 = vst.msk [vmem:[%s6259_s11 + $0x108] sm:$0xff] %vm430_vm0, %v4548_v34 }
 0x337   : > { %v3158_v59 = vpop.f32.mrf.mxu0  ;;  %v4576_v8 = vpop.f32.mrf.mxu1 }
 0x338   : > { %3616 = vst.msk [vmem:[%s6259_s11 + $0x100] sm:$0xff] %vm430_vm0, %v3158_v59  ;;  %3625 = vst.msk [vmem:[%s6259_s11 + $0x148] sm:$0xff] %vm430_vm0, %v4576_v8 }
 0x339   : > { %v3287_v0 = vpop.f32.mrf.mxu1 }
 0x33a   : > { %3624 = vst.msk [vmem:[%s6259_s11 + $0x140] sm:$0xff] %vm430_vm0, %v3287_v0 }
 0x33d   : > { %v4551_v11 = vpop.f32.mrf.mxu0 }
 0x33e   : > { %3619 = vst.msk [vmem:[%s6259_s11 + $0x118] sm:$0xff] %vm430_vm0, %v4551_v11 }
 0x33f   : > { %v3168_v47 = vpop.f32.mrf.mxu0  ;;  %v4579_v54 = vpop.f32.mrf.mxu1 }
 0x340   : > { %3618 = vst.msk [vmem:[%s6259_s11 + $0x110] sm:$0xff] %vm430_vm0, %v3168_v47  ;;  %3627 = vst.msk [vmem:[%s6259_s11 + $0x158] sm:$0xff] %vm430_vm0, %v4579_v54 }
 0x341   : > { %v3297_v32 = vpop.f32.mrf.mxu1 }
 0x342   : > { %3626 = vst.msk [vmem:[%s6259_s11 + $0x150] sm:$0xff] %vm430_vm0, %v3297_v32 }
 0x345   : > { %v4554_v19 = vpop.f32.mrf.mxu0 }
 0x346   : > { %3621 = vst.msk [vmem:[%s6259_s11 + $0x128] sm:$0xff] %vm430_vm0, %v4554_v19 }
 0x347   : > { %v3178_v35 = vpop.f32.mrf.mxu0  ;;  %v4582_v7 = vpop.f32.mrf.mxu1 }
 0x348   : > { %3620 = vst.msk [vmem:[%s6259_s11 + $0x120] sm:$0xff] %vm430_vm0, %v3178_v35  ;;  %3629 = vst.msk [vmem:[%s6259_s11 + $0x168] sm:$0xff] %vm430_vm0, %v4582_v7 }
 0x349   : > { %v3307_v18 = vpop.f32.mrf.mxu1 }
 0x34a   : > { %3628 = vst.msk [vmem:[%s6259_s11 + $0x160] sm:$0xff] %vm430_vm0, %v3307_v18 }
 0x34d   : > { %v4557_v57 = vpop.f32.mrf.mxu0 }
 0x34e   : > { %3623 = vst.msk [vmem:[%s6259_s11 + $0x138] sm:$0xff] %vm430_vm0, %v4557_v57 }
 0x34f   : > { %v3188_v29 = vpop.f32.mrf.mxu0  ;;  %v4585_v1 = vpop.f32.mrf.mxu1 }
 0x350   : > { %3622 = vst.msk [vmem:[%s6259_s11 + $0x130] sm:$0xff] %vm430_vm0, %v3188_v29  ;;  %3631 = vst.msk [vmem:[%s6259_s11 + $0x178] sm:$0xff] %vm430_vm0, %v4585_v1 }
 0x351   : > { %v3317_v48 = vpop.f32.mrf.mxu1 }
 0x352   : > { %3630 = vst.msk [vmem:[%s6259_s11 + $0x170] sm:$0xff] %vm430_vm0, %v3317_v48 }
 0x355   : > { %v4604_v23 = vpop.f32.mrf.mxu0 }
 0x356   : > { %3633 = vst.msk [vmem:[%s6259_s11 + $0x188] sm:$0xff] %vm430_vm0, %v4604_v23 }
 0x357   : > { %v3416_v37 = vpop.f32.mrf.mxu0  ;;  %v4632_v43 = vpop.f32.mrf.mxu1 }
 0x358   : > { %3632 = vst.msk [vmem:[%s6259_s11 + $0x180] sm:$0xff] %vm430_vm0, %v3416_v37  ;;  %3641 = vst.msk [vmem:[%s6259_s11 + $0x1c8] sm:$0xff] %vm430_vm0, %v4632_v43 }
 0x359   : > { %v3545_v24 = vpop.f32.mrf.mxu1 }
 0x35a   : > { %3640 = vst.msk [vmem:[%s6259_s11 + $0x1c0] sm:$0xff] %vm430_vm0, %v3545_v24 }
 0x35d   : > { %v4607_v39 = vpop.f32.mrf.mxu0 }
 0x35e   : > { %3635 = vst.msk [vmem:[%s6259_s11 + $0x198] sm:$0xff] %vm430_vm0, %v4607_v39 }
 0x35f   : > { %v3426_v27 = vpop.f32.mrf.mxu0  ;;  %v4635_v45 = vpop.f32.mrf.mxu1 }
 0x360   : > { %3634 = vst.msk [vmem:[%s6259_s11 + $0x190] sm:$0xff] %vm430_vm0, %v3426_v27  ;;  %3643 = vst.msk [vmem:[%s6259_s11 + $0x1d8] sm:$0xff] %vm430_vm0, %v4635_v45 }
 0x361   : > { %v3555_v17 = vpop.f32.mrf.mxu1 }
 0x362   : > { %3642 = vst.msk [vmem:[%s6259_s11 + $0x1d0] sm:$0xff] %vm430_vm0, %v3555_v17 }
 0x365   : > { %v4610_v42 = vpop.f32.mrf.mxu0 }
 0x366   : > { %3637 = vst.msk [vmem:[%s6259_s11 + $0x1a8] sm:$0xff] %vm430_vm0, %v4610_v42 }
 0x367   : > { %v3436_v14 = vpop.f32.mrf.mxu0  ;;  %v4638_v4 = vpop.f32.mrf.mxu1 }
 0x368   : > { %3636 = vst.msk [vmem:[%s6259_s11 + $0x1a0] sm:$0xff] %vm430_vm0, %v3436_v14  ;;  %3645 = vst.msk [vmem:[%s6259_s11 + $0x1e8] sm:$0xff] %vm430_vm0, %v4638_v4 }
 0x369   : > { %v3565_v56 = vpop.f32.mrf.mxu1 }
 0x36a   : > { %3644 = vst.msk [vmem:[%s6259_s11 + $0x1e0] sm:$0xff] %vm430_vm0, %v3565_v56 }
 0x36f   : > { %v4641_v2 = vpop.f32.mrf.mxu1 }
 0x370   : > { %3647 = vst.msk [vmem:[%s6259_s11 + $0x1f8] sm:$0xff] %vm430_vm0, %v4641_v2 }
 0x371   : > { %v4613_v3 = vpop.f32.mrf.mxu0  ;;  %v3575_v51 = vpop.f32.mrf.mxu1 }
 0x372   : > { %3639 = vst.msk [vmem:[%s6259_s11 + $0x1b8] sm:$0xff] %vm430_vm0, %v4613_v3  ;;  %3646 = vst.msk [vmem:[%s6259_s11 + $0x1f0] sm:$0xff] %vm430_vm0, %v3575_v51 }
 0x373   : > { %v3446_v58 = vpop.f32.mrf.mxu0 }
 0x374   : > { %3638 = vst.msk [vmem:[%s6259_s11 + $0x1b0] sm:$0xff] %vm430_vm0, %v3446_v58 }
 0x375 PF: > { %s14_s15 = sadd.s32 1, %s4912_s15  }
 0x376   : > { %p11_p4 = scmp.ge.s32.totalorder %s14_s15, 10  }
 0x378   :  { %13 = sbr.rel (!%p11_p4) target bundleno = 1 (0x1), region = 72 }

// kernel: msa_block_forward.5
= control target key start
LH: loop header
LB: loop body
LE: loop exit
PB: predicated region body
PF: predicated region fallthrough
CT: control target
= control target key end

     0   :  { %8 = vsyncpa [#allocation3], 0  ;;  %s1519_s0 = inlined_call_operand.vmem [shape: f32[1024,128], index: 0, kind: input, shape index: {}]   ;;  %s1520_s1 = inlined_call_operand.vmem [shape: f32[128,128], index: 1, kind: input, shape index: {}]   ;;  %s1521_s2 = inlined_call_operand.vmem [shape: f32[1,128], index: 2, kind: input, shape index: {}]   ;;  %s1522_s3 = inlined_call_operand.hbm [shape: f32[1024,128], index: 3, kind: output, shape index: {}]  }
   0x1   :  { %10 = vsyncpa [#allocation3 + $0x1], 0  ;;  %s1164_s12 = smov 0   ;;  %s1166_s13 = smov 0  }
   0x2   :  { %s1168_s14 = smov 0   ;;  %s1170_s15 = smov 0  }
   0x3 LB: > { %s1185_s16 = sadd.s32 4294967295, %s1139_s15   ;;  %s784_s17 = sadd.s32 4294967294, %s1139_s15   ;;  %s1139_s15 = sphi %s1170_s15, %s1528_s15   ;;  %s1135_s14 = sphi %s1168_s14, %s1527_s14   ;;  %s1131_s13 = sphi %s1166_s13, %s1526_s13   ;;  %s1127_s12 = sphi %s1164_s12, %s1525_s12  }
   0x4   : > { %s1189_s18 = sadd.s32 1, %s1139_s15   ;;  %s91_s19 = sadd.s32 1, %s1135_s14 }
   0x5   : > { %s88_s20 = ssub.s32 %s1139_s15, %s1189_s18  ;;  %p101_p0 = scmp.ne.s32.totalorder %s1135_s14, %s1131_s13 }
   0x6   : > { %p89_p1 = scmp.eq.s32.totalorder %s88_s20, 0  ;;  %p102_p2 = scmp.eq.s32.totalorder %s1185_s16, 1 }
   0x7   : > { %p107_p3 = scmp.ne.s32.totalorder %s1131_s13, %s1127_s12  ;;  %p108_p4 = scmp.eq.s32.totalorder %s784_s17, 1 }
   0x8   : > { %s1200_s21 = scalar_select %p89_p1, %s1135_s14, %s91_s19  }
   0x9   : > { %p1202_p5 = por %p102_p2, %p101_p0  ;;  %p1206_p6 = por %p108_p4, %p107_p3 }
   0xa   : > { %p787_p7 = scmp.ge.s32.totalorder %s1139_s15, 1  ;;  %p141_p8 = scmp.lt.s32.totalorder %s1139_s15, 3 }
   0xc   : > { %p142_p9 = pnand %p787_p7, %p141_p8 }
   0xd   : > { %s789_s19 = sshll.u32 (!%p142_p9), %s1185_s16, 6  ;;  %s162_s25 = sand.u32 (!%p142_p9), 1, %s1131_s13  }
   0xe   : > { %145 = sbr.rel (%p142_p9) target bundleno = 324 (0x144), region = 32  ;;  %p166_p10 = scmp.lt.s32.totalorder (!%p142_p9), %s789_s19, 127 }
   0xf   : > { %s788_s26 = sshll.u32 (!%p142_p9), %s162_s25, 9  ;;  %s797_s30 = sshll.u32 (!%p142_p9), %s1185_s16, 13 }
  0x10   : > { %s1340_s29 = scalar_lea.vmem (!%p142_p9), [#allocation2], %s788_s26  ;;  %s1467_s7 = scalar_lea.hbm (!%p142_p9), %s1522_s3, %s797_s30 }
  0x11   : > { %s722_s4 = sshll.u32 (!%p142_p9), %s1340_s29, 4  ;;  %s1479_s16 = scalar_lea.sflag (!%p142_p9), [#allocation3], %s162_s25  ;;  %s1469_s4 = int_to_ptr.vmem [resolvable:$true] %s722_s4 }
  0x12   : > { %s1141_s9 = smov (!%p142_p9), [#allocation2]  }
  0x13   : > { %v251_v0 = vld [vmem:[%s1520_s1 + $0x78] sm:$0xff]  ;;  %v250_v1 = vld [vmem:[%s1520_s1 + $0x70] sm:$0xff]  ;;  %v249_v2 = vld [vmem:[%s1520_s1 + $0x68] sm:$0xff]  ;;  %s1530_s19 = smov (!%p166_p10, %s789_s19), 127  ;;  %s1083_s10 = sshll.u32 %s1141_s9, 4  ;;  %s1084_s10 = int_to_ptr.vmem [resolvable:$false] %s1083_s10 }
  0x14   : > { %878 = vmatprep.subr.mxu0 %v251_v0  ;;  %1006 = vmatprep.subr.mxu1 %v251_v0  ;;  %v248_v3 = vld [vmem:[%s1520_s1 + $0x60] sm:$0xff]  ;;  %v247_v4 = vld [vmem:[%s1520_s1 + $0x58] sm:$0xff]  ;;  %v246_v5 = vld [vmem:[%s1520_s1 + $0x50] sm:$0xff]  ;;  %s790_s8 = sshll.u32 %s1530_s19, 3  ;;  %s1085_s11 = scalar_lea.vmem %s1084_s10, 16384 }
  0x15   : > { %879 = vmatpush3.msra.mxu0 %v251_v0  ;;  %1022 = vmatpush3.msra.mxu1 %v251_v0  ;;  %v245_v6 = vld [vmem:[%s1520_s1 + $0x48] sm:$0xff]  ;;  %v244_v7 = vld [vmem:[%s1520_s1 + $0x40] sm:$0xff]  ;;  %v243_v8 = vld [vmem:[%s1520_s1 + $0x38] sm:$0xff]  ;;  %s1261_s20 = scalar_lea.vmem %s1519_s0, %s790_s8  ;;  %s1079_s8 = scalar_lea.vmem %s1469_s4, 8192 }
  0x16   : > { %880 = vmatprep.subr.mxu0 %v250_v1  ;;  %1007 = vmatprep.subr.mxu1 %v250_v1  ;;  %v242_v9 = vld [vmem:[%s1520_s1 + $0x30] sm:$0xff]  ;;  %v241_v10 = vld [vmem:[%s1520_s1 + $0x28] sm:$0xff]  ;;  %v240_v11 = vld [vmem:[%s1520_s1 + $0x20] sm:$0xff]  ;;  %p1080_p11 = scmp.ne.s32.totalorder %s1469_s4, %s1079_s8  ;;  %p1086_p0 = scmp.lt.s32.totalorder %s1469_s4, %s1084_s10 }
  0x17   : > { %881 = vmatpush3.msra.mxu0 %v250_v1  ;;  %1023 = vmatpush3.msra.mxu1 %v250_v1  ;;  %v239_v12 = vld [vmem:[%s1520_s1 + $0x18] sm:$0xff]  ;;  %v238_v13 = vld [vmem:[%s1520_s1 + $0x10] sm:$0xff]  ;;  %v237_v14 = vld [vmem:[%s1520_s1 + $0x8] sm:$0xff]  ;;  %p1087_p1 = scmp.lt.s32.totalorder %s1085_s11, %s1079_s8 }
  0x18   : > { %882 = vmatprep.subr.mxu0 %v249_v2  ;;  %1008 = vmatprep.subr.mxu1 %v249_v2  ;;  %v236_v15 = vld [vmem:[%s1520_s1] sm:$0xff]  ;;  %v173_v18 = vld [vmem:[%s1261_s20 + $0x8] sm:$0xff]  ;;  %v174_v20 = vld [vmem:[%s1261_s20 + $0x10] sm:$0xff]  ;;  %p1081_p12 = pnand %p1080_p11, %p1202_p5 }
  0x19   : > { %883 = vmatpush3.msra.mxu0 %v249_v2  ;;  %1024 = vmatpush3.msra.mxu1 %v249_v2  ;;  %v172_v16 = vld [vmem:[%s1261_s20] sm:$0xff]  ;;  %v205_v19 = vld [vmem:[%s1261_s20 + $0x108] sm:$0xff]  ;;  %v206_v21 = vld [vmem:[%s1261_s20 + $0x110] sm:$0xff]  ;;  %p1088_p2 = por %p1087_p1, %p1086_p0 }
  0x1a   : > { %884 = vmatprep.subr.mxu0 %v248_v3  ;;  %1009 = vmatprep.subr.mxu1 %v248_v3  ;;  %v204_v17 = vld [vmem:[%s1261_s20 + $0x100] sm:$0xff]  ;;  %v175_v22 = vld [vmem:[%s1261_s20 + $0x18] sm:$0xff]  ;;  %v177_v26 = vld [vmem:[%s1261_s20 + $0x28] sm:$0xff]  ;;  %p1082_p13 = pneg %p1081_p12 }
  0x1b   : > { %885 = vmatpush3.msra.mxu0 %v248_v3  ;;  %1025 = vmatpush3.msra.mxu1 %v248_v3  ;;  %v207_v23 = vld [vmem:[%s1261_s20 + $0x118] sm:$0xff]  ;;  %v176_v24 = vld [vmem:[%s1261_s20 + $0x20] sm:$0xff]  ;;  %v209_v27 = vld [vmem:[%s1261_s20 + $0x128] sm:$0xff] }
  0x1c   : > { %886 = vmatprep.subr.mxu0 %v247_v4  ;;  %1010 = vmatprep.subr.mxu1 %v247_v4  ;;  %v208_v25 = vld [vmem:[%s1261_s20 + $0x120] sm:$0xff]  ;;  %v178_v28 = vld [vmem:[%s1261_s20 + $0x30] sm:$0xff]  ;;  %v179_v30 = vld [vmem:[%s1261_s20 + $0x38] sm:$0xff]  ;;  %p1089_p3 = pnand %p1088_p2, %p1082_p13 }
  0x1d   : > { %887 = vmatpush3.msra.mxu0 %v247_v4  ;;  %1026 = vmatpush3.msra.mxu1 %v247_v4  ;;  %v210_v29 = vld [vmem:[%s1261_s20 + $0x130] sm:$0xff]  ;;  %v211_v31 = vld [vmem:[%s1261_s20 + $0x138] sm:$0xff]  ;;  %v180_v32 = vld [vmem:[%s1261_s20 + $0x40] sm:$0xff] }
  0x1e   : > { %888 = vmatprep.subr.mxu0 %v246_v5  ;;  %1011 = vmatprep.subr.mxu1 %v246_v5  ;;  %v212_v33 = vld [vmem:[%s1261_s20 + $0x140] sm:$0xff]  ;;  %v181_v34 = vld [vmem:[%s1261_s20 + $0x48] sm:$0xff]  ;;  %v182_v36 = vld [vmem:[%s1261_s20 + $0x50] sm:$0xff] }
  0x1f   : > { %889 = vmatpush3.msra.mxu0 %v246_v5  ;;  %1027 = vmatpush3.msra.mxu1 %v246_v5  ;;  %v213_v35 = vld [vmem:[%s1261_s20 + $0x148] sm:$0xff]  ;;  %v214_v37 = vld [vmem:[%s1261_s20 + $0x150] sm:$0xff]  ;;  %v183_v38 = vld [vmem:[%s1261_s20 + $0x58] sm:$0xff] }
  0x20   : > { %890 = vmatprep.subr.mxu0 %v245_v6  ;;  %1012 = vmatprep.subr.mxu1 %v245_v6  ;;  %v215_v39 = vld [vmem:[%s1261_s20 + $0x158] sm:$0xff]  ;;  %v184_v40 = vld [vmem:[%s1261_s20 + $0x60] sm:$0xff]  ;;  %v185_v42 = vld [vmem:[%s1261_s20 + $0x68] sm:$0xff] }
  0x21   : > { %891 = vmatpush3.msra.mxu0 %v245_v6  ;;  %1028 = vmatpush3.msra.mxu1 %v245_v6  ;;  %v216_v41 = vld [vmem:[%s1261_s20 + $0x160] sm:$0xff]  ;;  %v217_v43 = vld [vmem:[%s1261_s20 + $0x168] sm:$0xff]  ;;  %v186_v44 = vld [vmem:[%s1261_s20 + $0x70] sm:$0xff] }
  0x22   : > { %892 = vmatprep.subr.mxu0 %v244_v7  ;;  %1013 = vmatprep.subr.mxu1 %v244_v7  ;;  %v218_v45 = vld [vmem:[%s1261_s20 + $0x170] sm:$0xff]  ;;  %v187_v46 = vld [vmem:[%s1261_s20 + $0x78] sm:$0xff]  ;;  %v188_v48 = vld [vmem:[%s1261_s20 + $0x80] sm:$0xff] }
  0x23   : > { %893 = vmatpush3.msra.mxu0 %v244_v7  ;;  %1029 = vmatpush3.msra.mxu1 %v244_v7  ;;  %v219_v47 = vld [vmem:[%s1261_s20 + $0x178] sm:$0xff]  ;;  %v220_v49 = vld [vmem:[%s1261_s20 + $0x180] sm:$0xff]  ;;  %v189_v50 = vld [vmem:[%s1261_s20 + $0x88] sm:$0xff] }
  0x24   : > { %894 = vmatprep.subr.mxu0 %v243_v8  ;;  %1014 = vmatprep.subr.mxu1 %v243_v8  ;;  %v221_v51 = vld [vmem:[%s1261_s20 + $0x188] sm:$0xff]  ;;  %v190_v52 = vld [vmem:[%s1261_s20 + $0x90] sm:$0xff]  ;;  %v191_v54 = vld [vmem:[%s1261_s20 + $0x98] sm:$0xff] }
  0x25   : > { %895 = vmatpush3.msra.mxu0 %v243_v8  ;;  %1030 = vmatpush3.msra.mxu1 %v243_v8  ;;  %v222_v53 = vld [vmem:[%s1261_s20 + $0x190] sm:$0xff]  ;;  %v223_v55 = vld [vmem:[%s1261_s20 + $0x198] sm:$0xff]  ;;  %v192_v56 = vld [vmem:[%s1261_s20 + $0xa0] sm:$0xff] }
  0x26   : > { %896 = vmatprep.subr.mxu0 %v242_v9  ;;  %1015 = vmatprep.subr.mxu1 %v242_v9  ;;  %v224_v57 = vld [vmem:[%s1261_s20 + $0x1a0] sm:$0xff]  ;;  %v193_v58 = vld [vmem:[%s1261_s20 + $0xa8] sm:$0xff]  ;;  %v194_v60 = vld [vmem:[%s1261_s20 + $0xb0] sm:$0xff] }
  0x27   : > { %897 = vmatpush3.msra.mxu0 %v242_v9  ;;  %1031 = vmatpush3.msra.mxu1 %v242_v9  ;;  %v225_v59 = vld [vmem:[%s1261_s20 + $0x1a8] sm:$0xff]  ;;  %v226_v61 = vld [vmem:[%s1261_s20 + $0x1b0] sm:$0xff]  ;;  %v195_v62 = vld [vmem:[%s1261_s20 + $0xb8] sm:$0xff] }
  0x28   : > { %898 = vmatprep.subr.mxu0 %v241_v10  ;;  %1016 = vmatprep.subr.mxu1 %v241_v10  ;;  %v227_v63 = vld [vmem:[%s1261_s20 + $0x1b8] sm:$0xff]  ;;  %v196_v0 = vld [vmem:[%s1261_s20 + $0xc0] sm:$0xff]  ;;  %v197_v2 = vld [vmem:[%s1261_s20 + $0xc8] sm:$0xff] }
  0x29   : > { %899 = vmatpush3.msra.mxu0 %v241_v10  ;;  %1032 = vmatpush3.msra.mxu1 %v241_v10  ;;  %v228_v1 = vld [vmem:[%s1261_s20 + $0x1c0] sm:$0xff]  ;;  %v229_v3 = vld [vmem:[%s1261_s20 + $0x1c8] sm:$0xff]  ;;  %v198_v4 = vld [vmem:[%s1261_s20 + $0xd0] sm:$0xff] }
  0x2a   : > { %900 = vmatprep.subr.mxu0 %v240_v11  ;;  %1017 = vmatprep.subr.mxu1 %v240_v11  ;;  %v230_v5 = vld [vmem:[%s1261_s20 + $0x1d0] sm:$0xff]  ;;  %v199_v6 = vld [vmem:[%s1261_s20 + $0xd8] sm:$0xff]  ;;  %v200_v8 = vld [vmem:[%s1261_s20 + $0xe0] sm:$0xff] }
  0x2b   : > { %901 = vmatpush3.msra.mxu0 %v240_v11  ;;  %1033 = vmatpush3.msra.mxu1 %v240_v11  ;;  %v231_v7 = vld [vmem:[%s1261_s20 + $0x1d8] sm:$0xff]  ;;  %v232_v9 = vld [vmem:[%s1261_s20 + $0x1e0] sm:$0xff]  ;;  %v201_v10 = vld [vmem:[%s1261_s20 + $0xe8] sm:$0xff] }
  0x2c   : > { %902 = vmatprep.subr.mxu0 %v239_v12  ;;  %1018 = vmatprep.subr.mxu1 %v239_v12  ;;  %v233_v11 = vld [vmem:[%s1261_s20 + $0x1e8] sm:$0xff] }
  0x2d   : > { %903 = vmatpush3.msra.mxu0 %v239_v12  ;;  %1034 = vmatpush3.msra.mxu1 %v239_v12  ;;  %v202_v12 = vld [vmem:[%s1261_s20 + $0xf0] sm:$0xff] }
  0x2e   : > { %904 = vmatprep.subr.mxu0 %v238_v13  ;;  %1019 = vmatprep.subr.mxu1 %v238_v13 }
  0x2f   : > { %905 = vmatpush3.msra.mxu0 %v238_v13  ;;  %1035 = vmatpush3.msra.mxu1 %v238_v13  ;;  %v234_v13 = vld [vmem:[%s1261_s20 + $0x1f0] sm:$0xff] }
  0x30   : > { %906 = vmatprep.subr.mxu0 %v237_v14  ;;  %1020 = vmatprep.subr.mxu1 %v237_v14 }
  0x31   : > { %907 = vmatpush3.msra.mxu0 %v237_v14  ;;  %1036 = vmatpush3.msra.mxu1 %v237_v14  ;;  %v203_v14 = vld [vmem:[%s1261_s20 + $0xf8] sm:$0xff] }
  0x32   : > { %908 = vmatprep.subr.mxu0 %v236_v15  ;;  %1021 = vmatprep.subr.mxu1 %v236_v15 }
  0x33   : > { %909 = vmatpush3.msra.mxu0 %v236_v15  ;;  %1037 = vmatpush3.msra.mxu1 %v236_v15  ;;  %v235_v15 = vld [vmem:[%s1261_s20 + $0x1f8] sm:$0xff] }
  0x34   : > { %910 = vmatprep.mubr.f32.mxu0 %v172_v16  ;;  %958 = vmatprep.mubr.f32.mxu1 %v204_v17  ;;  %v1336_v16 = vld [vmem:[%s1521_s2] ss:$0 sm:$0xff] }
  0x35   : > { %911 = vmatmul.mubr.f32.vlgmr.msra.gmra.mxu0 %v173_v18  ;;  %959 = vmatmul.mubr.f32.vlgmr.msra.gmra.mxu1 %v205_v19 }
  0x36   : > { %913 = vmatprep.mubr.f32.mxu0 %v174_v20  ;;  %961 = vmatprep.mubr.f32.mxu1 %v206_v21 }
  0x39   : > { %914 = vmatmul.mubr.f32.gmra.mxu0 %v175_v22  ;;  %962 = vmatmul.mubr.f32.gmra.mxu1 %v207_v23 }
  0x3a   : > { %916 = vmatprep.mubr.f32.mxu0 %v176_v24  ;;  %964 = vmatprep.mubr.f32.mxu1 %v208_v25 }
  0x3d   : > { %917 = vmatmul.mubr.f32.gmra.mxu0 %v177_v26  ;;  %965 = vmatmul.mubr.f32.gmra.mxu1 %v209_v27 }
  0x3e   : > { %919 = vmatprep.mubr.f32.mxu0 %v178_v28  ;;  %967 = vmatprep.mubr.f32.mxu1 %v210_v29 }
  0x41   : > { %920 = vmatmul.mubr.f32.gmra.mxu0 %v179_v30  ;;  %968 = vmatmul.mubr.f32.gmra.mxu1 %v211_v31 }
  0x42   : > { %922 = vmatprep.mubr.f32.mxu0 %v180_v32  ;;  %970 = vmatprep.mubr.f32.mxu1 %v212_v33 }
  0x45   : > { %923 = vmatmul.mubr.f32.gmra.mxu0 %v181_v34  ;;  %971 = vmatmul.mubr.f32.gmra.mxu1 %v213_v35 }
  0x46   : > { %925 = vmatprep.mubr.f32.mxu0 %v182_v36  ;;  %973 = vmatprep.mubr.f32.mxu1 %v214_v37 }
  0x49   : > { %926 = vmatmul.mubr.f32.gmra.mxu0 %v183_v38  ;;  %974 = vmatmul.mubr.f32.gmra.mxu1 %v215_v39 }
  0x4a   : > { %928 = vmatprep.mubr.f32.mxu0 %v184_v40  ;;  %976 = vmatprep.mubr.f32.mxu1 %v216_v41 }
  0x4d   : > { %929 = vmatmul.mubr.f32.gmra.mxu0 %v185_v42  ;;  %977 = vmatmul.mubr.f32.gmra.mxu1 %v217_v43 }
  0x4e   : > { %931 = vmatprep.mubr.f32.mxu0 %v186_v44  ;;  %979 = vmatprep.mubr.f32.mxu1 %v218_v45 }
  0x51   : > { %932 = vmatmul.mubr.f32.gmra.mxu0 %v187_v46  ;;  %980 = vmatmul.mubr.f32.gmra.mxu1 %v219_v47 }
  0x52   : > { %934 = vmatprep.mubr.f32.mxu0 %v188_v48  ;;  %982 = vmatprep.mubr.f32.mxu1 %v220_v49 }
  0x55   : > { %935 = vmatmul.mubr.f32.gmra.mxu0 %v189_v50  ;;  %983 = vmatmul.mubr.f32.gmra.mxu1 %v221_v51 }
  0x56   : > { %937 = vmatprep.mubr.f32.mxu0 %v190_v52  ;;  %985 = vmatprep.mubr.f32.mxu1 %v222_v53 }
  0x59   : > { %938 = vmatmul.mubr.f32.gmra.mxu0 %v191_v54  ;;  %986 = vmatmul.mubr.f32.gmra.mxu1 %v223_v55 }
  0x5a   : > { %940 = vmatprep.mubr.f32.mxu0 %v192_v56  ;;  %988 = vmatprep.mubr.f32.mxu1 %v224_v57 }
  0x5d   : > { %941 = vmatmul.mubr.f32.gmra.mxu0 %v193_v58  ;;  %989 = vmatmul.mubr.f32.gmra.mxu1 %v225_v59 }
  0x5e   : > { %943 = vmatprep.mubr.f32.mxu0 %v194_v60  ;;  %991 = vmatprep.mubr.f32.mxu1 %v226_v61 }
  0x61   : > { %944 = vmatmul.mubr.f32.gmra.mxu0 %v195_v62  ;;  %992 = vmatmul.mubr.f32.gmra.mxu1 %v227_v63 }
  0x62   : > { %946 = vmatprep.mubr.f32.mxu0 %v196_v0  ;;  %994 = vmatprep.mubr.f32.mxu1 %v228_v1 }
  0x65   : > { %947 = vmatmul.mubr.f32.gmra.mxu0 %v197_v2  ;;  %995 = vmatmul.mubr.f32.gmra.mxu1 %v229_v3 }
  0x66   : > { %949 = vmatprep.mubr.f32.mxu0 %v198_v4  ;;  %997 = vmatprep.mubr.f32.mxu1 %v230_v5 }
  0x69   : > { %950 = vmatmul.mubr.f32.gmra.mxu0 %v199_v6  ;;  %998 = vmatmul.mubr.f32.gmra.mxu1 %v231_v7 }
  0x6a   : > { %952 = vmatprep.mubr.f32.mxu0 %v200_v8  ;;  %1000 = vmatprep.mubr.f32.mxu1 %v232_v9 }
  0x6d   : > { %953 = vmatmul.mubr.f32.gmra.mxu0 %v201_v10  ;;  %1001 = vmatmul.mubr.f32.gmra.mxu1 %v233_v11 }
  0x6e   : > { %955 = vmatprep.mubr.f32.mxu0 %v202_v12  ;;  %1003 = vmatprep.mubr.f32.mxu1 %v234_v13 }
  0x71   : > { %956 = vmatmul.mubr.f32.gmra.mxu0 %v203_v14  ;;  %1004 = vmatmul.mubr.f32.gmra.mxu1 %v235_v15 }
  0xf5   : > { %v912_v17 = vpop.f32.mrf.mxu0  ;;  %v960_v18 = vpop.f32.mrf.mxu1 }
  0xf6   : > { %v331_v19 = vadd.f32 %v912_v17, %v1336_v16  ;;  %v491_v20 = vadd.f32 %v960_v18, %v1336_v16 }
  0xf7   : > { %v325_v21 = vpop.f32.mrf.mxu0  ;;  %v485_v22 = vpop.f32.mrf.mxu1 }
  0xf8   : > { %645 = vst [vmem:[%s1340_s29 + $0x8] sm:$0xff] %v331_v19  ;;  %677 = vst [vmem:[%s1340_s29 + $0x108] sm:$0xff] %v491_v20  ;;  %v326_v23 = vadd.f32 %v1336_v16, %v325_v21  ;;  %v486_v24 = vadd.f32 %v1336_v16, %v485_v22 }
  0xf9   : > { %v915_v25 = vpop.f32.mrf.mxu0  ;;  %v963_v26 = vpop.f32.mrf.mxu1 }
  0xfa   : > { %644 = vst [vmem:[%s1340_s29] sm:$0xff] %v326_v23  ;;  %676 = vst [vmem:[%s1340_s29 + $0x100] sm:$0xff] %v486_v24  ;;  %v341_v27 = vadd.f32 %v915_v25, %v1336_v16  ;;  %v501_v28 = vadd.f32 %v963_v26, %v1336_v16 }
  0xfb   : > { %v335_v29 = vpop.f32.mrf.mxu0  ;;  %v495_v30 = vpop.f32.mrf.mxu1 }
  0xfc   : > { %647 = vst [vmem:[%s1340_s29 + $0x18] sm:$0xff] %v341_v27  ;;  %679 = vst [vmem:[%s1340_s29 + $0x118] sm:$0xff] %v501_v28  ;;  %v336_v31 = vadd.f32 %v1336_v16, %v335_v29  ;;  %v496_v32 = vadd.f32 %v1336_v16, %v495_v30 }
  0xfd   : > { %v918_v33 = vpop.f32.mrf.mxu0  ;;  %v966_v34 = vpop.f32.mrf.mxu1 }
  0xfe   : > { %646 = vst [vmem:[%s1340_s29 + $0x10] sm:$0xff] %v336_v31  ;;  %678 = vst [vmem:[%s1340_s29 + $0x110] sm:$0xff] %v496_v32  ;;  %v351_v35 = vadd.f32 %v918_v33, %v1336_v16  ;;  %v511_v36 = vadd.f32 %v966_v34, %v1336_v16 }
  0xff   : > { %v345_v37 = vpop.f32.mrf.mxu0  ;;  %v505_v38 = vpop.f32.mrf.mxu1 }
 0x100   : > { %649 = vst [vmem:[%s1340_s29 + $0x28] sm:$0xff] %v351_v35  ;;  %681 = vst [vmem:[%s1340_s29 + $0x128] sm:$0xff] %v511_v36  ;;  %v346_v39 = vadd.f32 %v1336_v16, %v345_v37  ;;  %v506_v40 = vadd.f32 %v1336_v16, %v505_v38 }
 0x101   : > { %v921_v41 = vpop.f32.mrf.mxu0  ;;  %v969_v42 = vpop.f32.mrf.mxu1 }
 0x102   : > { %648 = vst [vmem:[%s1340_s29 + $0x20] sm:$0xff] %v346_v39  ;;  %680 = vst [vmem:[%s1340_s29 + $0x120] sm:$0xff] %v506_v40  ;;  %v361_v43 = vadd.f32 %v921_v41, %v1336_v16  ;;  %v521_v44 = vadd.f32 %v969_v42, %v1336_v16 }
 0x103   : > { %v355_v45 = vpop.f32.mrf.mxu0  ;;  %v515_v46 = vpop.f32.mrf.mxu1 }
 0x104   : > { %651 = vst [vmem:[%s1340_s29 + $0x38] sm:$0xff] %v361_v43  ;;  %683 = vst [vmem:[%s1340_s29 + $0x138] sm:$0xff] %v521_v44  ;;  %v356_v47 = vadd.f32 %v1336_v16, %v355_v45  ;;  %v516_v48 = vadd.f32 %v1336_v16, %v515_v46 }
 0x105   : > { %v924_v49 = vpop.f32.mrf.mxu0  ;;  %v972_v50 = vpop.f32.mrf.mxu1 }
 0x106   : > { %650 = vst [vmem:[%s1340_s29 + $0x30] sm:$0xff] %v356_v47  ;;  %682 = vst [vmem:[%s1340_s29 + $0x130] sm:$0xff] %v516_v48  ;;  %v371_v51 = vadd.f32 %v924_v49, %v1336_v16  ;;  %v531_v52 = vadd.f32 %v972_v50, %v1336_v16 }
 0x107   : > { %v365_v53 = vpop.f32.mrf.mxu0  ;;  %v525_v54 = vpop.f32.mrf.mxu1 }
 0x108   : > { %653 = vst [vmem:[%s1340_s29 + $0x48] sm:$0xff] %v371_v51  ;;  %685 = vst [vmem:[%s1340_s29 + $0x148] sm:$0xff] %v531_v52  ;;  %v366_v55 = vadd.f32 %v1336_v16, %v365_v53  ;;  %v526_v56 = vadd.f32 %v1336_v16, %v525_v54 }
 0x109   : > { %v927_v57 = vpop.f32.mrf.mxu0  ;;  %v975_v58 = vpop.f32.mrf.mxu1 }
 0x10a   : > { %652 = vst [vmem:[%s1340_s29 + $0x40] sm:$0xff] %v366_v55  ;;  %684 = vst [vmem:[%s1340_s29 + $0x140] sm:$0xff] %v526_v56  ;;  %v381_v59 = vadd.f32 %v927_v57, %v1336_v16  ;;  %v541_v60 = vadd.f32 %v975_v58, %v1336_v16 }
 0x10b   : > { %v375_v61 = vpop.f32.mrf.mxu0  ;;  %v535_v62 = vpop.f32.mrf.mxu1 }
 0x10c   : > { %655 = vst [vmem:[%s1340_s29 + $0x58] sm:$0xff] %v381_v59  ;;  %687 = vst [vmem:[%s1340_s29 + $0x158] sm:$0xff] %v541_v60  ;;  %v376_v63 = vadd.f32 %v1336_v16, %v375_v61  ;;  %v536_v0 = vadd.f32 %v1336_v16, %v535_v62 }
 0x10d   : > { %v930_v1 = vpop.f32.mrf.mxu0  ;;  %v978_v2 = vpop.f32.mrf.mxu1 }
 0x10e   : > { %654 = vst [vmem:[%s1340_s29 + $0x50] sm:$0xff] %v376_v63  ;;  %686 = vst [vmem:[%s1340_s29 + $0x150] sm:$0xff] %v536_v0  ;;  %v391_v3 = vadd.f32 %v930_v1, %v1336_v16  ;;  %v551_v4 = vadd.f32 %v978_v2, %v1336_v16 }
 0x10f   : > { %v385_v5 = vpop.f32.mrf.mxu0  ;;  %v545_v6 = vpop.f32.mrf.mxu1 }
 0x110   : > { %657 = vst [vmem:[%s1340_s29 + $0x68] sm:$0xff] %v391_v3  ;;  %689 = vst [vmem:[%s1340_s29 + $0x168] sm:$0xff] %v551_v4  ;;  %v386_v7 = vadd.f32 %v1336_v16, %v385_v5  ;;  %v546_v8 = vadd.f32 %v1336_v16, %v545_v6 }
 0x111   : > { %v933_v9 = vpop.f32.mrf.mxu0  ;;  %v981_v10 = vpop.f32.mrf.mxu1 }
 0x112   : > { %656 = vst [vmem:[%s1340_s29 + $0x60] sm:$0xff] %v386_v7  ;;  %688 = vst [vmem:[%s1340_s29 + $0x160] sm:$0xff] %v546_v8  ;;  %v401_v11 = vadd.f32 %v933_v9, %v1336_v16  ;;  %v561_v12 = vadd.f32 %v981_v10, %v1336_v16 }
 0x113   : > { %v395_v13 = vpop.f32.mrf.mxu0  ;;  %v555_v14 = vpop.f32.mrf.mxu1 }
 0x114   : > { %659 = vst [vmem:[%s1340_s29 + $0x78] sm:$0xff] %v401_v11  ;;  %691 = vst [vmem:[%s1340_s29 + $0x178] sm:$0xff] %v561_v12  ;;  %v396_v15 = vadd.f32 %v1336_v16, %v395_v13  ;;  %v556_v17 = vadd.f32 %v1336_v16, %v555_v14 }
 0x115   : > { %v936_v18 = vpop.f32.mrf.mxu0  ;;  %v984_v19 = vpop.f32.mrf.mxu1 }
 0x116   : > { %658 = vst [vmem:[%s1340_s29 + $0x70] sm:$0xff] %v396_v15  ;;  %690 = vst [vmem:[%s1340_s29 + $0x170] sm:$0xff] %v556_v17  ;;  %v411_v20 = vadd.f32 %v936_v18, %v1336_v16  ;;  %v571_v21 = vadd.f32 %v984_v19, %v1336_v16 }
 0x117   : > { %v405_v22 = vpop.f32.mrf.mxu0  ;;  %v565_v23 = vpop.f32.mrf.mxu1 }
 0x118   : > { %661 = vst [vmem:[%s1340_s29 + $0x88] sm:$0xff] %v411_v20  ;;  %693 = vst [vmem:[%s1340_s29 + $0x188] sm:$0xff] %v571_v21  ;;  %v406_v24 = vadd.f32 %v1336_v16, %v405_v22  ;;  %v566_v25 = vadd.f32 %v1336_v16, %v565_v23 }
 0x119   : > { %v939_v26 = vpop.f32.mrf.mxu0  ;;  %v987_v27 = vpop.f32.mrf.mxu1 }
 0x11a   : > { %660 = vst [vmem:[%s1340_s29 + $0x80] sm:$0xff] %v406_v24  ;;  %692 = vst [vmem:[%s1340_s29 + $0x180] sm:$0xff] %v566_v25  ;;  %v421_v28 = vadd.f32 %v939_v26, %v1336_v16  ;;  %v581_v29 = vadd.f32 %v987_v27, %v1336_v16 }
 0x11b   : > { %v415_v30 = vpop.f32.mrf.mxu0  ;;  %v575_v31 = vpop.f32.mrf.mxu1 }
 0x11c   : > { %663 = vst [vmem:[%s1340_s29 + $0x98] sm:$0xff] %v421_v28  ;;  %695 = vst [vmem:[%s1340_s29 + $0x198] sm:$0xff] %v581_v29  ;;  %v416_v32 = vadd.f32 %v1336_v16, %v415_v30  ;;  %v576_v33 = vadd.f32 %v1336_v16, %v575_v31 }
 0x11d   : > { %v942_v34 = vpop.f32.mrf.mxu0  ;;  %v990_v35 = vpop.f32.mrf.mxu1 }
 0x11e   : > { %662 = vst [vmem:[%s1340_s29 + $0x90] sm:$0xff] %v416_v32  ;;  %694 = vst [vmem:[%s1340_s29 + $0x190] sm:$0xff] %v576_v33  ;;  %v431_v36 = vadd.f32 %v942_v34, %v1336_v16  ;;  %v591_v37 = vadd.f32 %v990_v35, %v1336_v16 }
 0x11f   : > { %v425_v38 = vpop.f32.mrf.mxu0  ;;  %v585_v39 = vpop.f32.mrf.mxu1 }
 0x120   : > { %665 = vst [vmem:[%s1340_s29 + $0xa8] sm:$0xff] %v431_v36  ;;  %697 = vst [vmem:[%s1340_s29 + $0x1a8] sm:$0xff] %v591_v37  ;;  %v426_v40 = vadd.f32 %v1336_v16, %v425_v38  ;;  %v586_v41 = vadd.f32 %v1336_v16, %v585_v39 }
 0x121   : > { %v945_v42 = vpop.f32.mrf.mxu0  ;;  %v993_v43 = vpop.f32.mrf.mxu1 }
 0x122   : > { %664 = vst [vmem:[%s1340_s29 + $0xa0] sm:$0xff] %v426_v40  ;;  %696 = vst [vmem:[%s1340_s29 + $0x1a0] sm:$0xff] %v586_v41  ;;  %v441_v44 = vadd.f32 %v945_v42, %v1336_v16  ;;  %v601_v45 = vadd.f32 %v993_v43, %v1336_v16 }
 0x123   : > { %v435_v46 = vpop.f32.mrf.mxu0  ;;  %v595_v47 = vpop.f32.mrf.mxu1 }
 0x124   : > { %667 = vst [vmem:[%s1340_s29 + $0xb8] sm:$0xff] %v441_v44  ;;  %699 = vst [vmem:[%s1340_s29 + $0x1b8] sm:$0xff] %v601_v45  ;;  %v436_v48 = vadd.f32 %v1336_v16, %v435_v46  ;;  %v596_v49 = vadd.f32 %v1336_v16, %v595_v47 }
 0x125   : > { %v948_v50 = vpop.f32.mrf.mxu0  ;;  %v996_v51 = vpop.f32.mrf.mxu1 }
 0x126   : > { %666 = vst [vmem:[%s1340_s29 + $0xb0] sm:$0xff] %v436_v48  ;;  %698 = vst [vmem:[%s1340_s29 + $0x1b0] sm:$0xff] %v596_v49  ;;  %v451_v52 = vadd.f32 %v948_v50, %v1336_v16  ;;  %v611_v53 = vadd.f32 %v996_v51, %v1336_v16 }
 0x127   : > { %v445_v54 = vpop.f32.mrf.mxu0  ;;  %v605_v55 = vpop.f32.mrf.mxu1 }
 0x128   : > { %669 = vst [vmem:[%s1340_s29 + $0xc8] sm:$0xff] %v451_v52  ;;  %701 = vst [vmem:[%s1340_s29 + $0x1c8] sm:$0xff] %v611_v53  ;;  %v446_v56 = vadd.f32 %v1336_v16, %v445_v54  ;;  %v606_v57 = vadd.f32 %v1336_v16, %v605_v55 }
 0x129   : > { %v951_v58 = vpop.f32.mrf.mxu0  ;;  %v999_v59 = vpop.f32.mrf.mxu1 }
 0x12a   : > { %668 = vst [vmem:[%s1340_s29 + $0xc0] sm:$0xff] %v446_v56  ;;  %700 = vst [vmem:[%s1340_s29 + $0x1c0] sm:$0xff] %v606_v57  ;;  %v461_v60 = vadd.f32 %v951_v58, %v1336_v16  ;;  %v621_v61 = vadd.f32 %v999_v59, %v1336_v16 }
 0x12b   : > { %v455_v62 = vpop.f32.mrf.mxu0  ;;  %v615_v63 = vpop.f32.mrf.mxu1 }
 0x12c   : > { %671 = vst [vmem:[%s1340_s29 + $0xd8] sm:$0xff] %v461_v60  ;;  %703 = vst [vmem:[%s1340_s29 + $0x1d8] sm:$0xff] %v621_v61  ;;  %v456_v0 = vadd.f32 %v1336_v16, %v455_v62  ;;  %v616_v1 = vadd.f32 %v1336_v16, %v615_v63 }
 0x12d   : > { %v954_v2 = vpop.f32.mrf.mxu0  ;;  %v1002_v3 = vpop.f32.mrf.mxu1 }
 0x12e   : > { %670 = vst [vmem:[%s1340_s29 + $0xd0] sm:$0xff] %v456_v0  ;;  %702 = vst [vmem:[%s1340_s29 + $0x1d0] sm:$0xff] %v616_v1  ;;  %v471_v4 = vadd.f32 %v954_v2, %v1336_v16  ;;  %v631_v5 = vadd.f32 %v1002_v3, %v1336_v16 }
 0x12f   : > { %v465_v6 = vpop.f32.mrf.mxu0  ;;  %v625_v7 = vpop.f32.mrf.mxu1 }
 0x130   : > { %673 = vst [vmem:[%s1340_s29 + $0xe8] sm:$0xff] %v471_v4  ;;  %705 = vst [vmem:[%s1340_s29 + $0x1e8] sm:$0xff] %v631_v5  ;;  %v466_v8 = vadd.f32 %v1336_v16, %v465_v6  ;;  %v626_v9 = vadd.f32 %v1336_v16, %v625_v7 }
 0x131   : > { %v957_v10 = vpop.f32.mrf.mxu0  ;;  %v1005_v11 = vpop.f32.mrf.mxu1 }
 0x132   : > { %672 = vst [vmem:[%s1340_s29 + $0xe0] sm:$0xff] %v466_v8  ;;  %704 = vst [vmem:[%s1340_s29 + $0x1e0] sm:$0xff] %v626_v9  ;;  %v481_v12 = vadd.f32 %v957_v10, %v1336_v16  ;;  %v641_v13 = vadd.f32 %v1005_v11, %v1336_v16 }
 0x133   : > { %v475_v14 = vpop.f32.mrf.mxu0  ;;  %v635_v15 = vpop.f32.mrf.mxu1 }
 0x134   : > { %675 = vst [vmem:[%s1340_s29 + $0xf8] sm:$0xff] %v481_v12  ;;  %707 = vst [vmem:[%s1340_s29 + $0x1f8] sm:$0xff] %v641_v13  ;;  %v476_v17 = vadd.f32 %v1336_v16, %v475_v14  ;;  %v636_v18 = vadd.f32 %v1336_v16, %v635_v15 }
 0x136   : > { %674 = vst [vmem:[%s1340_s29 + $0xf0] sm:$0xff] %v476_v17  ;;  %706 = vst [vmem:[%s1340_s29 + $0x1f0] sm:$0xff] %v636_v18 }
 0x137   : > { %1092 = shalt.err (!%p1089_p3)
}
 0x138   : > { %s1093_s17 = scalar_lea.hbm %s1467_s7, 8192  ;;  %s1097_s24 = scalar_lea.hbm %s1522_s3, 16384 }
 0x139   : > { %p1094_p4 = scmp.ne.s32.totalorder %s1467_s7, %s1093_s17  ;;  %p1098_p9 = scmp.lt.s32.totalorder %s1467_s7, %s1522_s3 }
 0x13a   : > { %p1099_p10 = scmp.lt.s32.totalorder %s1097_s24, %s1093_s17 }
 0x13b   : > { %p1095_p7 = pnand %p1094_p4, %p1202_p5 }
 0x13c   : > { %p1100_p11 = por %p1099_p10, %p1098_p9 }
 0x13d   : > { %p1096_p8 = pneg %p1095_p7 }
 0x13f   : > { %p1101_p12 = pnand %p1100_p11, %p1096_p8 }
 0x141   : > { %1104 = shalt.err (!%p1101_p12)
}
 0x142   : > { %s1142_s27 = smov 128   ;;  %s1143_s28 = smov 8  }
 0x143   : > { %1038 = dma.vmem_to_hbm [thread:$0]  (%p1202_p5), %s1469_s4, 8192, %s1467_s7, %s1479_s16, %s1142_s27, %s1142_s27, %s1143_s28  }
 0x144 PF: > { %p1044_p13 = scmp.ge.s32.totalorder %s1139_s15, 2  ;;  %s737_s29 = sand.u32 1, %s1127_s12  }
 0x145   : > { %s738_s30 = scalar_lea.sflag [#allocation3], %s737_s29 }
 0x146   : > { %p1041_p0 = pnand %p1044_p13, %p1206_p6 }
 0x148   : > { %p1042_p1 = pneg %p1041_p0 }
 0x14a   : > { %1122 = dma.done.wait (%p1042_p1), %s738_s30, 8192  }
 0x14b   : > { %1124 = vsyncadd (%p1042_p1), %s738_s30, 4294959104  ;;  %p13_p2 = scmp.ge.s32.totalorder %s1189_s18, 4   ;;  %s1525_s12 = smov %s1131_s13 }
 0x14c   : > { %s1526_s13 = smov %s1135_s14  ;;  %s1527_s14 = smov %s1200_s21 }
 0x14d   : > { %s1528_s15 = smov %s1189_s18  ;;  %15 = sbr.rel (!%p13_p2) target bundleno = 3 (0x3), region = 67 }
 0x152   :  { %743 = vsyncpa [#allocation3], 1 }
 0x153   :  { %745 = vsyncpa [#allocation3 + $0x1], 1 }

</bundles_post_ra>
